<compile_context>
chip_gen: v7x
topology: tpu7x:2x2x1
jax: 0.10.0
libtpu: 0.0.40
codegen_flags: <defaults>
</compile_context>

<pallas_src>
import functools
import math

import jax
import jax.numpy as jnp
import numpy as np
from jax.experimental import pallas as pl
from jax.experimental.pallas import tpu as pltpu


# ---------------------------------------------------------------------------
# Fused kernel: build RHS once per sample, then per channel-block:
#   conv (single MXU dot) -> GroupNorm (block-local groups) -> SiLU -> store.
# ---------------------------------------------------------------------------
def _conv_gn_silu_kernel(x_ref, w_ref, gamma_ref, beta_ref, o_ref,
                         xpad_ref, rhs_ref,
                         *, k, s, d, p, C1, H, W, Ho, Wo, cg, eps):
    """x_ref:     (1, C1, H, W)     input sample, original dtype (unpadded)
       w_ref:     (CB, k*k*C1) bf16 conv weight block, taps folded into K
       gamma_ref: (CB, 1)      f32  GroupNorm scale (block slice)
       beta_ref:  (CB, 1)      f32  GroupNorm shift (block slice)
       o_ref:     (1, CB, Ho*Wo)    SiLU(GN(conv(x))) block
       xpad_ref:  (C1, Hp, Wp) bf16 scratch: zero-padded sample
       rhs_ref:   (k*k*C1, Ho*Wo) bf16 scratch: shifted-patch RHS (per sample)
    """
    HW = Ho * Wo
    c_blk = pl.program_id(1)

    # ---- once per sample: pad + cast + build the folded-tap RHS -------------
    @pl.when(c_blk == 0)
    def _build_rhs():
        xb = x_ref[0].astype(jnp.bfloat16)                    # (C1, H, W)
        if p > 0:
            xpad_ref[...] = jnp.zeros_like(xpad_ref)
        xpad_ref[:, p:p + H, p:p + W] = xb
        xpv = xpad_ref[...]                                   # (C1, Hp, Wp)
        for ki in range(k):
            for kj in range(k):
                tap = ki * k + kj
                patch = jax.lax.slice(
                    xpv,
                    (0, ki * d, kj * d),
                    (C1, ki * d + (Ho - 1) * s + 1, kj * d + (Wo - 1) * s + 1),
                    (1, s, s))                                # (C1, Ho, Wo)
                rhs_ref[tap * C1:(tap + 1) * C1, :] = patch.reshape(C1, HW)

    # ---- conv: one deep-K MXU dot per channel block --------------------------
    conv = jnp.dot(w_ref[...], rhs_ref[...],
                   preferred_element_type=jnp.float32)        # (CB, HW) f32

    # ---- GroupNorm: block-local groups, two-pass variance --------------------
    CB = conv.shape[0]
    gb = CB // cg                                             # groups in block
    inv_count = 1.0 / float(HW * cg)

    ch_sum = jnp.sum(conv, axis=1, keepdims=True)             # (CB, 1)
    grp_mean = jnp.sum(ch_sum.reshape(gb, cg), axis=1,
                       keepdims=True) * inv_count             # (gb, 1)
    ch_mean = jnp.repeat(grp_mean, cg, axis=0)                # (CB, 1)

    centered = conv - ch_mean                                 # (CB, HW)
    ch_var = jnp.sum(centered * centered, axis=1, keepdims=True)   # (CB, 1)
    grp_var = jnp.sum(ch_var.reshape(gb, cg), axis=1,
                      keepdims=True) * inv_count              # (gb, 1)
    inv_std = jax.lax.rsqrt(grp_var + eps)                    # (gb, 1)

    scale = jnp.repeat(inv_std, cg, axis=0) * gamma_ref[...]  # (CB, 1)
    y = centered * scale + beta_ref[...]                      # (CB, HW)

    # ---- SiLU + lane-dense store ---------------------------------------------
    o_ref[0] = (y * jax.nn.sigmoid(y)).astype(o_ref.dtype)


def _vmem_capacity_bytes():
    try:
        return int(pltpu.get_tpu_info().vmem_capacity_bytes)
    except Exception:
        return 64 * 1024 * 1024   # conservative (v7x per-core) fallback


# ---------------------------------------------------------------------------
# Conv_GN forward:  SiLU(GroupNorm16(Conv2d_nobias(x)))   (NCHW in / NCHW out)
# ---------------------------------------------------------------------------
def conv_gn_forward(x_nchw, weight, gamma, beta, *, k, s=1, d=1, p=None,
                    num_groups=16, eps=1e-5, out_dtype=None):
    N, C1, H, W = x_nchw.shape
    C2 = weight.shape[0]
    assert C2 % num_groups == 0, "GroupNorm(16, c2) requires c2 % 16 == 0"
    assert weight.shape[1] == C1, "grouped conv (g>1) not implemented"

    if p is None:                                   # ultralytics autopad
        p = (d * (k - 1) + 1) // 2
    Hp, Wp = H + 2 * p, W + 2 * p
    Ho = (Hp - d * (k - 1) - 1) // s + 1
    Wo = (Wp - d * (k - 1) - 1) // s + 1
    HW = Ho * Wo
    KC1 = k * k * C1
    cg = C2 // num_groups                           # channels per GN group
    out_dtype = jnp.dtype(x_nchw.dtype) if out_dtype is None else jnp.dtype(out_dtype)

    # ---- channel block: whole groups, multiple of 8 sublanes, modest cap ----
    min_gb = 8 // math.gcd(cg, 8)                   # groups needed for CB % 8 == 0
    if num_groups % min_gb != 0:                    # (cannot happen for G=16)
        min_gb = num_groups
    cb_cap = max(min_gb * cg, min(128, C2 // 2))    # cap CB; force >=2 blocks when possible
    g_b = min_gb
    while num_groups % (g_b * 2) == 0 and (g_b * 2) * cg <= cb_cap:
        g_b *= 2
    CB = g_b * cg
    n_cblk = C2 // CB

    # ---- lightweight weight / affine prep (weights only; no activation pass) -
    # OIHW -> (O, kH, kW, I) -> (C2, k*k*C1): row r = (ki*k+kj)*C1 + i.
    w2 = jnp.transpose(weight.astype(jnp.bfloat16), (0, 2, 3, 1)).reshape(C2, KC1)
    gamma_col = gamma.reshape(C2, 1).astype(jnp.float32)
    beta_col = beta.reshape(C2, 1).astype(jnp.float32)

    kernel = functools.partial(
        _conv_gn_silu_kernel, k=k, s=s, d=d, p=p, C1=C1, H=H, W=W,
        Ho=Ho, Wo=Wo, cg=cg, eps=float(eps))

    # ---- generation-aware VMEM budget ----------------------------------------
    in_bpe = jnp.dtype(x_nchw.dtype).itemsize
    footprint = (2 * C1 * H * W * in_bpe          # x block (double-buffered)
                 + 2 * CB * KC1 * 2               # weight block
                 + 4 * CB * 4                     # gamma/beta blocks
                 + 2 * CB * HW * out_dtype.itemsize   # out block
                 + C1 * Hp * Wp * 2               # xpad scratch
                 + KC1 * HW * 2                   # rhs scratch
                 + 6 * CB * HW * 4)               # f32 temporaries headroom
    cap = _vmem_capacity_bytes()
    vmem_limit = int(min(cap * 0.85, max(32 * 1024 * 1024, footprint * 2)))

    out = pl.pallas_call(
        kernel,
        out_shape=jax.ShapeDtypeStruct((N, C2, HW), out_dtype),
        grid_spec=pltpu.PrefetchScalarGridSpec(
            num_scalar_prefetch=0,
            grid=(N, n_cblk),
            in_specs=[
                pl.BlockSpec((1, C1, H, W), lambda n, c: (n, 0, 0, 0)),
                pl.BlockSpec((CB, KC1), lambda n, c: (c, 0)),
                pl.BlockSpec((CB, 1), lambda n, c: (c, 0)),
                pl.BlockSpec((CB, 1), lambda n, c: (c, 0)),
            ],
            out_specs=pl.BlockSpec((1, CB, HW), lambda n, c: (n, c, 0)),
            scratch_shapes=[
                pltpu.VMEM((C1, Hp, Wp), jnp.bfloat16),   # padded sample
                pltpu.VMEM((KC1, HW), jnp.bfloat16),      # folded-tap RHS
            ],
        ),
        compiler_params=pltpu.CompilerParams(
            # channel-block axis is "arbitrary": it reuses the per-sample RHS
            # scratch built at c==0; the sample axis shards across TensorCores.
            dimension_semantics=("parallel", "arbitrary"),
            vmem_limit_bytes=vmem_limit,
        ),
    )(x_nchw, w2, gamma_col, beta_col)

    return out.reshape(N, C2, Ho, Wo)                                  # NCHW


# ---------------------------------------------------------------------------
# Reference (plain JAX, f32) for sanity check
# ---------------------------------------------------------------------------
def reference(x, w, gamma, beta, *, k, s=1, d=1, eps=1e-5, groups=16):
    p = (d * (k - 1) + 1) // 2
    y = jax.lax.conv_general_dilated(
        x.astype(jnp.float32), w.astype(jnp.float32), (s, s),
        [(p, p), (p, p)], rhs_dilation=(d, d),
        dimension_numbers=("NCHW", "OIHW", "NCHW"))
    N, C2, H, W = y.shape
    yg = y.reshape(N, groups, -1)
    mean = yg.mean(-1, keepdims=True)
    var = ((yg - mean) ** 2).mean(-1, keepdims=True)
    yn = ((yg - mean) / jnp.sqrt(var + eps)).reshape(N, C2, H, W)
    yn = yn * gamma[None, :, None, None] + beta[None, :, None, None]
    return yn * jax.nn.sigmoid(yn)


if __name__ == "__main__":
    # Conv_GN(c1=16, c2=32, k=3, s=1) -> GroupNorm(16, 32) -> SiLU
    N, C1, H, W = 2, 16, 16, 16
    C2, K = 32, 3

    key = jax.random.PRNGKey(0)
    kx, kw, kg, kb = jax.random.split(key, 4)
    x = jax.random.normal(kx, (N, C1, H, W), dtype=jnp.float32)
    weight = jax.random.normal(kw, (C2, C1, K, K), dtype=jnp.float32) * 0.1
    gamma = 1.0 + 0.1 * jax.random.normal(kg, (C2,), dtype=jnp.float32)
    beta = 0.1 * jax.random.normal(kb, (C2,), dtype=jnp.float32)

    out = conv_gn_forward(x, weight, gamma, beta, k=K, s=1)
    out = jax.block_until_ready(out)
    assert out.shape == (N, C2, H, W)

    ref = jax.block_until_ready(reference(x, weight, gamma, beta, k=K, s=1))
    # bf16 MXU inputs (f32 accumulate / GN math) -> slightly looser tolerance
    # than the pure-f32 PyTorch module; this is an intentional trade.
    np.testing.assert_allclose(np.asarray(out, dtype=np.float32), np.asarray(ref),
                               atol=2e-2, rtol=2e-2)

    print("KERNEL_OK")
</pallas_src>

<mosaic_0001>
module attributes {stable_mosaic.version = 11 : i64} {
  func.func @_conv_gn_silu_kernel(%arg0: i32, %arg1: i32, %arg2: memref<1x16x16x16xf32, #tpu.memory_space<vmem>>, %arg3: memref<16x144xbf16, #tpu.memory_space<vmem>>, %arg4: memref<16x1xf32, #tpu.memory_space<vmem>>, %arg5: memref<16x1xf32, #tpu.memory_space<vmem>>, %arg6: memref<1x16x256xf32, #tpu.memory_space<vmem>>, %arg7: memref<16x18x18xbf16, #tpu.memory_space<vmem>>, %arg8: memref<144x256xbf16, #tpu.memory_space<vmem>>) attributes {dimension_semantics = [#tpu.dimension_semantics<parallel>, #tpu.dimension_semantics<arbitrary>], iteration_bounds = array<i64: 2, 2>, scalar_prefetch = 0 : i64, scratch_operands = 2 : i64, tpu.core_type = #tpu.core_type<tc>, window_params = [{transform_indices = @transform_0, window_bounds = array<i64: 1, 16, 16, 16>}, {transform_indices = @transform_1, window_bounds = array<i64: 16, 144>}, {transform_indices = @transform_2, window_bounds = array<i64: 16, 1>}, {transform_indices = @transform_3, window_bounds = array<i64: 16, 1>}, {transform_indices = @transform_4, window_bounds = array<i64: 1, 16, 256>}]} {
    %c0_i32 = arith.constant 0 : i32
    %0 = arith.cmpi eq, %arg1, %c0_i32 : i32
    %1 = arith.extui %0 : i1 to i32
    %c0_i32_0 = arith.constant 0 : i32
    %2 = arith.cmpi ne, %1, %c0_i32_0 : i32
    scf.if %2 {
      %c0_19 = arith.constant 0 : index
      %c0_20 = arith.constant 0 : index
      %c0_21 = arith.constant 0 : index
      %c0_22 = arith.constant 0 : index
      %48 = vector.load %arg2[%c0_19, %c0_20, %c0_21, %c0_22] : memref<1x16x16x16xf32, #tpu.memory_space<vmem>>, vector<1x16x16x16xf32>
      %49 = vector.shape_cast %48 : vector<1x16x16x16xf32> to vector<16x16x16xf32>
      %50 = arith.truncf %49 : vector<16x16x16xf32> to vector<16x16x16xbf16>
      %cst_23 = arith.constant 0.000000e+00 : bf16
      %51 = vector.broadcast %cst_23 : bf16 to vector<16x18x18xbf16>
      %c0_24 = arith.constant 0 : index
      %c0_25 = arith.constant 0 : index
      %c0_26 = arith.constant 0 : index
      %52 = vector.load %arg7[%c0_24, %c0_25, %c0_26] : memref<16x18x18xbf16, #tpu.memory_space<vmem>>, vector<16x18x18xbf16>
      tpu.vector_store %arg7[%c0_24, %c0_25, %c0_26], %51 {strides = array<i32>} : memref<16x18x18xbf16, #tpu.memory_space<vmem>>, vector<16x18x18xbf16>,
      %c0_27 = arith.constant 0 : index
      %c1 = arith.constant 1 : index
      %c1_28 = arith.constant 1 : index
      %53 = vector.load %arg7[%c0_27, %c1, %c1_28] : memref<16x18x18xbf16, #tpu.memory_space<vmem>>, vector<16x16x16xbf16>
      tpu.vector_store %arg7[%c0_27, %c1, %c1_28], %50 {strides = array<i32>} : memref<16x18x18xbf16, #tpu.memory_space<vmem>>, vector<16x16x16xbf16>,
      %c0_29 = arith.constant 0 : index
      %c0_30 = arith.constant 0 : index
      %c0_31 = arith.constant 0 : index
      %54 = vector.load %arg7[%c0_29, %c0_30, %c0_31] : memref<16x18x18xbf16, #tpu.memory_space<vmem>>, vector<16x18x18xbf16>
      %55 = vector.extract_strided_slice %54 {offsets = [0, 0, 0], sizes = [16, 16, 16], strides = [1, 1, 1]} : vector<16x18x18xbf16> to vector<16x16x16xbf16>
      %56 = vector.shape_cast %55 : vector<16x16x16xbf16> to vector<16x256xbf16>
      %c0_32 = arith.constant 0 : index
      %c0_33 = arith.constant 0 : index
      %57 = vector.load %arg8[%c0_32, %c0_33] : memref<144x256xbf16, #tpu.memory_space<vmem>>, vector<16x256xbf16>
      tpu.vector_store %arg8[%c0_32, %c0_33], %56 {strides = array<i32>} : memref<144x256xbf16, #tpu.memory_space<vmem>>, vector<16x256xbf16>,
      %58 = vector.extract_strided_slice %54 {offsets = [0, 0, 1], sizes = [16, 16, 16], strides = [1, 1, 1]} : vector<16x18x18xbf16> to vector<16x16x16xbf16>
      %59 = vector.shape_cast %58 : vector<16x16x16xbf16> to vector<16x256xbf16>
      %c16 = arith.constant 16 : index
      %c0_34 = arith.constant 0 : index
      %60 = vector.load %arg8[%c16, %c0_34] : memref<144x256xbf16, #tpu.memory_space<vmem>>, vector<16x256xbf16>
      tpu.vector_store %arg8[%c16, %c0_34], %59 {strides = array<i32>} : memref<144x256xbf16, #tpu.memory_space<vmem>>, vector<16x256xbf16>,
      %61 = vector.extract_strided_slice %54 {offsets = [0, 0, 2], sizes = [16, 16, 16], strides = [1, 1, 1]} : vector<16x18x18xbf16> to vector<16x16x16xbf16>
      %62 = vector.shape_cast %61 : vector<16x16x16xbf16> to vector<16x256xbf16>
      %c32 = arith.constant 32 : index
      %c0_35 = arith.constant 0 : index
      %63 = vector.load %arg8[%c32, %c0_35] : memref<144x256xbf16, #tpu.memory_space<vmem>>, vector<16x256xbf16>
      tpu.vector_store %arg8[%c32, %c0_35], %62 {strides = array<i32>} : memref<144x256xbf16, #tpu.memory_space<vmem>>, vector<16x256xbf16>,
      %64 = vector.extract_strided_slice %54 {offsets = [0, 1, 0], sizes = [16, 16, 16], strides = [1, 1, 1]} : vector<16x18x18xbf16> to vector<16x16x16xbf16>
      %65 = vector.shape_cast %64 : vector<16x16x16xbf16> to vector<16x256xbf16>
      %c48 = arith.constant 48 : index
      %c0_36 = arith.constant 0 : index
      %66 = vector.load %arg8[%c48, %c0_36] : memref<144x256xbf16, #tpu.memory_space<vmem>>, vector<16x256xbf16>
      tpu.vector_store %arg8[%c48, %c0_36], %65 {strides = array<i32>} : memref<144x256xbf16, #tpu.memory_space<vmem>>, vector<16x256xbf16>,
      %67 = vector.extract_strided_slice %54 {offsets = [0, 1, 1], sizes = [16, 16, 16], strides = [1, 1, 1]} : vector<16x18x18xbf16> to vector<16x16x16xbf16>
      %68 = vector.shape_cast %67 : vector<16x16x16xbf16> to vector<16x256xbf16>
      %c64 = arith.constant 64 : index
      %c0_37 = arith.constant 0 : index
      %69 = vector.load %arg8[%c64, %c0_37] : memref<144x256xbf16, #tpu.memory_space<vmem>>, vector<16x256xbf16>
      tpu.vector_store %arg8[%c64, %c0_37], %68 {strides = array<i32>} : memref<144x256xbf16, #tpu.memory_space<vmem>>, vector<16x256xbf16>,
      %70 = vector.extract_strided_slice %54 {offsets = [0, 1, 2], sizes = [16, 16, 16], strides = [1, 1, 1]} : vector<16x18x18xbf16> to vector<16x16x16xbf16>
      %71 = vector.shape_cast %70 : vector<16x16x16xbf16> to vector<16x256xbf16>
      %c80 = arith.constant 80 : index
      %c0_38 = arith.constant 0 : index
      %72 = vector.load %arg8[%c80, %c0_38] : memref<144x256xbf16, #tpu.memory_space<vmem>>, vector<16x256xbf16>
      tpu.vector_store %arg8[%c80, %c0_38], %71 {strides = array<i32>} : memref<144x256xbf16, #tpu.memory_space<vmem>>, vector<16x256xbf16>,
      %73 = vector.extract_strided_slice %54 {offsets = [0, 2, 0], sizes = [16, 16, 16], strides = [1, 1, 1]} : vector<16x18x18xbf16> to vector<16x16x16xbf16>
      %74 = vector.shape_cast %73 : vector<16x16x16xbf16> to vector<16x256xbf16>
      %c96 = arith.constant 96 : index
      %c0_39 = arith.constant 0 : index
      %75 = vector.load %arg8[%c96, %c0_39] : memref<144x256xbf16, #tpu.memory_space<vmem>>, vector<16x256xbf16>
      tpu.vector_store %arg8[%c96, %c0_39], %74 {strides = array<i32>} : memref<144x256xbf16, #tpu.memory_space<vmem>>, vector<16x256xbf16>,
      %76 = vector.extract_strided_slice %54 {offsets = [0, 2, 1], sizes = [16, 16, 16], strides = [1, 1, 1]} : vector<16x18x18xbf16> to vector<16x16x16xbf16>
      %77 = vector.shape_cast %76 : vector<16x16x16xbf16> to vector<16x256xbf16>
      %c112 = arith.constant 112 : index
      %c0_40 = arith.constant 0 : index
      %78 = vector.load %arg8[%c112, %c0_40] : memref<144x256xbf16, #tpu.memory_space<vmem>>, vector<16x256xbf16>
      tpu.vector_store %arg8[%c112, %c0_40], %77 {strides = array<i32>} : memref<144x256xbf16, #tpu.memory_space<vmem>>, vector<16x256xbf16>,
      %79 = vector.extract_strided_slice %54 {offsets = [0, 2, 2], sizes = [16, 16, 16], strides = [1, 1, 1]} : vector<16x18x18xbf16> to vector<16x16x16xbf16>
      %80 = vector.shape_cast %79 : vector<16x16x16xbf16> to vector<16x256xbf16>
      %c128 = arith.constant 128 : index
      %c0_41 = arith.constant 0 : index
      %81 = vector.load %arg8[%c128, %c0_41] : memref<144x256xbf16, #tpu.memory_space<vmem>>, vector<16x256xbf16>
      tpu.vector_store %arg8[%c128, %c0_41], %80 {strides = array<i32>} : memref<144x256xbf16, #tpu.memory_space<vmem>>, vector<16x256xbf16>,
    } else {
    }
    %c0 = arith.constant 0 : index
    %c0_1 = arith.constant 0 : index
    %3 = vector.load %arg3[%c0, %c0_1] : memref<16x144xbf16, #tpu.memory_space<vmem>>, vector<16x144xbf16>
    %c0_2 = arith.constant 0 : index
    %c0_3 = arith.constant 0 : index
    %4 = vector.load %arg8[%c0_2, %c0_3] : memref<144x256xbf16, #tpu.memory_space<vmem>>, vector<144x256xbf16>
    %cst = arith.constant dense<0.000000e+00> : vector<16x256xf32>
    %5 = tpu.matmul %3, %4, %cst {dimension_numbers = #tpu.dot_dimension_numbers<[1], [0], [0], [1], [0, 0, 1, 1], [], []>} : vector<16x144xbf16>, vector<144x256xbf16>, vector<16x256xf32> -> vector<16x256xf32>
    %cst_4 = arith.constant dense<0.000000e+00> : vector<16xf32>
    %6 = vector.multi_reduction <add>, %5, %cst_4 [1] : vector<16x256xf32> to vector<16xf32>
    %7 = vector.shape_cast %6 : vector<16xf32> to vector<16x1xf32>
    %8 = vector.shape_cast %7 : vector<16x1xf32> to vector<8x2xf32>
    %cst_5 = arith.constant dense<0.000000e+00> : vector<8xf32>
    %9 = vector.multi_reduction <add>, %8, %cst_5 [1] : vector<8x2xf32> to vector<8xf32>
    %10 = vector.shape_cast %9 : vector<8xf32> to vector<8x1xf32>
    %cst_6 = arith.constant 0.001953125 : f32
    %11 = vector.broadcast %cst_6 : f32 to vector<8x1xf32>
    %12 = arith.mulf %10, %11 : vector<8x1xf32>
    %13 = vector.shape_cast %12 : vector<8x1xf32> to vector<8x1x1xf32>
    %14 = vector.broadcast %13 : vector<8x1x1xf32> to vector<8x2x1xf32>
    %15 = vector.shape_cast %14 : vector<8x2x1xf32> to vector<16x1xf32>
    %16 = vector.broadcast %15 : vector<16x1xf32> to vector<16x256xf32>
    %17 = arith.subf %5, %16 : vector<16x256xf32>
    %18 = arith.mulf %17, %17 : vector<16x256xf32>
    %cst_7 = arith.constant dense<0.000000e+00> : vector<16xf32>
    %19 = vector.multi_reduction <add>, %18, %cst_7 [1] : vector<16x256xf32> to vector<16xf32>
    %20 = vector.shape_cast %19 : vector<16xf32> to vector<16x1xf32>
    %21 = vector.shape_cast %20 : vector<16x1xf32> to vector<8x2xf32>
    %cst_8 = arith.constant dense<0.000000e+00> : vector<8xf32>
    %22 = vector.multi_reduction <add>, %21, %cst_8 [1] : vector<8x2xf32> to vector<8xf32>
    %23 = vector.shape_cast %22 : vector<8xf32> to vector<8x1xf32>
    %cst_9 = arith.constant 0.001953125 : f32
    %24 = vector.broadcast %cst_9 : f32 to vector<8x1xf32>
    %25 = arith.mulf %23, %24 : vector<8x1xf32>
    %cst_10 = arith.constant 9.99999974E-6 : f32
    %26 = vector.broadcast %cst_10 : f32 to vector<8x1xf32>
    %27 = arith.addf %25, %26 : vector<8x1xf32>
    %28 = math.rsqrt %27 : vector<8x1xf32>
    %29 = vector.shape_cast %28 : vector<8x1xf32> to vector<8x1x1xf32>
    %30 = vector.broadcast %29 : vector<8x1x1xf32> to vector<8x2x1xf32>
    %31 = vector.shape_cast %30 : vector<8x2x1xf32> to vector<16x1xf32>
    %c0_11 = arith.constant 0 : index
    %c0_12 = arith.constant 0 : index
    %32 = vector.load %arg4[%c0_11, %c0_12] : memref<16x1xf32, #tpu.memory_space<vmem>>, vector<16x1xf32>
    %33 = arith.mulf %31, %32 : vector<16x1xf32>
    %34 = vector.broadcast %33 : vector<16x1xf32> to vector<16x256xf32>
    %35 = arith.mulf %17, %34 : vector<16x256xf32>
    %c0_13 = arith.constant 0 : index
    %c0_14 = arith.constant 0 : index
    %36 = vector.load %arg5[%c0_13, %c0_14] : memref<16x1xf32, #tpu.memory_space<vmem>>, vector<16x1xf32>
    %37 = vector.broadcast %36 : vector<16x1xf32> to vector<16x256xf32>
    %38 = arith.addf %35, %37 : vector<16x256xf32>
    %39 = arith.negf %38 : vector<16x256xf32>
    %40 = math.exp %39 : vector<16x256xf32>
    %cst_15 = arith.constant 1.000000e+00 : f32
    %41 = vector.broadcast %cst_15 : f32 to vector<16x256xf32>
    %42 = arith.addf %41, %40 : vector<16x256xf32>
    %43 = arith.divf %41, %42 : vector<16x256xf32>
    %44 = arith.mulf %38, %43 : vector<16x256xf32>
    %c0_16 = arith.constant 0 : index
    %c0_17 = arith.constant 0 : index
    %c0_18 = arith.constant 0 : index
    %45 = vector.load %arg6[%c0_16, %c0_17, %c0_18] : memref<1x16x256xf32, #tpu.memory_space<vmem>>, vector<1x16x256xf32>
    %46 = vector.shape_cast %45 : vector<1x16x256xf32> to vector<16x256xf32>
    %47 = vector.shape_cast %44 : vector<16x256xf32> to vector<1x16x256xf32>
    tpu.vector_store %arg6[%c0_16, %c0_17, %c0_18], %47 {strides = array<i32>} : memref<1x16x256xf32, #tpu.memory_space<vmem>>, vector<1x16x256xf32>,
    return
  }
  func.func @transform_0(%arg0: i32, %arg1: i32) -> (i32, i32, i32, i32) {
    %c0_i32 = arith.constant 0 : i32
    %c0_i32_0 = arith.constant 0 : i32
    %c0_i32_1 = arith.constant 0 : i32
    %c0_i32_2 = arith.constant 0 : i32
    return %arg0, %c0_i32, %c0_i32_0, %c0_i32_1 : i32, i32, i32, i32
  }
  func.func @transform_1(%arg0: i32, %arg1: i32) -> (i32, i32) {
    %c0_i32 = arith.constant 0 : i32
    %c0_i32_0 = arith.constant 0 : i32
    return %arg1, %c0_i32 : i32, i32
  }
  func.func @transform_2(%arg0: i32, %arg1: i32) -> (i32, i32) {
    %c0_i32 = arith.constant 0 : i32
    %c0_i32_0 = arith.constant 0 : i32
    return %arg1, %c0_i32 : i32, i32
  }
  func.func @transform_3(%arg0: i32, %arg1: i32) -> (i32, i32) {
    %c0_i32 = arith.constant 0 : i32
    %c0_i32_0 = arith.constant 0 : i32
    return %arg1, %c0_i32 : i32, i32
  }
  func.func @transform_4(%arg0: i32, %arg1: i32) -> (i32, i32, i32) {
    %c0_i32 = arith.constant 0 : i32
    %c0_i32_0 = arith.constant 0 : i32
    return %arg0, %arg1, %c0_i32 : i32, i32, i32
  }
}

</mosaic_0001>

<bundles_post_ra>
// kernel: tpu_custom_call.1
= control target key start
LH: loop header
LB: loop body
LE: loop exit
PB: predicated region body
PF: predicated region fallthrough
CT: control target
= control target key end

     0   :  { %s11921_s0 = inlined_call_operand.hbm [shape: f32[2,16,16,16], index: 0, kind: input, shape index: {}]   ;;  %s11922_s1 = inlined_call_operand.vmem [shape: bf16[32,144], index: 1, kind: input, shape index: {}]   ;;  %s11923_s2 = inlined_call_operand.vmem [shape: f32[32,1], index: 2, kind: input, shape index: {}]   ;;  %s11924_s3 = inlined_call_operand.vmem [shape: f32[32,1], index: 3, kind: input, shape index: {}]   ;;  %s11925_s4 = inlined_call_operand.hbm [shape: f32[2,32,256], index: 4, kind: output, shape index: {}]  }
   0x1   :  { %12172 = sst [smem:[#allocation139_spill]] %s11921_s0 }
   0x2   :  { %9 = vsyncpa [#allocation5], 0 }
   0x3   :  { %11 = vsyncpa [#allocation5 + $0x1], 0 }
   0x4   :  { %12 = vsyncpa [#allocation6], 0 }
   0x5   :  { %14 = vsyncpa [#allocation6 + $0x1], 0  ;;  %s8190_s15 = smov 0   ;;  %s8192_s16 = smov 0  }
   0x6   :  { %s8194_s17 = smov 0   ;;  %s8196_s18 = smov 0  }
   0x7   :  { %s8198_s19 = smov 0   ;;  %s8200_s20 = smov 0  }
   0x8   :  { %s8202_s21 = smov 0   ;;  %s8204_s22 = smov 0  }
   0x9   :  { %s8206_s23 = smov 0   ;;  %s8208_s24 = smov 0  }
   0xa   :  { %s8210_s25 = smov 0  }
   0xb LB: > { %12173 = sst [smem:[#allocation10_spill]] %s8130_s23  ;;  %s7543_s26 = sadd.s32 4294967295, %s8138_s25   ;;  %s8138_s25 = sphi %s8210_s25, %s20_s25   ;;  %s8134_s24 = sphi %s8208_s24, %s12584_s24   ;;  %s8130_s23 = sphi %s8206_s23, %s12583_s23   ;;  %s8126_s22 = sphi %s8204_s22, %s12582_s22   ;;  %s8122_s21 = sphi %s8202_s21, %s12581_s21   ;;  %s8118_s20 = sphi %s8200_s20, %s12590_s20   ;;  %s8114_s19 = sphi %s8198_s19, %s12589_s19   ;;  %s8110_s18 = sphi %s8196_s18, %s12588_s18   ;;  %s8106_s17 = sphi %s8194_s17, %s12587_s17   ;;  %s8102_s16 = sphi %s8192_s16, %s12586_s16   ;;  %s8098_s15 = sphi %s8190_s15, %s12585_s15  }
   0xc   : > { %12174 = sst [smem:[#allocation11_spill]] %s8134_s24  ;;  %s7544_s27 = sadd.s32 4294967294, %s8138_s25  }
   0xd   : > { %s29_s28 = sadd.s32 1, %s8130_s23  ;;  %s32_s29 = sadd.s32 1, %s8134_s24 }
   0xe   : > { %p30_p0 = scmp.ge.s32.totalorder %s29_s28, 2  ;;  %s39_s30 = sadd.s32 1, %s8118_s20 }
   0xf   : > { %p46_p1 = scmp.ne.s32.totalorder %s8118_s20, %s8114_s19  ;;  %p47_p2 = scmp.eq.s32.totalorder %s8138_s25, 0 }
  0x10   : > { %s12592_s28 = smov (%p30_p0, %s29_s28), 0  ;;  %s12594_s29 = smov (!%p30_p0, %s32_s29), %s8134_s24 }
  0x11   : > { %12175 = sst [smem:[#allocation12_spill]] %s12592_s28  ;;  %p8254_p3 = por %p47_p2, %p46_p1 }
  0x12   : > { %p52_p4 = scmp.ne.s32.totalorder %s8114_s19, %s8110_s18  ;;  %p34_p5 = scmp.ge.s32.totalorder %s12594_s29, 2 }
  0x13   : > { %p53_p6 = scmp.eq.s32.totalorder %s7543_s26, 0  ;;  %s141_s6 = ssub.s32 %s8130_s23, %s12592_s28 }
  0x14   : > { %s145_s7 = sadd.s32 1, %s8106_s17  ;;  %s12596_s29 = smov (%p34_p5, %s12594_s29), 0 }
  0x15   : > { %12177 = sst [smem:[#allocation13_spill]] %s12596_s29  ;;  %p8264_p7 = por %p53_p6, %p52_p4 }
  0x16   : > { %p155_p8 = scmp.ne.s32.totalorder %s8106_s17, %s8102_s16  ;;  %s36_s9 = ssub.s32 %s8134_s24, %s12596_s29 }
  0x17   : > { %p156_p9 = scmp.eq.s32.totalorder %s7543_s26, 3  ;;  %p37_p10 = scmp.eq.s32.totalorder %s36_s9, 0 }
  0x18   : > { %s142_s10 = sor.u32 %s141_s6, %s36_s9  ;;  %p161_p13 = scmp.ne.s32.totalorder %s8102_s16, %s8098_s15 }
  0x19   : > { %p143_p11 = scmp.eq.s32.totalorder %s142_s10, 0  ;;  %p8272_p12 = por %p156_p9, %p155_p8 }
  0x1a   : > { %s8277_s12 = scalar_select %p37_p10, %s8118_s20, %s39_s30  }
  0x1b   : > { %s12179_s11 = scalar_select %p8272_p12, 1, 0 }
  0x1c   : > { %s8280_s13 = scalar_select %p143_p11, %s8106_s17, %s145_s7  }
  0x1d   : > { %p162_p0 = scmp.eq.s32.totalorder %s7544_s27, 3  ;;  %p7814_p1 = scmp.lt.s32.totalorder %s8138_s25, 4 }
  0x1e   : > { %s182_s18 = sand.u32 1, %s8118_s20   ;;  %s7767_s6 = sshll.u32 %s8134_s24, 12 }
  0x1f   : > { %p8285_p2 = por %p162_p0, %p161_p13  ;;  %s7547_s26 = sshll.u32 %s182_s18, 8 }
  0x20   : > { %s12181_s0 = sld [smem:[#allocation139_spill]]  ;;  %s186_s30 = scalar_lea.vmem [#allocation4], %s7547_s26 }
  0x21   : > { %s12180_s14 = scalar_select %p8285_p2, 1, 0 }
  0x22   : > { %s193_s7 = sshll.u32 %s186_s30, 4  ;;  %p8300_p4 = pnand %p7814_p1, %p8254_p3  ;;  %s8296_s7 = int_to_ptr.vmem [resolvable:$true] %s193_s7 }
  0x23   : > { %s8305_s28 = scalar_lea.sflag [#allocation5], %s182_s18 }
  0x24   : > { %p7988_p8 = pneg %p8300_p4 }
  0x26   : > { %s8294_s29 = scalar_lea.hbm %s12181_s0, %s7767_s6  ;;  %s7991_s5 = scalar_lea.hbm %s12181_s0, 8192 }
  0x27   : > { %s7986_s6 = scalar_lea.hbm %s8294_s29, 4096  ;;  %p7992_p3 = scmp.lt.u32.totalorder %s8294_s29, %s12181_s0 }
  0x28   : > { %p7987_p6 = scmp.ne.s32.totalorder %s8294_s29, %s7986_s6  ;;  %p7993_p11 = scmp.lt.u32.totalorder %s7991_s5, %s7986_s6 }
  0x29   : > { %p7995_p0 = scmp.lt.u32.totalorder %s7986_s6, %s8294_s29 }
  0x2a   : > { %p7989_p9 = pnand %p7988_p8, %p7987_p6  ;;  %p7994_p13 = por %p7993_p11, %p7992_p3 }
  0x2c   : > { %p7990_p10 = pneg %p7989_p9  ;;  %p7996_p1 = por %p7995_p0, %p7994_p13 }
  0x2e   : > { %p7997_p5 = pnand %p7996_p1, %p7990_p10 }
  0x30   : > { %8000 = shalt.err (!%p7997_p5)
}
  0x31   : > { %s8001_s18 = scalar_lea.vmem %s8296_s7, 4096  ;;  %s8140_s26 = smov [#allocation4]  }
  0x32   : > { %p8002_p6 = scmp.ne.s32.totalorder %s8296_s7, %s8001_s18  ;;  %s8006_s9 = sshll.u32 %s8140_s26, 4  ;;  %s8007_s9 = int_to_ptr.vmem [resolvable:$false] %s8006_s9 }
  0x33   : > { %s8008_s10 = scalar_lea.vmem %s8007_s9, 8192  ;;  %p8009_p12 = scmp.lt.s32.totalorder %s8296_s7, %s8007_s9 }
  0x34   : > { %p8004_p9 = pnand %p8002_p6, %p7988_p8  ;;  %p8010_p3 = scmp.lt.s32.totalorder %s8008_s10, %s8001_s18 }
  0x36   : > { %p8005_p2 = pneg %p8004_p9  ;;  %p8011_p11 = por %p8010_p3, %p8009_p12 }
  0x38   : > { %p8012_p13 = pnand %p8011_p11, %p8005_p2 }
  0x3a   : > { %8015 = shalt.err (!%p8012_p13)
}
  0x3b   : > { %s8141_s6 = smov 128   ;;  %s8142_s5 = smov 8  }
  0x3c   : > { %7809 = dma.hbm_to_vmem [thread:$0]  (!%p8300_p4), %s8294_s29, 4096, %s8296_s7, %s8305_s28, %s8141_s6, %s8141_s6, %s8142_s5  }
  0x3d   : > { %p229_p5 = scmp.lt.s32.totalorder %s8138_s25, 5  ;;  %p12183_p8 = scmp.ge.s32.totalorder %s8138_s25, 1 }
  0x3f   : > { %p230_p10 = pnand %p12183_p8, %p229_p5 }
  0x40   : > { %s235_s30 = sand.u32 (!%p230_p10), 1, %s8114_s19  }
  0x41   : > { %233 = sbr.rel (%p230_p10) target bundleno = 2991 (0xbaf), region = 36  ;;  %s7551_s18 = sshll.u32 (!%p230_p10), %s235_s30, 8 }
  0x42   : > { %s236_s26 = scalar_lea.sflag (!%p230_p10), [#allocation5], %s235_s30  ;;  %s8337_s9 = scalar_lea.vmem (!%p230_p10), [#allocation4], %s7551_s18 }
  0x48   : > { %8089 = dma.done.wait (%p8264_p7), %s236_s26, 4096  }
  0x49   : > { %8091 = vsyncadd (%p8264_p7), %s236_s26, 4294963200  ;;  %s277_s28 = sand.u32 1, %s8102_s16   ;;  %s7553_s29 = sshll.u32 %s8122_s21, 1 }
  0x4a   : > { %s7552_s7 = sshll.u32 %s277_s28, 5  ;;  %p281_p12 = scmp.lt.s32.totalorder %s7553_s29, 3 }
  0x4b   : > { %s8362_s23 = scalar_lea.vmem [#allocation7], %s7552_s7  ;;  %p7560_p7 = scmp.ne.s32.totalorder %s8122_s21, 0 }
  0x4c   : > { %s12598_s29 = smov (!%p281_p12, %s7553_s29), 3 }
  0x4d   : > { %s7768_s27 = sshll.u32 %s12598_s29, 3  ;;  %304 = sbr.rel (%p7560_p7) target bundleno = 1606 (0x646), region = 44 }
  0x4e   : > { %s8350_s5 = scalar_lea.vmem %s11922_s1, %s7768_s27  ;;  %s8355_s8 = scalar_lea.vmem %s11923_s2, %s7768_s27 }
  0x4f   : > { %s8360_s24 = scalar_lea.vmem %s11924_s3, %s7768_s27 }
  0x54   : > { %v306_v0 = vld [vmem:[%s8337_s9 + $0x8] sm:$0xff]  ;;  %v305_v1 = vld [vmem:[%s8337_s9] sm:$0xff]  ;;  %v307_v2 = vld [vmem:[%s8337_s9 + $0x10] sm:$0xff]  ;;  %vm483_vm0 = vsmask.f32 256  ;;  %s8143_s0 = smov 1  }
  0x55   : > { %v7770_v3 = vpack.c.bf16 %v306_v0, %v306_v0  ;;  %v7769_v4 = vpack.c.bf16 %v305_v1, %v305_v1  ;;  %v7771_v5 = vpack.c.bf16 %v307_v2, %v307_v2  ;;  %v308_v6 = vld [vmem:[%s8337_s9 + $0x18] sm:$0xff]  ;;  %v309_v7 = vld [vmem:[%s8337_s9 + $0x20] sm:$0xff]  ;;  %v310_v8 = vld [vmem:[%s8337_s9 + $0x28] sm:$0xff]  ;;  %vm484_vm1 = vsmask.f32 4368  ;;  %s8148_s29 = smov 64  }
  0x56   : > { %v7772_v9 = vpack.c.bf16 %v308_v6, %v308_v6  ;;  %v7773_v10 = vpack.c.bf16 %v309_v7, %v309_v7  ;;  %v7774_v11 = vpack.c.bf16 %v310_v8, %v310_v8  ;;  %v311_v26 = vld [vmem:[%s8337_s9 + $0x30] sm:$0xff]  ;;  %vm8374_vm2 = vmor %vm483_vm0, %vm484_vm1  ;;  %v312_v32 = vld [vmem:[%s8337_s9 + $0x38] sm:$0xff]  ;;  %vm356_vm3 = vcmask 139264   ;;  %s8149_s7 = smov 32   ;;  %s8150_s27 = smov 16  }
  0x57   : > { %v495_v12 = vshrl.u32 %v7770_v3, 16  ;;  %v498_v13 = vshll.u32 %v7770_v3, 16  ;;  %v487_v14 = vshrl.u32 %v7769_v4, 16  ;;  %v490_v15 = vshll.u32 %v7769_v4, 16  ;;  %v313_v42 = vld [vmem:[%s8337_s9 + $0x40] sm:$0xff]  ;;  %v314_v43 = vld [vmem:[%s8337_s9 + $0x48] sm:$0xff] }
  0x58   : > { %v504_v16 = vshrl.u32 %v7771_v5, 16  ;;  %v512_v17 = vshrl.u32 %v7772_v9, 16  ;;  %v507_v20 = vshll.u32 %v7771_v5, 16  ;;  %v515_v21 = vshll.u32 %v7772_v9, 16  ;;  %v315_v61 = vld [vmem:[%s8337_s9 + $0x50] sm:$0xff]  ;;  %v316_v62 = vld [vmem:[%s8337_s9 + $0x58] sm:$0xff] }
  0x59   : > { %v497_v18 = vrot.slane %v495_v12, 7  ;;  %v489_v19 = vrot.slane %v487_v14, 7  ;;  %v521_v24 = vshrl.u32 %v7773_v10, 16  ;;  %v529_v25 = vshrl.u32 %v7774_v11, 16  ;;  %v317_v8 = vld [vmem:[%s8337_s9 + $0x60] sm:$0xff]  ;;  %v318_v9 = vld [vmem:[%s8337_s9 + $0x68] sm:$0xff] }
  0x5a   : > { %v506_v22 = vrot.slane %v504_v16, 7  ;;  %v514_v23 = vrot.slane %v512_v17, 7  ;;  %v532_v33 = vshll.u32 %v7774_v11, 16  ;;  %v7775_v37 = vpack.c.bf16 %v311_v26, %v311_v26  ;;  %s8151_s10 = smov 96   ;;  %s8152_s6 = smov 80  }
  0x5b   : > { %v502_v27 = vrot.slane %v497_v18, 4  ;;  %v500_v28 = vor.u32 %v498_v13, %v497_v18  ;;  %v492_v29 = vor.u32 %v490_v15, %v489_v19  ;;  %v493_v30 = vrot.slane %v489_v19, 4  ;;  %s8153_s30 = smov 48   ;;  %s8154_s18 = smov 112  }
  0x5c   : > { %v509_v34 = vor.u32 %v507_v20, %v506_v22  ;;  %v510_v35 = vrot.slane %v506_v22, 4  ;;  %v517_v36 = vor.u32 %v515_v21, %v514_v23  ;;  %v523_v39 = vrot.slane %v521_v24, 7  ;;  %s8155_s26 = smov 126  }
  0x5d   : > { %762 = vrot.lane.b32.xlu1 %v502_v27, %s8143_s0  ;;  %758 = vrot.lane.b32.xlu0 %v492_v29, %s8143_s0  ;;  %v501_v38 = vsel %vm8374_vm2, %v493_v30, %v500_v28  ;;  %v531_v40 = vrot.slane %v529_v25, 7  ;;  %v7776_v41 = vpack.c.bf16 %v312_v32, %v312_v32  ;;  %v524_v44 = vshll.u32 %v7773_v10, 16  ;;  %v320_v28 = vld [vmem:[%s8337_s9 + $0x78] sm:$0xff] }
  0x5e   : > { %v519_v45 = vrot.slane %v514_v23, 4  ;;  %v538_v46 = vshrl.u32 %v7775_v37, 16  ;;  %v7777_v47 = vpack.c.bf16 %v313_v42, %v313_v42  ;;  %v7778_v48 = vpack.c.bf16 %v314_v43, %v314_v43  ;;  %v319_v23 = vld [vmem:[%s8337_s9 + $0x70] sm:$0xff] }
  0x5f   : > { %v518_v49 = vsel %vm8374_vm2, %v510_v35, %v517_v36  ;;  %v527_v50 = vrot.slane %v523_v39, 4  ;;  %v534_v51 = vor.u32 %v532_v33, %v531_v40  ;;  %v546_v52 = vshrl.u32 %v7776_v41, 16 }
  0x60   : > { %v526_v53 = vor.u32 %v524_v44, %v523_v39  ;;  %v540_v54 = vrot.slane %v538_v46, 7  ;;  %v541_v55 = vshll.u32 %v7775_v37, 16  ;;  %v555_v56 = vshrl.u32 %v7777_v47, 16  ;;  %v321_v39 = vld [vmem:[%s8337_s9 + $0x80] sm:$0xff] }
  0x61   : > { %764 = vrot.lane.b32.xlu1 %v509_v34, %s8143_s0  ;;  %760 = vrot.lane.b32.xlu0 %v501_v38, %s8143_s0  ;;  %v563_v57 = vshrl.u32 %v7778_v48, 16  ;;  %v535_v58 = vsel %vm8374_vm2, %v527_v50, %v534_v51  ;;  %v548_v59 = vrot.slane %v546_v52, 7  ;;  %v549_v60 = vshll.u32 %v7776_v41, 16 }
  0x62   : > { %v536_v63 = vrot.slane %v531_v40, 4  ;;  %v566_v0 = vshll.u32 %v7778_v48, 16  ;;  %v543_v1 = vor.u32 %v541_v55, %v540_v54  ;;  %v557_v2 = vrot.slane %v555_v56, 7  ;;  %v322_v40 = vld [vmem:[%s8337_s9 + $0x88] sm:$0xff] }
  0x63   : > { %v565_v3 = vrot.slane %v563_v57, 7  ;;  %v7779_v4 = vpack.c.bf16 %v315_v61, %v315_v61  ;;  %v544_v5 = vrot.slane %v540_v54, 4  ;;  %v551_v6 = vor.u32 %v549_v60, %v548_v59 }
  0x64   : > { %v7780_v7 = vpack.c.bf16 %v316_v62, %v316_v62  ;;  %v558_v10 = vshll.u32 %v7777_v47, 16  ;;  %v553_v11 = vrot.slane %v548_v59, 4  ;;  %v561_v12 = vrot.slane %v557_v2, 4  ;;  %v324_v59 = vld [vmem:[%s8337_s9 + $0x98] sm:$0xff] }
  0x65   : > { %768 = vrot.lane.b32.xlu1 %v519_v45, %s8143_s0  ;;  %766 = vrot.lane.b32.xlu0 %v518_v49, %s8143_s0  ;;  %v568_v13 = vor.u32 %v566_v0, %v565_v3  ;;  %v572_v14 = vshrl.u32 %v7779_v4, 16  ;;  %v552_v15 = vsel %vm8374_vm2, %v544_v5, %v551_v6  ;;  %v7781_v17 = vpack.c.bf16 %v317_v8, %v317_v8  ;;  %v325_v5 = vld [vmem:[%s8337_s9 + $0xa0] sm:$0xff] }
  0x66   : > { %v580_v16 = vshrl.u32 %v7780_v7, 16  ;;  %v7782_v18 = vpack.c.bf16 %v318_v9, %v318_v9  ;;  %v560_v20 = vor.u32 %v558_v10, %v557_v2  ;;  %v575_v22 = vshll.u32 %v7779_v4, 16 }
  0x67   : > { %v569_v19 = vsel %vm8374_vm2, %v561_v12, %v568_v13  ;;  %v574_v21 = vrot.slane %v572_v14, 7  ;;  %v583_v25 = vshll.u32 %v7780_v7, 16  ;;  %v589_v26 = vshrl.u32 %v7781_v17, 16  ;;  %v326_v7 = vld [vmem:[%s8337_s9 + $0xa8] sm:$0xff] }
  0x68   : > { %v582_v24 = vrot.slane %v580_v16, 7  ;;  %v597_v27 = vshrl.u32 %v7782_v18, 16  ;;  %v7783_v29 = vpack.c.bf16 %v319_v23, %v319_v23  ;;  %v570_v32 = vrot.slane %v565_v3, 4 }
  0x69   : > { %772 = vrot.lane.b32.xlu1 %v535_v58, %s8143_s0  ;;  %770 = vrot.lane.b32.xlu0 %v526_v53, %s8143_s0  ;;  %v577_v30 = vor.u32 %v575_v22, %v574_v21  ;;  %v578_v33 = vrot.slane %v574_v21, 4  ;;  %v7784_v34 = vpack.c.bf16 %v320_v28, %v320_v28  ;;  %v591_v36 = vrot.slane %v589_v26, 7  ;;  %v323_v58 = vld [vmem:[%s8337_s9 + $0x90] sm:$0xff]  ;;  %v328_v26 = vld [vmem:[%s8337_s9 + $0xb8] sm:$0xff] }
  0x6a   : > { %v585_v35 = vor.u32 %v583_v25, %v582_v24  ;;  %v599_v37 = vrot.slane %v597_v27, 7  ;;  %v600_v38 = vshll.u32 %v7782_v18, 16  ;;  %v606_v41 = vshrl.u32 %v7783_v29, 16  ;;  %v327_v25 = vld [vmem:[%s8337_s9 + $0xb0] sm:$0xff] }
  0x6b   : > { %v587_v42 = vrot.slane %v582_v24, 4  ;;  %v592_v43 = vshll.u32 %v7781_v17, 16  ;;  %v614_v44 = vshrl.u32 %v7784_v34, 16  ;;  %v8415_v45 = vpack.c.bf16 %v321_v39, %v321_v39 }
  0x6c   : > { %v586_v46 = vsel %vm8374_vm2, %v578_v33, %v585_v35  ;;  %v595_v47 = vrot.slane %v591_v36, 4  ;;  %v602_v48 = vor.u32 %v600_v38, %v599_v37  ;;  %v7786_v49 = vpack.c.bf16 %v322_v40, %v322_v40  ;;  %v330_v38 = vld [vmem:[%s8337_s9 + $0xc8] sm:$0xff] }
  0x6d   : > { %776 = vrot.lane.b32.xlu1 %v543_v1, %s8143_s0  ;;  %774 = vrot.lane.b32.xlu0 %v536_v63, %s8143_s0  ;;  %v608_v50 = vrot.slane %v606_v41, 7  ;;  %v609_v51 = vshll.u32 %v7783_v29, 16  ;;  %v594_v52 = vor.u32 %v592_v43, %v591_v36  ;;  %v8421_v53 = vrot.slane %v614_v44, 7 }
  0x6e   : > { %v617_v54 = vshll.u32 %v7784_v34, 16  ;;  %v603_v55 = vsel %vm8374_vm2, %v595_v47, %v602_v48  ;;  %v623_v56 = vshrl.u32 %v8415_v45, 16  ;;  %v631_v57 = vshrl.u32 %v7786_v49, 16 }
  0x6f   : > { %v611_v60 = vor.u32 %v609_v51, %v608_v50  ;;  %v604_v61 = vrot.slane %v599_v37, 4  ;;  %v612_v62 = vrot.slane %v608_v50, 4  ;;  %v8431_v0 = vpack.c.bf16 %v323_v58, %v323_v58  ;;  %v329_v37 = vld [vmem:[%s8337_s9 + $0xc0] sm:$0xff] }
  0x70   : > { %v619_v63 = vor.u32 %v617_v54, %v8421_v53  ;;  %v8433_v1 = vrot.slane %v623_v56, 7  ;;  %v8435_v2 = vrot.slane %v631_v57, 7  ;;  %v634_v3 = vshll.u32 %v7786_v49, 16  ;;  %v331_v56 = vld [vmem:[%s8337_s9 + $0xd0] sm:$0xff]  ;;  %v332_v57 = vld [vmem:[%s8337_s9 + $0xd8] sm:$0xff] }
  0x71   : > { %780 = vrot.lane.b32.xlu1 %v553_v11, %s8143_s0  ;;  %778 = vrot.lane.b32.xlu0 %v552_v15, %s8143_s0  ;;  %v8437_v4 = vpack.c.bf16 %v324_v59, %v324_v59  ;;  %v11939_v6 = vmov 0   ;;  %v621_v8 = vrot.slane %v8421_v53, 4  ;;  %v626_v9 = vshll.u32 %v8415_v45, 16 }
  0x72   : > { %357 = vst.msk [vmem:[#allocation2 + $0x8] sm:$0x1] %vm356_vm3, %v11939_v6  ;;  %360 = vst.msk [vmem:[#allocation2 + $0x14] sm:$0x1] %vm356_vm3, %v11939_v6  ;;  %v620_v10 = vsel %vm8374_vm2, %v612_v62, %v619_v63  ;;  %v640_v11 = vshrl.u32 %v8431_v0, 16  ;;  %v8480_v12 = vpack.c.bf16 %v325_v5, %v325_v5  ;;  %vm353_vm4 = vcmask 142336  }
  0x73   : > { %363 = vst.msk [vmem:[#allocation2 + $0x20] sm:$0x1] %vm356_vm3, %v11939_v6  ;;  %366 = vst.msk [vmem:[#allocation2 + $0x2c] sm:$0x1] %vm356_vm3, %v11939_v6  ;;  %v629_v13 = vrot.slane %v8433_v1, 4  ;;  %v636_v14 = vor.u32 %v634_v3, %v8435_v2  ;;  %v648_v15 = vshrl.u32 %v8437_v4, 16  ;;  %v8485_v16 = vpack.c.bf16 %v326_v7, %v326_v7 }
  0x74   : > { %369 = vst.msk [vmem:[#allocation2 + $0x38] sm:$0x1] %vm356_vm3, %v11939_v6  ;;  %372 = vst.msk [vmem:[#allocation2 + $0x44] sm:$0x1] %vm356_vm3, %v11939_v6  ;;  %v628_v17 = vor.u32 %v626_v9, %v8433_v1  ;;  %v642_v18 = vrot.slane %v640_v11, 7  ;;  %v657_v23 = vshrl.u32 %v8480_v12, 16  ;;  %v7792_v36 = vpack.c.bf16 %v328_v26, %v328_v26 }
  0x75   : > { %784 = vrot.lane.b32.xlu1 %v569_v19, %s8143_s0  ;;  %782 = vrot.lane.b32.xlu0 %v560_v20, %s8143_s0  ;;  %375 = vst.msk [vmem:[#allocation2 + $0x50] sm:$0x1] %vm356_vm3, %v11939_v6  ;;  %378 = vst.msk [vmem:[#allocation2 + $0x5c] sm:$0x1] %vm356_vm3, %v11939_v6  ;;  %v643_v19 = vshll.u32 %v8431_v0, 16  ;;  %v651_v20 = vshll.u32 %v8437_v4, 16  ;;  %v637_v21 = vsel %vm8374_vm2, %v629_v13, %v636_v14 }
  0x76   : > { %381 = vst.msk [vmem:[#allocation2 + $0x68] sm:$0x1] %vm356_vm3, %v11939_v6  ;;  %384 = vst.msk [vmem:[#allocation2 + $0x74] sm:$0x1] %vm356_vm3, %v11939_v6  ;;  %v650_v22 = vrot.slane %v648_v15, 7  ;;  %v665_v24 = vshrl.u32 %v8485_v16, 16  ;;  %v7794_v43 = vpack.c.bf16 %v330_v38, %v330_v38  ;;  %v7795_v63 = vpack.c.bf16 %v331_v56, %v331_v56 }
  0x77   : > { %387 = vst.msk [vmem:[#allocation2 + $0x80] sm:$0x1] %vm356_vm3, %v11939_v6  ;;  %390 = vst.msk [vmem:[#allocation2 + $0x8c] sm:$0x1] %vm356_vm3, %v11939_v6  ;;  %v638_v27 = vrot.slane %v8435_v2, 4  ;;  %v645_v28 = vor.u32 %v643_v19, %v642_v18  ;;  %v646_v29 = vrot.slane %v642_v18, 4  ;;  %v7796_v2 = vpack.c.bf16 %v332_v57, %v332_v57 }
  0x78   : > { %393 = vst.msk [vmem:[#allocation2 + $0x98] sm:$0x1] %vm356_vm3, %v11939_v6  ;;  %396 = vst.msk [vmem:[#allocation2 + $0xa4] sm:$0x1] %vm356_vm3, %v11939_v6  ;;  %v653_v33 = vor.u32 %v651_v20, %v650_v22  ;;  %v659_v34 = vrot.slane %v657_v23, 7  ;;  %v667_v35 = vrot.slane %v665_v24, 7 }
  0x79   : > { %788 = vrot.lane.b32.xlu1 %v577_v30, %s8143_s0  ;;  %786 = vrot.lane.b32.xlu0 %v570_v32, %s8143_s0  ;;  %399 = vst.msk [vmem:[#allocation2 + $0xb0] sm:$0x1] %vm356_vm3, %v11939_v6  ;;  %402 = vst.msk [vmem:[#allocation2 + $0xbc] sm:$0x1] %vm356_vm3, %v11939_v6  ;;  %v668_v30 = vshll.u32 %v8485_v16, 16  ;;  %v7791_v32 = vpack.c.bf16 %v327_v25, %v327_v25  ;;  %v660_v39 = vshll.u32 %v8480_v12, 16 }
  0x7a   : > { %354 = vst.msk [vmem:[#allocation2] sm:$0xf] %vm353_vm4, %v11939_v6  ;;  %355 = vst.msk [vmem:[#allocation2 + $0x4] sm:$0xf] %vm353_vm4, %v11939_v6  ;;  %v655_v40 = vrot.slane %v650_v22, 4  ;;  %v654_v44 = vsel %vm8374_vm2, %v646_v29, %v653_v33  ;;  %v663_v45 = vrot.slane %v659_v34, 4 }
  0x7b   : > { %358 = vst.msk [vmem:[#allocation2 + $0xc] sm:$0xf] %vm353_vm4, %v11939_v6  ;;  %359 = vst.msk [vmem:[#allocation2 + $0x10] sm:$0xf] %vm353_vm4, %v11939_v6  ;;  %v674_v41 = vshrl.u32 %v7791_v32, 16  ;;  %v682_v47 = vshrl.u32 %v7792_v36, 16  ;;  %v662_v48 = vor.u32 %v660_v39, %v659_v34 }
  0x7c   : > { %361 = vst.msk [vmem:[#allocation2 + $0x18] sm:$0xf] %vm353_vm4, %v11939_v6  ;;  %362 = vst.msk [vmem:[#allocation2 + $0x1c] sm:$0xf] %vm353_vm4, %v11939_v6  ;;  %v677_v50 = vshll.u32 %v7791_v32, 16  ;;  %v672_v58 = vrot.slane %v667_v35, 4 }
  0x7d   : > { %792 = vrot.lane.b32.xlu1 %v587_v42, %s8143_s0  ;;  %790 = vrot.lane.b32.xlu0 %v586_v46, %s8143_s0  ;;  %364 = vst.msk [vmem:[#allocation2 + $0x24] sm:$0xf] %vm353_vm4, %v11939_v6  ;;  %365 = vst.msk [vmem:[#allocation2 + $0x28] sm:$0xf] %vm353_vm4, %v11939_v6  ;;  %v7793_v42 = vpack.c.bf16 %v329_v37, %v329_v37  ;;  %v670_v46 = vor.u32 %v668_v30, %v667_v35  ;;  %v676_v49 = vrot.slane %v674_v41, 7  ;;  %v333_v3 = vld [vmem:[%s8337_s9 + $0xe0] sm:$0xff] }
  0x7e   : > { %367 = vst.msk [vmem:[#allocation2 + $0x30] sm:$0xf] %vm353_vm4, %v11939_v6  ;;  %368 = vst.msk [vmem:[#allocation2 + $0x34] sm:$0xf] %vm353_vm4, %v11939_v6  ;;  %v684_v54 = vrot.slane %v682_v47, 7  ;;  %v702_v59 = vshll.u32 %v7794_v43, 16  ;;  %v7797_v13 = vpack.c.bf16 %v333_v3, %v333_v3 }
  0x7f   : > { %370 = vst.msk [vmem:[#allocation2 + $0x3c] sm:$0xf] %vm353_vm4, %v11939_v6  ;;  %371 = vst.msk [vmem:[#allocation2 + $0x40] sm:$0xf] %vm353_vm4, %v11939_v6  ;;  %v691_v51 = vshrl.u32 %v7793_v42, 16  ;;  %v671_v53 = vsel %vm8374_vm2, %v663_v45, %v670_v46  ;;  %v680_v0 = vrot.slane %v676_v49, 4 }
  0x80   : > { %373 = vst.msk [vmem:[#allocation2 + $0x48] sm:$0xf] %vm353_vm4, %v11939_v6  ;;  %374 = vst.msk [vmem:[#allocation2 + $0x4c] sm:$0xf] %vm353_vm4, %v11939_v6  ;;  %v334_v4 = vld [vmem:[%s8337_s9 + $0xe8] sm:$0xff]  ;;  %v694_v5 = vshll.u32 %v7793_v42, 16 }
  0x81   : > { %796 = vrot.lane.b32.xlu1 %v603_v55, %s8143_s0  ;;  %794 = vrot.lane.b32.xlu0 %v594_v52, %s8143_s0  ;;  %376 = vst.msk [vmem:[#allocation2 + $0x54] sm:$0xf] %vm353_vm4, %v11939_v6  ;;  %377 = vst.msk [vmem:[#allocation2 + $0x58] sm:$0xf] %vm353_vm4, %v11939_v6  ;;  %v699_v52 = vshrl.u32 %v7794_v43, 16  ;;  %v685_v55 = vshll.u32 %v7792_v36, 16  ;;  %v7798_v14 = vpack.c.bf16 %v334_v4, %v334_v4 }
  0x82   : > { %379 = vst.msk [vmem:[#allocation2 + $0x60] sm:$0xf] %vm353_vm4, %v11939_v6  ;;  %380 = vst.msk [vmem:[#allocation2 + $0x64] sm:$0xf] %vm353_vm4, %v11939_v6  ;;  %v689_v7 = vrot.slane %v684_v54, 4  ;;  %v716_v12 = vshrl.u32 %v7796_v2, 16 }
  0x83   : > { %382 = vst.msk [vmem:[#allocation2 + $0x6c] sm:$0xf] %vm353_vm4, %v11939_v6  ;;  %383 = vst.msk [vmem:[#allocation2 + $0x70] sm:$0xf] %vm353_vm4, %v11939_v6  ;;  %v701_v62 = vrot.slane %v699_v52, 7  ;;  %v687_v1 = vor.u32 %v685_v55, %v684_v54  ;;  %v711_v18 = vshll.u32 %v7795_v63, 16 }
  0x84   : > { %385 = vst.msk [vmem:[#allocation2 + $0x78] sm:$0xf] %vm353_vm4, %v11939_v6  ;;  %386 = vst.msk [vmem:[#allocation2 + $0x7c] sm:$0xf] %vm353_vm4, %v11939_v6  ;;  %v718_v19 = vrot.slane %v716_v12, 7  ;;  %v719_v20 = vshll.u32 %v7796_v2, 16 }
  0x85   : > { %800 = vrot.lane.b32.xlu1 %v611_v60, %s8143_s0  ;;  %798 = vrot.lane.b32.xlu0 %v604_v61, %s8143_s0  ;;  %388 = vst.msk [vmem:[#allocation2 + $0x84] sm:$0xf] %vm353_vm4, %v11939_v6  ;;  %389 = vst.msk [vmem:[#allocation2 + $0x88] sm:$0xf] %vm353_vm4, %v11939_v6  ;;  %v679_v60 = vor.u32 %v677_v50, %v676_v49  ;;  %v693_v61 = vrot.slane %v691_v51, 7  ;;  %v704_v9 = vor.u32 %v702_v59, %v701_v62  ;;  %v335_v23 = vld [vmem:[%s8337_s9 + $0xf0] sm:$0xff] }
  0x86   : > { %391 = vst.msk [vmem:[#allocation2 + $0x90] sm:$0xf] %vm353_vm4, %v11939_v6  ;;  %392 = vst.msk [vmem:[#allocation2 + $0x94] sm:$0xf] %vm353_vm4, %v11939_v6  ;;  %v688_v11 = vsel %vm8374_vm2, %v680_v0, %v687_v1  ;;  %v733_v22 = vshrl.u32 %v7798_v14, 16  ;;  %v336_v24 = vld [vmem:[%s8337_s9 + $0xf8] sm:$0xff]  ;;  %v7799_v29 = vpack.c.bf16 %v335_v23, %v335_v23  ;;  %v721_v30 = vor.u32 %v719_v20, %v718_v19 }
  0x87   : > { %394 = vst.msk [vmem:[#allocation2 + $0x9c] sm:$0xf] %vm353_vm4, %v11939_v6  ;;  %395 = vst.msk [vmem:[#allocation2 + $0xa0] sm:$0xf] %vm353_vm4, %v11939_v6  ;;  %v696_v16 = vor.u32 %v694_v5, %v693_v61  ;;  %v706_v25 = vrot.slane %v701_v62, 4  ;;  %v7800_v34 = vpack.c.bf16 %v336_v24, %v336_v24  ;;  %v723_v35 = vrot.slane %v718_v19, 4 }
  0x88   : > { %397 = vst.msk [vmem:[#allocation2 + $0xa8] sm:$0xf] %vm353_vm4, %v11939_v6  ;;  %398 = vst.msk [vmem:[#allocation2 + $0xac] sm:$0xf] %vm353_vm4, %v11939_v6  ;;  %v735_v33 = vrot.slane %v733_v22, 7  ;;  %v728_v36 = vshll.u32 %v7797_v13, 16 }
  0x89   : > { %400 = vst.msk [vmem:[#allocation2 + $0xb4] sm:$0xf] %vm353_vm4, %v11939_v6  ;;  %401 = vst.msk [vmem:[#allocation2 + $0xb8] sm:$0xf] %vm353_vm4, %v11939_v6  ;;  %804 = vrot.lane.b32.xlu1 %v621_v8, %s8143_s0  ;;  %802 = vrot.lane.b32.xlu0 %v620_v10, %s8143_s0  ;;  %v697_v8 = vrot.slane %v693_v61, 4  ;;  %v708_v10 = vshrl.u32 %v7795_v63, 16 }
  0x8a   : > { %v742_v37 = vshrl.u32 %v7799_v29, 16  ;;  %v750_v41 = vshrl.u32 %v7800_v34, 16  ;;  %v753_v47 = vshll.u32 %v7800_v34, 16  ;;  %v740_v49 = vrot.slane %v735_v33, 4  ;;  %v912_v55 = vld [vmem:[#allocation2 + $0x8] sm:$0x1] }
  0x8b   : > { %v705_v15 = vsel %vm8374_vm2, %v697_v8, %v704_v9  ;;  %vm910_vm5 = vcmask 131080   ;;  %vm902_vm6 = vcmask 134152   ;;  %vm903_vm7 = vsmask.f32 7938  ;;  %v905_v31 = vld [vmem:[#allocation2] sm:$0xf] }
  0x8c   : > { %v744_v43 = vrot.slane %v742_v37, 7  ;;  %v752_v46 = vrot.slane %v750_v41, 7  ;;  %vm8612_vm8 = vmand %vm910_vm5, %vm483_vm0  ;;  %v915_v61 = vld [vmem:[#allocation2 + $0xc] sm:$0xf]  ;;  %v919_v1 = vld [vmem:[#allocation2 + $0x14] sm:$0x1] }
  0x8d   : > { %808 = vrot.lane.b32.xlu1 %v637_v21, %s8143_s0  ;;  %806 = vrot.lane.b32.xlu0 %v628_v17, %s8143_s0  ;;  %v710_v17 = vrot.slane %v708_v10, 7  ;;  %v725_v21 = vshrl.u32 %v7797_v13, 16  ;;  %vm8617_vm9 = vmand %vm902_vm6, %vm903_vm7  ;;  %s8145_s9 = smov 127   ;;  %v929_v13 = vld [vmem:[#allocation2 + $0x24] sm:$0xf]  ;;  %vm4794_vm13 = vcmask 1042432  }
  0x8e   : > { %v748_v50 = vrot.slane %v744_v43, 4  ;;  %v755_v51 = vor.u32 %v753_v47, %v752_v46  ;;  %v757_v52 = vrot.slane %v752_v46, 4  ;;  %v933_v20 = vld [vmem:[#allocation2 + $0x2c] sm:$0x1]  ;;  %vm2733_vm10 = vsmask.f32 3328 }
  0x8f   : > { %v713_v26 = vor.u32 %v711_v18, %v710_v17  ;;  %v727_v32 = vrot.slane %v725_v21, 7  ;;  %vm2734_vm11 = vsmask.f32 7440  ;;  %v1017_v56 = vld [vmem:[#allocation2 + $0xbc] sm:$0x1]  ;;  %vm4795_vm14 = vcmask 1046532  }
  0x90   : > { %vm8849_vm12 = vmor %vm2733_vm10, %vm2734_vm11  ;;  %vm1512_vm0 = vcmask 130048   ;;  %vm1519_vm1 = vcmask 392192   ;;  %vm1522_vm3 = vcmask 523264   ;;  %vm1525_vm4 = vcmask 654336  }
  0x91   : > { %812 = vrot.lane.b32.xlu1 %v645_v28, %s8143_s0  ;;  %810 = vrot.lane.b32.xlu0 %v638_v27, %s8143_s0  ;;  %v714_v27 = vrot.slane %v710_v17, 4  ;;  %v736_v28 = vshll.u32 %v7798_v14, 16  ;;  %v731_v39 = vrot.slane %v727_v32, 4  ;;  %v730_v42 = vor.u32 %v728_v36, %v727_v32  ;;  %v926_v14 = vld [vmem:[#allocation2 + $0x20] sm:$0x1]  ;;  %vm9489_vm15 = vmor %vm4794_vm13, %vm4795_vm14 }
  0x92   : > { %v943_v32 = vld [vmem:[#allocation2 + $0x3c] sm:$0xf]  ;;  %vm1528_vm5 = vcmask 785408  }
  0x93   : > { %v722_v38 = vsel %vm8374_vm2, %v714_v27, %v721_v30 }
  0x95   : > { %816 = vrot.lane.b32.xlu1 %v655_v40, %s8143_s0  ;;  %814 = vrot.lane.b32.xlu0 %v654_v44, %s8143_s0  ;;  %v738_v40 = vor.u32 %v736_v28, %v735_v33  ;;  %v745_v44 = vshll.u32 %v7799_v29, 16  ;;  %v940_v33 = vld [vmem:[#allocation2 + $0x38] sm:$0x1] }
  0x97   : > { %v739_v45 = vsel %vm8374_vm2, %v731_v39, %v738_v40  ;;  %v947_v39 = vld [vmem:[#allocation2 + $0x44] sm:$0x1] }
  0x99   : > { %820 = vrot.lane.b32.xlu1 %v671_v53, %s8143_s0  ;;  %818 = vrot.lane.b32.xlu0 %v662_v48, %s8143_s0  ;;  %v747_v48 = vor.u32 %v745_v44, %v744_v43  ;;  %v756_v53 = vsel %vm8374_vm2, %v748_v50, %v755_v51  ;;  %v957_v50 = vld [vmem:[#allocation2 + $0x54] sm:$0xf]  ;;  %v954_v51 = vld [vmem:[#allocation2 + $0x50] sm:$0x1]  ;;  %vm1516_vm2 = vcmask 261120  }
  0x9d   : > { %824 = vrot.lane.b32.xlu1 %v679_v60, %s8143_s0  ;;  %822 = vrot.lane.b32.xlu0 %v672_v58, %s8143_s0 }
  0xa1   : > { %828 = vrot.lane.b32.xlu1 %v689_v7, %s8143_s0  ;;  %826 = vrot.lane.b32.xlu0 %v688_v11, %s8143_s0  ;;  %v922_v7 = vld [vmem:[#allocation2 + $0x18] sm:$0xf] }
  0xa5   : > { %832 = vrot.lane.b32.xlu1 %v705_v15, %s8143_s0  ;;  %830 = vrot.lane.b32.xlu0 %v696_v16, %s8143_s0 }
  0xa9   : > { %836 = vrot.lane.b32.xlu1 %v713_v26, %s8143_s0  ;;  %834 = vrot.lane.b32.xlu0 %v706_v25, %s8143_s0  ;;  %v936_v26 = vld [vmem:[#allocation2 + $0x30] sm:$0xf] }
  0xad   : > { %840 = vrot.lane.b32.xlu1 %v723_v35, %s8143_s0  ;;  %838 = vrot.lane.b32.xlu0 %v722_v38, %s8143_s0 }
  0xb1   : > { %844 = vrot.lane.b32.xlu1 %v739_v45, %s8143_s0  ;;  %842 = vrot.lane.b32.xlu0 %v730_v42, %s8143_s0  ;;  %v950_v45 = vld [vmem:[#allocation2 + $0x48] sm:$0xf] }
  0xb5   : > { %848 = vrot.lane.b32.xlu1 %v747_v48, %s8143_s0  ;;  %846 = vrot.lane.b32.xlu0 %v740_v49, %s8143_s0 }
  0xb9   : > { %850 = vrot.lane.b32.xlu0 %v756_v53, %s8143_s0  ;;  %852 = vrot.lane.b32.xlu1 %v757_v52, %s8143_s0 }
  0xcf   : > { %v763_v57 = vpop.permute.xlu1 %762  ;;  %v759_v58 = vpop.permute.xlu0 %758 }
  0xd0   : > { %v913_v59 = vsel %vm8612_vm8, %v763_v57, %v912_v55  ;;  %v906_v60 = vsel %vm8617_vm9, %v759_v58, %v905_v31  ;;  %v961_v58 = vld [vmem:[#allocation2 + $0x5c] sm:$0x1] }
  0xd1   : > { %914 = vst [vmem:[#allocation2 + $0x8] sm:$0x1] %v913_v59  ;;  %907 = vst [vmem:[#allocation2] sm:$0xf] %v906_v60 }
  0xd3   : > { %v765_v62 = vpop.permute.xlu1 %764  ;;  %v761_v63 = vpop.permute.xlu0 %760 }
  0xd4   : > { %v916_v0 = vsel %vm8617_vm9, %v765_v62, %v915_v61  ;;  %909 = vst.msk [vmem:[#allocation2 + $0x4] sm:$0xf] %vm902_vm6, %v761_v63 }
  0xd5   : > { %917 = vst [vmem:[#allocation2 + $0xc] sm:$0xf] %v916_v0  ;;  %v8146_v0 = vmov 1983009808  }
  0xd7   : > { %v769_v2 = vpop.permute.xlu1 %768  ;;  %v767_v3 = vpop.permute.xlu0 %766 }
  0xd8   : > { %v920_v4 = vsel %vm8612_vm8, %v769_v2, %v919_v1  ;;  %918 = vst.msk [vmem:[#allocation2 + $0x10] sm:$0xf] %vm902_vm6, %v767_v3  ;;  %v8631_v5 = vld [vmem:[#allocation2] sm:$0xf]  ;;  %v1070_v1 = vunpack.c.l.s4 %v8146_v0  ;;  %v1072_v2 = vlaneseq }
  0xd9   : > { %921 = vst [vmem:[#allocation2 + $0x14] sm:$0x1] %v920_v4  ;;  %1585 = vrot.lane.b32.xlu0 %v8631_v5, %s8145_s9  ;;  %v964_v3 = vld [vmem:[#allocation2 + $0x60] sm:$0xf] }
  0xdb   : > { %v773_v8 = vpop.permute.xlu1 %772  ;;  %v771_v9 = vpop.permute.xlu0 %770  ;;  %v8635_v10 = vld [vmem:[#allocation2 + $0x4] sm:$0xf] }
  0xdc   : > { %925 = vst.msk [vmem:[#allocation2 + $0x1c] sm:$0xf] %vm902_vm6, %v773_v8  ;;  %v923_v11 = vsel %vm8617_vm9, %v771_v9, %v922_v7  ;;  %1587 = vrot.lane.b32.xlu1 %v8635_v10, %s8145_s9  ;;  %v8642_v12 = vld [vmem:[#allocation2 + $0xc] sm:$0xf] }
  0xdd   : > { %924 = vst [vmem:[#allocation2 + $0x18] sm:$0xf] %v923_v11  ;;  %1589 = vrot.lane.b32.xlu0 %v8642_v12, %s8145_s9  ;;  %v1071_v11 = vunpack.c.0.s8 %v1070_v1 }
  0xdf   : > { %v777_v15 = vpop.permute.xlu1 %776  ;;  %v775_v16 = vpop.permute.xlu0 %774  ;;  %v8646_v17 = vld [vmem:[#allocation2 + $0x10] sm:$0xf] }
  0xe0   : > { %v930_v18 = vsel %vm8617_vm9, %v777_v15, %v929_v13  ;;  %v927_v19 = vsel %vm8612_vm8, %v775_v16, %v926_v14  ;;  %1591 = vrot.lane.b32.xlu1 %v8646_v17, %s8145_s9  ;;  %v1073_v13 = vshrl.u32 %v1072_v2, 7  ;;  %v971_v14 = vld [vmem:[#allocation2 + $0x6c] sm:$0xf]  ;;  %v968_v15 = vld [vmem:[#allocation2 + $0x68] sm:$0x1] }
  0xe1   : > { %931 = vst [vmem:[#allocation2 + $0x24] sm:$0xf] %v930_v18  ;;  %928 = vst [vmem:[#allocation2 + $0x20] sm:$0x1] %v927_v19 }
  0xe3   : > { %v781_v21 = vpop.permute.xlu1 %780  ;;  %v779_v22 = vpop.permute.xlu0 %778  ;;  %v8654_v23 = vld [vmem:[#allocation2 + $0x1c] sm:$0xf] }
  0xe4   : > { %v934_v24 = vsel %vm8612_vm8, %v781_v21, %v933_v20  ;;  %932 = vst.msk [vmem:[#allocation2 + $0x28] sm:$0xf] %vm902_vm6, %v779_v22  ;;  %1595 = vrot.lane.b32.xlu1 %v8654_v23, %s8145_s9  ;;  %v8661_v25 = vld [vmem:[#allocation2 + $0x18] sm:$0xf] }
  0xe5   : > { %935 = vst [vmem:[#allocation2 + $0x2c] sm:$0x1] %v934_v24  ;;  %1593 = vrot.lane.b32.xlu0 %v8661_v25, %s8145_s9  ;;  %v8727_v24 = vsub.s32 %v1071_v11, %v1073_v13 }
  0xe7   : > { %v785_v27 = vpop.permute.xlu1 %784  ;;  %v783_v28 = vpop.permute.xlu0 %782  ;;  %12191 = vst [vmem:[#allocation15_spill] sm:$0xff] %v8727_v24 }
  0xe8   : > { %939 = vst.msk [vmem:[#allocation2 + $0x34] sm:$0xf] %vm902_vm6, %v785_v27  ;;  %v937_v29 = vsel %vm8617_vm9, %v783_v28, %v936_v26  ;;  %v8668_v30 = vld [vmem:[#allocation2 + $0x24] sm:$0xf]  ;;  %v975_v26 = vld [vmem:[#allocation2 + $0x74] sm:$0x1] }
  0xe9   : > { %938 = vst [vmem:[#allocation2 + $0x30] sm:$0xf] %v937_v29  ;;  %1597 = vrot.lane.b32.xlu0 %v8668_v30, %s8145_s9  ;;  %v8147_v28 = vmov 1934713408  }
  0xea   : > { %v1087_v29 = vunpack.c.l.s4 %v8147_v28  ;;  %v999_v28 = vld [vmem:[#allocation2 + $0x9c] sm:$0xf] }
  0xeb   : > { %v789_v34 = vpop.permute.xlu1 %788  ;;  %v787_v35 = vpop.permute.xlu0 %786  ;;  %v8672_v36 = vld [vmem:[#allocation2 + $0x28] sm:$0xf] }
  0xec   : > { %v944_v37 = vsel %vm8617_vm9, %v789_v34, %v943_v32  ;;  %1599 = vrot.lane.b32.xlu1 %v8672_v36, %s8145_s9  ;;  %v941_v38 = vsel %vm8612_vm8, %v787_v35, %v940_v33 }
  0xed   : > { %945 = vst [vmem:[#allocation2 + $0x3c] sm:$0xf] %v944_v37  ;;  %942 = vst [vmem:[#allocation2 + $0x38] sm:$0x1] %v941_v38 }
  0xef   : > { %v793_v40 = vpop.permute.xlu1 %792  ;;  %v791_v41 = vpop.permute.xlu0 %790  ;;  %v8680_v42 = vld [vmem:[#allocation2 + $0x34] sm:$0xf] }
  0xf0   : > { %v948_v43 = vsel %vm8612_vm8, %v793_v40, %v947_v39  ;;  %946 = vst.msk [vmem:[#allocation2 + $0x40] sm:$0xf] %vm902_vm6, %v791_v41  ;;  %1603 = vrot.lane.b32.xlu1 %v8680_v42, %s8145_s9  ;;  %v8687_v44 = vld [vmem:[#allocation2 + $0x30] sm:$0xf]  ;;  %v1204_v39 = vcombine.low %v8635_v10, %v8680_v42  ;;  %v978_v41 = vld [vmem:[#allocation2 + $0x78] sm:$0xf] }
  0xf1   : > { %949 = vst [vmem:[#allocation2 + $0x44] sm:$0x1] %v948_v43  ;;  %1601 = vrot.lane.b32.xlu0 %v8687_v44, %s8145_s9  ;;  %v1068_v38 = vcombine.low %v8631_v5, %v8687_v44  ;;  %v1088_v5 = vunpack.c.0.s8 %v1087_v29  ;;  %v996_v29 = vld [vmem:[#allocation2 + $0x98] sm:$0x1] }
  0xf3   : > { %v797_v46 = vpop.permute.xlu1 %796  ;;  %v795_v47 = vpop.permute.xlu0 %794 }
  0xf4   : > { %953 = vst.msk [vmem:[#allocation2 + $0x4c] sm:$0xf] %vm902_vm6, %v797_v46  ;;  %v951_v48 = vsel %vm8617_vm9, %v795_v47, %v950_v45  ;;  %v8694_v49 = vld [vmem:[#allocation2 + $0x3c] sm:$0xf] }
  0xf5   : > { %952 = vst [vmem:[#allocation2 + $0x48] sm:$0xf] %v951_v48  ;;  %1605 = vrot.lane.b32.xlu0 %v8694_v49, %s8145_s9 }
  0xf7   : > { %v801_v52 = vpop.permute.xlu1 %800  ;;  %v799_v53 = vpop.permute.xlu0 %798  ;;  %v8698_v55 = vld [vmem:[#allocation2 + $0x40] sm:$0xf] }
  0xf8   : > { %v958_v31 = vsel %vm8617_vm9, %v801_v52, %v957_v50  ;;  %v955_v57 = vsel %vm8612_vm8, %v799_v53, %v954_v51  ;;  %1607 = vrot.lane.b32.xlu1 %v8698_v55, %s8145_s9  ;;  %v1238_v34 = vcombine.low %v8646_v17, %v8698_v55  ;;  %v8772_v52 = vrot.slane %v1204_v39, %v8727_v24  ;;  %v1003_v39 = vld [vmem:[#allocation2 + $0xa4] sm:$0x1] }
  0xf9   : > { %959 = vst [vmem:[#allocation2 + $0x54] sm:$0xf] %v958_v31  ;;  %956 = vst [vmem:[#allocation2 + $0x50] sm:$0x1] %v955_v57  ;;  %v985_v31 = vld [vmem:[#allocation2 + $0x84] sm:$0xf] }
  0xfa   : > { %v8761_v46 = vrot.slane %v1238_v34, %v8727_v24  ;;  %v982_v57 = vld [vmem:[#allocation2 + $0x80] sm:$0x1]  ;;  %v2774_v34 = vshrl.u32 %v8646_v17, 16 }
  0xfb   : > { %v805_v59 = vpop.permute.xlu1 %804  ;;  %v803_v60 = vpop.permute.xlu0 %802  ;;  %v8706_v61 = vld [vmem:[#allocation2 + $0x4c] sm:$0xf] }
  0xfc   : > { %v962_v62 = vsel %vm8612_vm8, %v805_v59, %v961_v58  ;;  %960 = vst.msk [vmem:[#allocation2 + $0x58] sm:$0xf] %vm902_vm6, %v803_v60  ;;  %1611 = vrot.lane.b32.xlu1 %v8706_v61, %s8145_s9  ;;  %v1038_v63 = vld [vmem:[#allocation2 + $0x48] sm:$0xf]  ;;  %v1212_v33 = vcombine.low %v8654_v23, %v8706_v61  ;;  %v8776_v58 = vsub.s32 %v1088_v5, %v1073_v13 }
  0xfd   : > { %963 = vst [vmem:[#allocation2 + $0x5c] sm:$0x1] %v962_v62  ;;  %1609 = vrot.lane.b32.xlu0 %v1038_v63, %s8145_s9  ;;  %v1076_v27 = vcombine.low %v8661_v25, %v1038_v63 }
  0xfe   : > { %v8758_v45 = vrot.slane %v1212_v33, %v8727_v24  ;;  %12192 = vst [vmem:[#allocation16_spill] sm:$0xff] %v8776_v58  ;;  %v2770_v33 = vshll.u32 %v8646_v17, 16  ;;  %v2794_v17 = vshll.u32 %v8654_v23, 16 }
  0xff   : > { %v809_v4 = vpop.permute.xlu1 %808  ;;  %v807_v7 = vpop.permute.xlu0 %806  ;;  %v8752_v43 = vrot.slane %v1076_v27, %v8727_v24 }
 0x100   : > { %967 = vst.msk [vmem:[#allocation2 + $0x64] sm:$0xf] %vm902_vm6, %v809_v4  ;;  %v965_v8 = vsel %vm8617_vm9, %v807_v7, %v964_v3  ;;  %v8717_v9 = vld [vmem:[#allocation2 + $0x54] sm:$0xf]  ;;  %v1220_v60 = vcombine.low %v8772_v52, %v8758_v45  ;;  %v989_v4 = vld [vmem:[#allocation2 + $0x8c] sm:$0x1] }
 0x101   : > { %12190 = vst [vmem:[#allocation14_spill] sm:$0xff] %v8717_v9  ;;  %966 = vst [vmem:[#allocation2 + $0x60] sm:$0xf] %v965_v8  ;;  %v1110_v19 = vcombine.low %v8668_v30, %v8717_v9  ;;  %v1102_v30 = vcombine.low %v8642_v12, %v8694_v49  ;;  %v8764_v49 = vrot.slane %v1068_v38, %v8727_v24  ;;  %v8821_v5 = vrot.slane %v2770_v33, 5 }
 0x102   : > { %v8796_v8 = vrot.slane %v1220_v60, %v8776_v58  ;;  %v1006_v60 = vld [vmem:[#allocation2 + $0xa8] sm:$0xf] }
 0x103   : > { %v813_v16 = vpop.permute.xlu1 %812  ;;  %v811_v18 = vpop.permute.xlu0 %810  ;;  %v8721_v20 = vld [vmem:[#allocation2 + $0x58] sm:$0xf]  ;;  %v8741_v25 = vrot.slane %v1110_v19, %v8727_v24  ;;  %v8755_v44 = vrot.slane %v1102_v30, %v8727_v24  ;;  %v1084_v59 = vcombine.low %v8764_v49, %v8752_v43  ;;  %v2746_v19 = vshll.u32 %v8635_v10, 16  ;;  %12195 = vst [vmem:[#allocation19_spill] sm:$0xff] %v8821_v5 }
 0x104   : > { %v972_v21 = vsel %vm8617_vm9, %v813_v16, %v971_v14  ;;  %v969_v22 = vsel %vm8612_vm8, %v811_v18, %v968_v15  ;;  %v1246_v32 = vcombine.low %v8672_v36, %v8721_v20  ;;  %v992_v18 = vld [vmem:[#allocation2 + $0x90] sm:$0xf]  ;;  %v1085_v33 = vcombine.high %v8764_v49, %v8752_v43 }
 0x105   : > { %973 = vst [vmem:[#allocation2 + $0x6c] sm:$0xf] %v972_v21  ;;  %970 = vst [vmem:[#allocation2 + $0x68] sm:$0x1] %v969_v22  ;;  %v1118_v50 = vcombine.low %v8755_v44, %v8741_v25  ;;  %v8793_v7 = vrot.slane %v1084_v59, %v8776_v58  ;;  %v2750_v21 = vshrl.u32 %v8635_v10, 16  ;;  %v8810_v30 = vrot.slane %v2746_v19, 5 }
 0x106   : > { %v8749_v40 = vrot.slane %v1246_v32, %v8727_v24 }
 0x107   : > { %v817_v35 = vpop.permute.xlu1 %816  ;;  %v815_v37 = vpop.permute.xlu0 %814  ;;  %v8783_v0 = vrot.slane %v1118_v50, %v8776_v58  ;;  %12193 = vst [vmem:[#allocation17_spill] sm:$0xff] %v8810_v30  ;;  %v2752_v32 = vrot.slane %v2750_v21, 4 }
 0x108   : > { %v976_v12 = vsel %vm8612_vm8, %v817_v35, %v975_v26  ;;  %974 = vst.msk [vmem:[#allocation2 + $0x70] sm:$0xf] %vm902_vm6, %v815_v37  ;;  %v1254_v53 = vcombine.low %v8761_v46, %v8749_v40 }
 0x109   : > { %977 = vst [vmem:[#allocation2 + $0x74] sm:$0x1] %v976_v12  ;;  %v8818_v12 = vld [vmem:[#allocation2 + $0x8] sm:$0x1]  ;;  %v1344_v16 = vshrl.u32 %v8783_v0, 16 }
 0x10a   : > { %v8790_v3 = vrot.slane %v1254_v53, %v8776_v58  ;;  %12194 = vst [vmem:[#allocation18_spill] sm:$0xff] %v8818_v12  ;;  %v2818_v53 = vshll.u32 %v8672_v36, 16  ;;  %v2756_v59 = vshll.u32 %v8818_v12, 16 }
 0x10b   : > { %v821_v47 = vpop.permute.xlu1 %820  ;;  %v819_v48 = vpop.permute.xlu0 %818 }
 0x10c   : > { %981 = vst.msk [vmem:[#allocation2 + $0x7c] sm:$0xf] %vm902_vm6, %v821_v47  ;;  %v979_v51 = vsel %vm8617_vm9, %v819_v48, %v978_v41  ;;  %v2753_v41 = vor.u32 %v2752_v32, %v8810_v30  ;;  %v2776_v47 = vrot.slane %v2774_v34, 4  ;;  %v2798_v48 = vshrl.u32 %v8654_v23, 16 }
 0x10d   : > { %980 = vst [vmem:[#allocation2 + $0x78] sm:$0xf] %v979_v51  ;;  %v2758_v21 = vrot.slane %v2756_v59, 5  ;;  %v12200_v32 = vmov 0  ;;  %v8883_v59 = vld [vmem:[#allocation2 + $0x60] sm:$0xf] }
 0x10e   : > { %v2777_v23 = vor.u32 %v2776_v47, %v8821_v5  ;;  %v12201_v32 = vsel %vm8849_vm12, 4294967295, %v12200_v32  ;;  %12209 = vst [vmem:[#allocation31_spill] sm:$0xff] %v8883_v59 }
 0x10f   : > { %v825_v62 = vpop.permute.xlu1 %824  ;;  %v823_v63 = vpop.permute.xlu0 %822  ;;  %12202 = vst [vmem:[#allocation24_spill] sm:$0xff] %v12201_v32 }
 0x110   : > { %v986_v1 = vsel %vm8617_vm9, %v825_v62, %v985_v31  ;;  %v983_v2 = vsel %vm8612_vm8, %v823_v63, %v982_v57  ;;  %v2822_v31 = vshrl.u32 %v8672_v36, 16  ;;  %v2754_v62 = vrot.slane %v2753_v41, 4  ;;  %v8831_v63 = vld [vmem:[#allocation2 + $0x14] sm:$0x1] }
 0x111   : > { %987 = vst [vmem:[#allocation2 + $0x84] sm:$0xf] %v986_v1  ;;  %984 = vst [vmem:[#allocation2 + $0x80] sm:$0x1] %v983_v2  ;;  %v8834_v1 = vrot.slane %v2794_v17, 5  ;;  %v2800_v2 = vrot.slane %v2798_v48, 4  ;;  %v1119_v17 = vcombine.high %v8755_v44, %v8741_v25 }
 0x112   : > { %12196 = vst [vmem:[#allocation20_spill] sm:$0xff] %v8831_v63  ;;  %v2780_v34 = vshll.u32 %v8831_v63, 16 }
 0x113   : > { %v829_v11 = vpop.permute.xlu1 %828  ;;  %v827_v13 = vpop.permute.xlu0 %826  ;;  %12197 = vst [vmem:[#allocation21_spill] sm:$0xff] %v8834_v1 }
 0x114   : > { %v990_v15 = vsel %vm8612_vm8, %v829_v11, %v989_v4  ;;  %988 = vst.msk [vmem:[#allocation2 + $0x88] sm:$0xf] %vm902_vm6, %v827_v13  ;;  %v1013_v11 = vld [vmem:[#allocation2 + $0xb4] sm:$0xf]  ;;  %v8836_v13 = vld [vmem:[#allocation2 + $0x20] sm:$0x1] }
 0x115   : > { %991 = vst [vmem:[#allocation2 + $0x8c] sm:$0x1] %v990_v15  ;;  %12198 = vst [vmem:[#allocation22_spill] sm:$0xff] %v8836_v13  ;;  %v8838_v15 = vrot.slane %v2818_v53, 5  ;;  %v2782_v25 = vrot.slane %v2780_v34, 5 }
 0x116   : > { %v8923_v34 = vld [vmem:[#allocation2 + $0x7c] sm:$0xf] }
 0x117   : > { %v833_v22 = vpop.permute.xlu1 %832  ;;  %v831_v26 = vpop.permute.xlu0 %830  ;;  %12199 = vst [vmem:[#allocation23_spill] sm:$0xff] %v8838_v15  ;;  %12215 = vst [vmem:[#allocation37_spill] sm:$0xff] %v8923_v34 }
 0x118   : > { %995 = vst.msk [vmem:[#allocation2 + $0x94] sm:$0xf] %vm902_vm6, %v833_v22  ;;  %v993_v27 = vsel %vm8617_vm9, %v831_v26, %v992_v18  ;;  %v2824_v18 = vrot.slane %v2822_v31, 4  ;;  %v2842_v22 = vshll.u32 %v8680_v42, 16  ;;  %v2846_v26 = vshrl.u32 %v8680_v42, 16 }
 0x119   : > { %994 = vst [vmem:[#allocation2 + $0x90] sm:$0xf] %v993_v27  ;;  %v2866_v27 = vshll.u32 %v8698_v55, 16  ;;  %v2801_v42 = vor.u32 %v2800_v2, %v8834_v1  ;;  %v2890_v31 = vshll.u32 %v8706_v61, 16 }
 0x11a   : > { %v2825_v41 = vor.u32 %v2824_v18, %v8838_v15  ;;  %v8873_v48 = vrot.slane %v2842_v22, 5  ;;  %v8900_v18 = vld [vmem:[#allocation2 + $0x78] sm:$0xf]  ;;  %v8907_v22 = vrot.slane %v1119_v17, %v8776_v58 }
 0x11b   : > { %v837_v35 = vpop.permute.xlu1 %836  ;;  %v835_v37 = vpop.permute.xlu0 %834  ;;  %v8888_v44 = vrot.slane %v2801_v42, 4  ;;  %12212 = vst [vmem:[#allocation34_spill] sm:$0xff] %v8900_v18  ;;  %v8980_v1 = vld [vmem:[#allocation2 + $0x88] sm:$0xf] }
 0x11c   : > { %v1000_v10 = vsel %vm8617_vm9, %v837_v35, %v999_v28  ;;  %v997_v38 = vsel %vm8612_vm8, %v835_v37, %v996_v29  ;;  %v2870_v28 = vshrl.u32 %v8698_v55, 16  ;;  %v1010_v29 = vld [vmem:[#allocation2 + $0xb0] sm:$0x1]  ;;  %v2778_v35 = vrot.slane %v2777_v23, 4  ;;  %12205 = vst [vmem:[#allocation27_spill] sm:$0xff] %v8873_v48  ;;  %12221 = vst [vmem:[#allocation43_spill] sm:$0xff] %v8980_v1 }
 0x11d   : > { %1001 = vst [vmem:[#allocation2 + $0x9c] sm:$0xf] %v1000_v10  ;;  %998 = vst [vmem:[#allocation2 + $0x98] sm:$0x1] %v997_v38  ;;  %v8859_v55 = vsel %vm8849_vm12, %v2754_v62, %v2758_v21  ;;  %v2804_v38 = vshll.u32 %v8836_v13, 16  ;;  %v8986_v30 = vcombine.high %v8907_v22, %v11939_v6 }
 0x11e   : > { %12203 = vst [vmem:[#allocation25_spill] sm:$0xff] %v8859_v55  ;;  %v8879_v53 = vrot.slane %v2870_v28, 4  ;;  %12210 = vst [vmem:[#allocation32_spill] sm:$0xff] %v8888_v44  ;;  %v8915_v28 = vrot.slane %v2825_v41, 4 }
 0x11f   : > { %v841_v50 = vpop.permute.xlu1 %840  ;;  %v839_v51 = vpop.permute.xlu0 %838  ;;  %v8925_v42 = vld [vmem:[#allocation2 + $0x94] sm:$0xf] }
 0x120   : > { %v1004_v57 = vsel %vm8612_vm8, %v841_v50, %v1003_v39  ;;  %1002 = vst.msk [vmem:[#allocation2 + $0xa0] sm:$0xf] %vm902_vm6, %v839_v51  ;;  %v8862_v39 = vld [vmem:[#allocation2 + $0x2c] sm:$0x1]  ;;  %v8869_v47 = vld [vmem:[#allocation2 + $0x90] sm:$0xf] }
 0x121   : > { %1005 = vst [vmem:[#allocation2 + $0xa4] sm:$0x1] %v1004_v57  ;;  %12204 = vst [vmem:[#allocation26_spill] sm:$0xff] %v8862_v39  ;;  %v8875_v50 = vrot.slane %v2846_v26, 4  ;;  %v8877_v51 = vrot.slane %v2866_v27, 5  ;;  %v2894_v57 = vshrl.u32 %v8706_v61, 16  ;;  %v1136_v2 = vcombine.low %v8883_v59, %v8869_v47 }
 0x122   : > { %12208 = vst [vmem:[#allocation30_spill] sm:$0xff] %v8879_v53  ;;  %v1221_v26 = vcombine.high %v8772_v52, %v8758_v45  ;;  %v8913_v27 = vsel %vm8849_vm12, %v2778_v35, %v2782_v25  ;;  %12214 = vst [vmem:[#allocation36_spill] sm:$0xff] %v8915_v28  ;;  %v8927_v45 = vrot.slane %v2890_v31, 5  ;;  %v8931_v35 = vld [vmem:[#allocation2 + $0x6c] sm:$0xf] }
 0x123   : > { %v845_v36 = vpop.permute.xlu1 %844  ;;  %v843_v4 = vpop.permute.xlu0 %842  ;;  %12206 = vst [vmem:[#allocation28_spill] sm:$0xff] %v8875_v50  ;;  %12207 = vst [vmem:[#allocation29_spill] sm:$0xff] %v8877_v51  ;;  %v8929_v52 = vrot.slane %v2894_v57, 4  ;;  %v8948_v31 = vld [vmem:[#allocation2 + $0x84] sm:$0xf]  ;;  %v1367_v50 = vshrl.u32 %v8796_v8, 16 }
 0x124   : > { %1009 = vst.msk [vmem:[#allocation2 + $0xac] sm:$0xf] %vm902_vm6, %v845_v36  ;;  %v1007_v19 = vsel %vm8617_vm9, %v843_v4, %v1006_v60  ;;  %v8886_v60 = vrot.slane %v1085_v33, %v8776_v58  ;;  %v8894_v4 = vrot.slane %v2804_v38, 5  ;;  %12213 = vst [vmem:[#allocation35_spill] sm:$0xff] %v8913_v27  ;;  %v1143_v38 = vrot.slane %v1136_v2, %v8727_v24 }
 0x125   : > { %1008 = vst [vmem:[#allocation2 + $0xa8] sm:$0xf] %v1007_v19  ;;  %v8902_v19 = vld [vmem:[#allocation2 + $0x9c] sm:$0xf]  ;;  %12216 = vst [vmem:[#allocation38_spill] sm:$0xff] %v8925_v42 }
 0x126   : > { %12211 = vst [vmem:[#allocation33_spill] sm:$0xff] %v8894_v4  ;;  %12217 = vst [vmem:[#allocation39_spill] sm:$0xff] %v8927_v45  ;;  %v1354_v25 = vpack.i.b16 %v8907_v22, %v8886_v60 }
 0x127   : > { %v849_v37 = vpop.permute.xlu1 %848  ;;  %v847_v10 = vpop.permute.xlu0 %846  ;;  %12218 = vst [vmem:[#allocation40_spill] sm:$0xff] %v8931_v35  ;;  %v8945_v17 = vld [vmem:[#allocation2 + $0xa0] sm:$0xf] }
 0x128   : > { %v1014_v43 = vsel %vm8617_vm9, %v849_v37, %v1013_v11  ;;  %v1011_v49 = vsel %vm8612_vm8, %v847_v10, %v1010_v29  ;;  %v8937_v10 = vcombine.high %v8886_v60, %v11939_v6  ;;  %v8967_v11 = vcombine.high %v8793_v7, %v11939_v6 }
 0x129   : > { %1015 = vst [vmem:[#allocation2 + $0xb4] sm:$0xf] %v1014_v43  ;;  %1012 = vst [vmem:[#allocation2 + $0xb0] sm:$0x1] %v1011_v49  ;;  %v1170_v43 = vcombine.low %v8931_v35, %v8902_v19  ;;  %v8943_v49 = vld [vmem:[#allocation2 + $0x64] sm:$0xf]  ;;  %v8971_v29 = vcombine.high %v8783_v0, %v11939_v6 }
 0x12a   : > { %12219 = vst [vmem:[#allocation41_spill] sm:$0xff] %v8943_v49  ;;  %v1272_v2 = vcombine.low %v8943_v49, %v8925_v42 }
 0x12b   : > { %v851_v62 = vpop.permute.xlu0 %850  ;;  %v853_v23 = vpop.permute.xlu1 %852  ;;  %v8892_v36 = vld [vmem:[#allocation2 + $0xac] sm:$0xf]  ;;  %v1348_v12 = vpack.i.b16 %v8971_v29, %v8967_v11 }
 0x12c   : > { %1016 = vst.msk [vmem:[#allocation2 + $0xb8] sm:$0xf] %vm902_vm6, %v851_v62  ;;  %v1018_v61 = vsel %vm8612_vm8, %v853_v23, %v1017_v56  ;;  %v8904_v21 = vld [vmem:[#allocation2 + $0xa8] sm:$0xf]  ;;  %v1280_v37 = vcombine.low %v8923_v34, %v8892_v36  ;;  %v8955_v62 = vrot.slane %v1221_v26, %v8776_v58  ;;  %v1255_v23 = vcombine.high %v8761_v46, %v8749_v40 }
 0x12d   : > { %1019 = vst [vmem:[#allocation2 + $0xbc] sm:$0x1] %v1018_v61  ;;  %v1144_v33 = vcombine.low %v8900_v18, %v8904_v21  ;;  %v1343_v46 = vshrl.u32 %v8793_v7, 16  ;;  %v1177_v56 = vrot.slane %v1170_v43, %v8727_v24  ;;  %v1279_v13 = vrot.slane %v1272_v2, %v8727_v24 }
 0x12e   : > { %v1287_v54 = vrot.slane %v1280_v37, %v8727_v24  ;;  %v1269_v37 = vrot.slane %v1255_v23, %v8776_v58  ;;  %v1379_v28 = vshrl.u32 %v8955_v62, 16  ;;  %vm1531_vm6 = vcmask 916480  }
 0x12f   : > { %v1151_v41 = vrot.slane %v1144_v33, %v8727_v24  ;;  %v8963_v33 = vld [vmem:[#allocation2 + $0x70] sm:$0xf]  ;;  %v1345_v23 = vpack.i.b16 %v1344_v16, %v1343_v46 }
 0x130   : > { %v8950_v57 = vld [vmem:[#allocation2 + $0xb4] sm:$0xf]  ;;  %12220 = vst [vmem:[#allocation42_spill] sm:$0xff] %v8963_v33  ;;  %v1306_v40 = vcombine.low %v8963_v33, %v8945_v17  ;;  %v1289_v55 = vcombine.high %v1279_v13, %v1287_v54 }
 0x131   : > { %v1178_v61 = vcombine.low %v8948_v31, %v8950_v57  ;;  %v1152_v26 = vcombine.low %v1143_v38, %v1151_v41  ;;  %v1153_v14 = vcombine.high %v1143_v38, %v1151_v41  ;;  %v1356_v38 = vshrl.u32 %v8907_v22, 16 }
 0x132   : > { %v1313_v6 = vrot.slane %v1306_v40, %v8727_v24  ;;  %v1360_v22 = vpack.i.b16 %v8986_v30, %v8937_v10  ;;  %v12222_v40 = vmov 0  }
 0x133   : > { %v1185_v15 = vrot.slane %v1178_v61, %v8727_v24  ;;  %v8982_v5 = vld [vmem:[#allocation2 + $0xb8] sm:$0xf]  ;;  %v1160_v43 = vrot.slane %v1152_v26, %v8776_v58  ;;  %v1167_v2 = vrot.slane %v1153_v14, %v8776_v58  ;;  %v1288_v14 = vcombine.low %v1279_v13, %v1287_v54 }
 0x134   : > { %v1314_v63 = vcombine.low %v8980_v1, %v8982_v5  ;;  %v1380_v13 = vshrl.u32 %v1269_v37, 16  ;;  %v1368_v54 = vshrl.u32 %v8790_v3, 16  ;;  %v1270_v42 = vcombine.high %v8790_v3, %v12222_v40 }
 0x135   : > { %v1187_v41 = vcombine.high %v1177_v56, %v1185_v15  ;;  %v1186_v61 = vcombine.low %v1177_v56, %v1185_v15  ;;  %v1378_v15 = vpack.i.b16 %v1269_v37, %v8955_v62  ;;  %v9006_v32 = vcombine.high %v1160_v43, %v12222_v40 }
 0x136   : > { %v1321_v27 = vrot.slane %v1314_v63, %v8727_v24  ;;  %v9012_v63 = vrot.slane %v1289_v55, %v8776_v58  ;;  %v1391_v48 = vshrl.u32 %v1160_v43, 16  ;;  %v9024_v55 = vcombine.high %v8955_v62, %v12222_v40 }
 0x137   : > { %v1201_v44 = vrot.slane %v1187_v41, %v8776_v58  ;;  %v1194_v4 = vrot.slane %v1186_v61, %v8776_v58 }
 0x138   : > { %v1323_v26 = vcombine.high %v1313_v6, %v1321_v27  ;;  %v1322_v56 = vcombine.low %v1313_v6, %v1321_v27 }
 0x139   : > { %v1402_v39 = vpack.i.b16 %v1201_v44, %v1167_v2  ;;  %v9009_v16 = vcombine.high %v1194_v4, %v12222_v40  ;;  %v1392_v41 = vshrl.u32 %v1194_v4, 16  ;;  %v1390_v61 = vpack.i.b16 %v1194_v4, %v1160_v43 }
 0x13a   : > { %v1337_v46 = vrot.slane %v1323_v26, %v8776_v58  ;;  %v9018_v27 = vcombine.high %v1201_v44, %v12222_v40  ;;  %v1330_v51 = vrot.slane %v1322_v56, %v8776_v58  ;;  %v1296_v4 = vrot.slane %v1288_v14, %v8776_v58 }
 0x13b   : > { %v7597_v24 = vcombine.low %v1354_v25, %v1402_v39  ;;  %v1396_v6 = vpack.i.b16 %v9009_v16, %v9006_v32  ;;  %v9028_v39 = vcombine.high %v1167_v2, %v12222_v40  ;;  %v9033_v25 = vcombine.high %v1269_v37, %v12222_v40 }
 0x13c   : > { %v1426_v53 = vpack.i.b16 %v1337_v46, %v9012_v63  ;;  %v1393_v43 = vpack.i.b16 %v1392_v41, %v1391_v48  ;;  %v1404_v56 = vshrl.u32 %v1201_v44, 16  ;;  %v12223_v14 = vshrl.u32 %v8886_v60, 16 }
 0x13d   : > { %1457 = vrot.lane.b32.xlu1 %v7597_v24, %s8148_s29  ;;  %v7595_v62 = vcombine.low %v1348_v12, %v1396_v6  ;;  %v1408_v9 = vpack.i.b16 %v9018_v27, %v9028_v39  ;;  %v1416_v24 = vshrl.u32 %v1330_v51, 16  ;;  %v1403_v37 = vshrl.u32 %v1167_v2, 16 }
 0x13e   : > { %v7605_v26 = vcombine.low %v1378_v15, %v1426_v53  ;;  %v1357_v58 = vpack.i.b16 %v1356_v38, %v12223_v14  ;;  %v1236_v48 = vcombine.high %v8796_v8, %v12222_v40  ;;  %v12224_v53 = vpack.i.b16 %v8783_v0, %v8793_v7 }
 0x13f   : > { %v1369_v44 = vpack.i.b16 %v1368_v54, %v1367_v50  ;;  %v1415_v15 = vshrl.u32 %v1296_v4, 16  ;;  %v1381_v41 = vpack.i.b16 %v1380_v13, %v1379_v28  ;;  %v1384_v6 = vpack.i.b16 %v9033_v25, %v9024_v55 }
 0x140   : > { %1495 = vrot.lane.b32.xlu0 %v7605_v26, %s8148_s29  ;;  %v9048_v12 = vcombine.low %v12224_v53, %v1390_v61  ;;  %v7594_v60 = vcombine.low %v1345_v23, %v1393_v43  ;;  %v1405_v38 = vpack.i.b16 %v1404_v56, %v1403_v37  ;;  %v1338_v2 = vcombine.high %v1330_v51, %v12222_v40 }
 0x141   : > { %1447 = vrot.lane.b32.xlu1 %v7595_v62, %s8149_s7  ;;  %v1414_v26 = vpack.i.b16 %v1330_v51, %v1296_v4  ;;  %v7599_v14 = vcombine.low %v1360_v22, %v1408_v9  ;;  %v1417_v34 = vpack.i.b16 %v1416_v24, %v1415_v15  ;;  %v1372_v49 = vpack.i.b16 %v1270_v42, %v1236_v48 }
 0x142   : > { %12225 = vst [vmem:[#allocation44_spill] sm:$0xff] %v9048_v12  ;;  %v1428_v0 = vshrl.u32 %v1337_v46, 16  ;;  %v1304_v7 = vcombine.high %v1296_v4, %v12222_v40  ;;  %v1373_v50 = vshrl.u32 %v1236_v48, 16  ;;  %v1374_v61 = vshrl.u32 %v1270_v42, 16 }
 0x143   : > { %v12226_v28 = vpack.i.b16 %v8790_v3, %v8796_v8  ;;  %v1427_v9 = vshrl.u32 %v9012_v63, 16  ;;  %v1349_v51 = vshrl.u32 %v8967_v11, 16  ;;  %v1350_v23 = vshrl.u32 %v8971_v29, 16 }
 0x144   : > { %1442 = vrot.lane.b32.xlu0 %v7594_v60, %s8150_s27  ;;  %v1385_v22 = vshrl.u32 %v9024_v55, 16  ;;  %v7598_v54 = vcombine.low %v1357_v58, %v1405_v38  ;;  %v1420_v4 = vpack.i.b16 %v1338_v2, %v1304_v7  ;;  %v1339_v42 = vcombine.high %v1337_v46, %v12222_v40 }
 0x145   : > { %v9059_v13 = vcombine.low %v12226_v28, %v1414_v26  ;;  %1467 = vrot.lane.b32.xlu1 %v7599_v14, %s8151_s10  ;;  %v1386_v43 = vshrl.u32 %v9033_v25, 16  ;;  %v7602_v3 = vcombine.low %v1369_v44, %v1417_v34  ;;  %v1429_v8 = vpack.i.b16 %v1428_v0, %v1427_v9 }
 0x146   : > { %v1422_v56 = vshrl.u32 %v1338_v2, 16  ;;  %v1362_v62 = vshrl.u32 %v8986_v30, 16  ;;  %v1305_v11 = vcombine.high %v9012_v63, %v12222_v40  ;;  %v1375_v29 = vpack.i.b16 %v1374_v61, %v1373_v50  ;;  %v9242_v40 = vld [vmem:[#allocation2 + $0x8c] sm:$0x1] }
 0x147   : > { %12227 = vst [vmem:[#allocation45_spill] sm:$0xff] %v9059_v13  ;;  %v2929_v55 = vshrl.u32 %v8883_v59, 16  ;;  %v2932_v58 = vshll.u32 %v8883_v59, 16  ;;  %v1421_v46 = vshrl.u32 %v1304_v7, 16  ;;  %v1351_v25 = vpack.i.b16 %v1350_v23, %v1349_v51 }
 0x148   : > { %1462 = vrot.lane.b32.xlu0 %v7598_v54, %s8152_s6  ;;  %v1361_v34 = vshrl.u32 %v8937_v10, 16  ;;  %v2953_v24 = vshrl.u32 %v8931_v35, 16  ;;  %v7603_v30 = vcombine.low %v1372_v49, %v1420_v4  ;;  %v1432_v37 = vpack.i.b16 %v1339_v42, %v1305_v11 }
 0x149   : > { %1480 = vrot.lane.b32.xlu1 %v7602_v3, %s8150_s27  ;;  %v1398_v48 = vshrl.u32 %v9009_v16, 16  ;;  %v1387_v53 = vpack.i.b16 %v1386_v43, %v1385_v22  ;;  %v7606_v44 = vcombine.low %v1381_v41, %v1429_v8  ;;  %v1423_v63 = vpack.i.b16 %v1422_v56, %v1421_v46 }
 0x14a   : > { %v1434_v15 = vshrl.u32 %v1339_v42, 16  ;;  %v1363_v60 = vpack.i.b16 %v1362_v62, %v1361_v34  ;;  %v1397_v38 = vshrl.u32 %v9006_v32, 16  ;;  %v9080_v2 = vrot.slane %v2929_v55, 4 }
 0x14b   : > { %v9082_v26 = vrot.slane %v2932_v58, 5  ;;  %v2956_v10 = vshll.u32 %v8931_v35, 16  ;;  %v1433_v49 = vshrl.u32 %v1305_v11, 16  ;;  %v9086_v14 = vrot.slane %v2953_v24, 4 }
 0x14c   : > { %1485 = vrot.lane.b32.xlu0 %v7603_v30, %s8149_s7  ;;  %v2977_v16 = vshrl.u32 %v8900_v18, 16  ;;  %v3049_v41 = vshrl.u32 %v8902_v19, 16  ;;  %v7607_v0 = vcombine.low %v1384_v6, %v1432_v37  ;;  %v1399_v7 = vpack.i.b16 %v1398_v48, %v1397_v38 }
 0x14d   : > { %1500 = vrot.lane.b32.xlu1 %v7606_v44, %s8152_s6  ;;  %v1410_v50 = vshrl.u32 %v9018_v27, 16  ;;  %v3052_v32 = vshll.u32 %v8902_v19, 16  ;;  %v7604_v61 = vcombine.low %v1375_v29, %v1423_v63  ;;  %v1435_v28 = vpack.i.b16 %v1434_v15, %v1433_v49 }
 0x14e   : > { %v3073_v9 = vshrl.u32 %v8904_v21, 16  ;;  %v3076_v51 = vshll.u32 %v8904_v21, 16  ;;  %v1409_v23 = vshrl.u32 %v9028_v39, 16  ;;  %v2980_v22 = vshll.u32 %v8900_v18, 16 }
 0x14f   : > { %v3001_v54 = vshrl.u32 %v8948_v31, 16  ;;  %v3004_v6 = vshll.u32 %v8948_v31, 16  ;;  %v3025_v27 = vshrl.u32 %v8869_v47, 16  ;;  %v3028_v4 = vshll.u32 %v8869_v47, 16 }
 0x150   : > { %1505 = vrot.lane.b32.xlu0 %v7607_v0, %s8151_s10  ;;  %v3097_v42 = vshrl.u32 %v8950_v57, 16  ;;  %v3100_v43 = vshll.u32 %v8950_v57, 16  ;;  %v7596_v3 = vcombine.low %v1351_v25, %v1399_v7  ;;  %v1411_v8 = vpack.i.b16 %v1410_v50, %v1409_v23  ;;  %v12230_v23 = vld [vmem:[#allocation38_spill] sm:$0xff] }
 0x151   : > { %1490 = vrot.lane.b32.xlu1 %v7604_v61, %s8153_s30  ;;  %v2958_v39 = vrot.slane %v2956_v10, 5  ;;  %v3051_v56 = vrot.slane %v3049_v41, 4  ;;  %v7608_v62 = vcombine.low %v1387_v53, %v1435_v28  ;;  %v3054_v11 = vrot.slane %v3052_v32, 5  ;;  %v12228_v61 = vld [vmem:[#allocation41_spill] sm:$0xff] }
 0x152   : > { %v3075_v29 = vrot.slane %v3073_v9, 4  ;;  %v3078_v55 = vrot.slane %v3076_v51, 5  ;;  %v2979_v58 = vrot.slane %v2977_v16, 4  ;;  %v2982_v46 = vrot.slane %v2980_v22, 5  ;;  %v12229_v51 = vld [vmem:[#allocation37_spill] sm:$0xff] }
 0x153   : > { %v3003_v34 = vrot.slane %v3001_v54, 4  ;;  %v3006_v24 = vrot.slane %v3004_v6, 5  ;;  %v3027_v30 = vrot.slane %v3025_v27, 4  ;;  %v3030_v37 = vrot.slane %v3028_v4, 5  ;;  %v12231_v4 = vld [vmem:[#allocation14_spill] sm:$0xff] }
 0x154   : > { %1452 = vrot.lane.b32.xlu0 %v7596_v3, %s8153_s30  ;;  %v3099_v48 = vrot.slane %v3097_v42, 4  ;;  %v3102_v25 = vrot.slane %v3100_v43, 5  ;;  %v2897_v44 = vor.u32 %v8929_v52, %v8927_v45  ;;  %v7600_v53 = vcombine.low %v1363_v60, %v1411_v8 }
 0x155   : > { %1510 = vrot.lane.b32.xlu1 %v7608_v62, %s8154_s18  ;;  %v2935_v63 = vor.u32 %v9082_v26, %v9080_v2  ;;  %v2962_v15 = vshll.u32 %v8963_v33, 16  ;;  %v2914_v38 = vshll.u32 %v8721_v20, 16  ;;  %v3055_v10 = vor.u32 %v3054_v11, %v3051_v56 }
 0x156   : > { %v3058_v49 = vshll.u32 %v8945_v17, 16  ;;  %v3079_v16 = vor.u32 %v3078_v55, %v3075_v29  ;;  %v2959_v41 = vor.u32 %v2958_v39, %v9086_v14  ;;  %v2983_v0 = vor.u32 %v2982_v46, %v2979_v58  ;;  %v12232_v29 = vld [vmem:[#allocation28_spill] sm:$0xff]  ;;  %v12233_v55 = vld [vmem:[#allocation27_spill] sm:$0xff] }
 0x157   : > { %v3007_v7 = vor.u32 %v3006_v24, %v3003_v34  ;;  %v3010_v52 = vshll.u32 %v8980_v1, 16  ;;  %v3031_v60 = vor.u32 %v3030_v37, %v3027_v30  ;;  %v3082_v2 = vshll.u32 %v8892_v36, 16  ;;  %v12235_v34 = vld [vmem:[#allocation30_spill] sm:$0xff]  ;;  %v12236_v24 = vld [vmem:[#allocation29_spill] sm:$0xff] }
 0x158   : > { %1472 = vrot.lane.b32.xlu0 %v7600_v53, %s8154_s18  ;;  %v3103_v26 = vor.u32 %v3102_v25, %v3099_v48  ;;  %v3106_v50 = vshll.u32 %v8982_v5, 16  ;;  %v2936_v32 = vrot.slane %v2935_v63, 4  ;;  %v2938_v28 = vshll.u32 %v12228_v61, 16  ;;  %v9148_v53 = vld [vmem:[#allocation2 + $0x38] sm:$0x1] }
 0x159   : > { %1615 = vrot.lane.b32.xlu1 %v8721_v20, %s8145_s9  ;;  %v9121_v9 = vrot.slane %v2962_v15, 5  ;;  %v2986_v14 = vshll.u32 %v12229_v51, 16  ;;  %v3034_v22 = vshll.u32 %v12230_v23, 16  ;;  %v3056_v54 = vrot.slane %v3055_v10, 4  ;;  %v12325_v10 = vld [vmem:[#allocation43_spill] sm:$0xff] }
 0x15a   : > { %v9125_v6 = vrot.slane %v3058_v49, 5  ;;  %v3080_v27 = vrot.slane %v3079_v16, 4  ;;  %v2960_v42 = vrot.slane %v2959_v41, 4  ;;  %v2984_v43 = vrot.slane %v2983_v0, 4  ;;  %v9164_v41 = vld [vmem:[#allocation2 + $0x44] sm:$0x1] }
 0x15b   : > { %v3008_v3 = vrot.slane %v3007_v7, 4  ;;  %v9129_v8 = vrot.slane %v3010_v52, 5  ;;  %v3032_v39 = vrot.slane %v3031_v60, 4  ;;  %v9133_v56 = vrot.slane %v3082_v2, 5  ;;  %v9182_v60 = vld [vmem:[#allocation2 + $0x50] sm:$0x1] }
 0x15c   : > { %1613 = vrot.lane.b32.xlu0 %v12231_v4, %s8145_s9  ;;  %v3104_v62 = vrot.slane %v3103_v26, 4  ;;  %v9135_v11 = vrot.slane %v3106_v50, 5  ;;  %v12234_v58 = vor.u32 %v12232_v29, %v12233_v55  ;;  %v12237_v30 = vor.u32 %v12235_v34, %v12236_v24  ;;  %v12251_v34 = vld [vmem:[#allocation36_spill] sm:$0xff] }
 0x15d   : > { %1619 = vrot.lane.b32.xlu1 %v12228_v61, %s8145_s9  ;;  %v9145_v48 = vrot.slane %v2938_v28, 5  ;;  %v2918_v25 = vshrl.u32 %v8721_v20, 16  ;;  %v9150_v63 = vrot.slane %v2986_v14, 5  ;;  %v9152_v15 = vrot.slane %v3034_v22, 5  ;;  %v9210_v28 = vld [vmem:[#allocation2 + $0x5c] sm:$0x1] }
 0x15e   : > { %v9140_v46 = vrot.slane %v12234_v58, 4  ;;  %v2874_v37 = vrot.slane %v12237_v30, 4  ;;  %v9157_v49 = vsel %vm8849_vm12, %v3056_v54, %v9125_v6  ;;  %v9162_v16 = vsel %vm8849_vm12, %v3080_v27, %v9133_v56  ;;  %12248 = vst [vmem:[#allocation51_spill] sm:$0xff] %v9210_v28  ;;  %v12249_v54 = vld [vmem:[#allocation26_spill] sm:$0xff]  ;;  %v9235_v50 = vld [vmem:[#allocation2 + $0x80] sm:$0x1] }
 0x15f   : > { %12239 = vst [vmem:[#allocation38_spill] sm:$0xff] %v9157_v49  ;;  %12240 = vst [vmem:[#allocation14_spill] sm:$0xff] %v9162_v16  ;;  %v9166_v0 = vrot.slane %v2897_v44, 4  ;;  %v9170_v20 = vrot.slane %v2914_v38, 5  ;;  %v9175_v7 = vsel %vm8849_vm12, %v2936_v32, %v9145_v48  ;;  %v9180_v52 = vsel %vm8849_vm12, %v2960_v42, %v9121_v9 }
 0x160   : > { %1617 = vrot.lane.b32.xlu0 %v8883_v59, %s8145_s9  ;;  %12242 = vst [vmem:[#allocation30_spill] sm:$0xff] %v9175_v7  ;;  %12243 = vst [vmem:[#allocation46_spill] sm:$0xff] %v9180_v52  ;;  %v9189_v44 = vsel %vm8849_vm12, %v2984_v43, %v9150_v63  ;;  %v9194_v38 = vsel %vm8849_vm12, %v3008_v3, %v9129_v8  ;;  %v9199_v2 = vsel %vm8849_vm12, %v3032_v39, %v9152_v15 }
 0x161   : > { %12241 = vst [vmem:[#allocation28_spill] sm:$0xff] %v9170_v20  ;;  %1623 = vrot.lane.b32.xlu1 %v8963_v33, %s8145_s9  ;;  %12244 = vst [vmem:[#allocation47_spill] sm:$0xff] %v9189_v44  ;;  %v9204_v26 = vsel %vm8849_vm12, %v3104_v62, %v9135_v11  ;;  %v2852_v14 = vshll.u32 %v9148_v53, 16  ;;  %v2920_v22 = vrot.slane %v2918_v25, 4  ;;  %v12250_v27 = vshll.u32 %v12249_v54, 16 }
 0x162   : > { %12245 = vst [vmem:[#allocation48_spill] sm:$0xff] %v9194_v38  ;;  %12246 = vst [vmem:[#allocation49_spill] sm:$0xff] %v9199_v2  ;;  %v2876_v42 = vshll.u32 %v9164_v41, 16  ;;  %v3014_v43 = vshrl.u32 %v8980_v1, 16  ;;  %v3062_v3 = vshrl.u32 %v8945_v17, 16  ;;  %v2900_v62 = vshll.u32 %v9182_v60, 16 }
 0x163   : > { %12247 = vst [vmem:[#allocation50_spill] sm:$0xff] %v9204_v26  ;;  %v2830_v4 = vrot.slane %v12250_v27, 5  ;;  %v2966_v29 = vshrl.u32 %v8963_v33, 16  ;;  %v2990_v58 = vshrl.u32 %v12229_v51, 16  ;;  %v2924_v25 = vshll.u32 %v9210_v28, 16 }
 0x164   : > { %1621 = vrot.lane.b32.xlu0 %v8931_v35, %s8145_s9  ;;  %v3038_v27 = vshrl.u32 %v12230_v23, 16  ;;  %v3086_v32 = vshrl.u32 %v8892_v36, 16  ;;  %v9237_v39 = vrot.slane %v2852_v14, 5  ;;  %v2921_v45 = vor.u32 %v2920_v22, %v9170_v20  ;;  %v9248_v35 = vld [vmem:[#allocation2 + $0xbc] sm:$0x1] }
 0x165   : > { %1627 = vrot.lane.b32.xlu1 %v12229_v51, %s8145_s9  ;;  %v9230_v30 = vsel %vm8849_vm12, %v12251_v34, %v2830_v4  ;;  %v2942_v24 = vshrl.u32 %v12228_v61, 16  ;;  %v3110_v55 = vshrl.u32 %v8982_v5, 16  ;;  %v9244_v4 = vld [vmem:[#allocation2 + $0xb0] sm:$0x1]  ;;  %v2878_v34 = vrot.slane %v2876_v42, 5 }
 0x166   : > { %12252 = vst [vmem:[#allocation26_spill] sm:$0xff] %v9230_v30  ;;  %v3016_v12 = vrot.slane %v3014_v43, 4  ;;  %v3064_v13 = vrot.slane %v3062_v3, 4  ;;  %v3088_v28 = vrot.slane %v3086_v32, 4  ;;  %v2902_v14 = vrot.slane %v2900_v62, 5 }
 0x167   : > { %v2968_v51 = vrot.slane %v2966_v29, 4  ;;  %v2992_v22 = vrot.slane %v2990_v58, 4  ;;  %v3112_v20 = vrot.slane %v3110_v55, 4  ;;  %v9252_v33 = vld [vmem:[#allocation2 + $0x98] sm:$0x1]  ;;  %v9256_v42 = vsel %vm8849_vm12, %v2874_v37, %v2878_v34 }
 0x168   : > { %1625 = vrot.lane.b32.xlu0 %v8900_v18, %s8145_s9  ;;  %12253 = vst [vmem:[#allocation36_spill] sm:$0xff] %v9252_v33  ;;  %12254 = vst [vmem:[#allocation52_spill] sm:$0xff] %v9256_v42  ;;  %v2926_v43 = vrot.slane %v2924_v25, 5  ;;  %v3040_v32 = vrot.slane %v3038_v27, 4  ;;  %v3116_v3 = vshll.u32 %v9248_v35, 16  ;;  %v2922_v61 = vrot.slane %v2921_v45, 4 }
 0x169   : > { %1631 = vrot.lane.b32.xlu1 %v8980_v1, %s8145_s9  ;;  %v9259_v18 = vld [vmem:[#allocation2 + $0xa4] sm:$0x1]  ;;  %v2944_v62 = vrot.slane %v2942_v24, 4  ;;  %v2996_v29 = vshll.u32 %v9235_v50, 16  ;;  %v3113_v55 = vor.u32 %v3112_v20, %v9135_v11  ;;  %v9263_v58 = vld [vmem:[#allocation2 + $0x68] sm:$0x1]  ;;  %v3017_v59 = vor.u32 %v3016_v12, %v9129_v8 }
 0x16a   : > { %v9265_v1 = vld [vmem:[#allocation2 + $0x74] sm:$0x1]  ;;  %v3065_v37 = vor.u32 %v3064_v13, %v9125_v6  ;;  %v3089_v25 = vor.u32 %v3088_v28, %v9133_v56  ;;  %v3092_v27 = vshll.u32 %v9244_v4, 16  ;;  %v2969_v45 = vor.u32 %v2968_v51, %v9121_v9 }
 0x16b   : > { %v2993_v24 = vor.u32 %v2992_v22, %v9150_v63  ;;  %v3020_v11 = vshll.u32 %v9242_v40, 16  ;;  %v3044_v20 = vshll.u32 %v9252_v33, 16  ;;  %v3041_v12 = vor.u32 %v3040_v32, %v9152_v15 }
 0x16c   : > { %1629 = vrot.lane.b32.xlu0 %v8948_v31, %s8145_s9  ;;  %v3068_v13 = vshll.u32 %v9259_v18, 16  ;;  %v3114_v6 = vrot.slane %v3113_v55, 4  ;;  %v3118_v8 = vrot.slane %v3116_v3, 5  ;;  %v9283_v56 = vsel %vm8849_vm12, %v2922_v61, %v2926_v43 }
 0x16d   : > { %1635 = vrot.lane.b32.xlu1 %v12230_v23, %s8145_s9  ;;  %12255 = vst [vmem:[#allocation53_spill] sm:$0xff] %v9283_v56  ;;  %v2945_v9 = vor.u32 %v2944_v62, %v9145_v48  ;;  %v2948_v51 = vshll.u32 %v9263_v58, 16  ;;  %v2972_v63 = vshll.u32 %v9265_v1, 16  ;;  %v3018_v28 = vrot.slane %v3017_v59, 4 }
 0x16e   : > { %v3066_v34 = vrot.slane %v3065_v37, 4  ;;  %v3090_v22 = vrot.slane %v3089_v25, 4  ;;  %v3094_v33 = vrot.slane %v3092_v27, 5  ;;  %v2970_v15 = vrot.slane %v2969_v45, 4 }
 0x16f   : > { %v2998_v32 = vrot.slane %v2996_v29, 5  ;;  %v3022_v3 = vrot.slane %v3020_v11, 5  ;;  %v3046_v55 = vrot.slane %v3044_v20, 5  ;;  %v2994_v61 = vrot.slane %v2993_v24, 4 }
 0x170   : > { %1633 = vrot.lane.b32.xlu0 %v8869_v47, %s8145_s9  ;;  %v3042_v48 = vrot.slane %v3041_v12, 4  ;;  %v3070_v43 = vrot.slane %v3068_v13, 5  ;;  %v9294_v62 = vsel %vm8849_vm12, %v3114_v6, %v3118_v8  ;;  %v9299_v59 = vsel %vm8849_vm12, %v9166_v0, %v2902_v14  ;;  %v12261_v0 = vld [vmem:[#allocation33_spill] sm:$0xff]  ;;  %v12262_v14 = vld [vmem:[#allocation32_spill] sm:$0xff] }
 0x171   : > { %1639 = vrot.lane.b32.xlu1 %v8945_v17, %s8145_s9  ;;  %12256 = vst [vmem:[#allocation54_spill] sm:$0xff] %v9294_v62  ;;  %12257 = vst [vmem:[#allocation55_spill] sm:$0xff] %v9299_v59  ;;  %v2946_v37 = vrot.slane %v2945_v9, 4  ;;  %v2950_v25 = vrot.slane %v2948_v51, 5  ;;  %v2974_v29 = vrot.slane %v2972_v63, 5  ;;  %v9303_v27 = vsel %vm8849_vm12, %v3018_v28, %v3022_v3  ;;  %v12269_v63 = vld [vmem:[#allocation15_spill] sm:$0xff] }
 0x172   : > { %12258 = vst [vmem:[#allocation56_spill] sm:$0xff] %v9303_v27  ;;  %v9307_v45 = vsel %vm8849_vm12, %v3066_v34, %v3070_v43  ;;  %v9311_v24 = vsel %vm8849_vm12, %v3090_v22, %v3094_v33  ;;  %v3330_v11 = vcombine.low %v9230_v30, %v9283_v56  ;;  %v9321_v20 = vsel %vm8849_vm12, %v12262_v14, %v12261_v0  ;;  %v12273_v3 = vld [vmem:[#allocation25_spill] sm:$0xff] }
 0x173   : > { %12259 = vst [vmem:[#allocation57_spill] sm:$0xff] %v9307_v45  ;;  %12260 = vst [vmem:[#allocation58_spill] sm:$0xff] %v9311_v24  ;;  %v9327_v12 = vsel %vm8849_vm12, %v9140_v46, %v9237_v39  ;;  %v9331_v33 = vsel %vm8849_vm12, %v2970_v15, %v2974_v29  ;;  %v3398_v13 = vcombine.low %v9303_v27, %v9294_v62  ;;  %v12268_v39 = vld [vmem:[#allocation35_spill] sm:$0xff]  ;;  %v7941_v27 = vld [vmem:[#allocation2 + $0x28] sm:$0xf] }
 0x174   : > { %1637 = vrot.lane.b32.xlu0 %v8902_v19, %s8145_s9  ;;  %12263 = vst [vmem:[#allocation33_spill] sm:$0xff] %v9321_v20  ;;  %12264 = vst [vmem:[#allocation32_spill] sm:$0xff] %v9327_v12  ;;  %v9339_v6 = vsel %vm8849_vm12, %v2994_v61, %v2998_v32  ;;  %v9343_v8 = vsel %vm8849_vm12, %v3042_v48, %v3046_v55  ;;  %v3296_v46 = vcombine.low %v9321_v20, %v9299_v59  ;;  %v7945_v59 = vld [vmem:[#allocation2 + $0x40] sm:$0xf] }
 0x175   : > { %12265 = vst [vmem:[#allocation59_spill] sm:$0xff] %v9331_v33  ;;  %1643 = vrot.lane.b32.xlu1 %v8892_v36, %s8145_s9  ;;  %12266 = vst [vmem:[#allocation60_spill] sm:$0xff] %v9339_v6  ;;  %v3322_v9 = vcombine.low %v12268_v39, %v9256_v42  ;;  %v3220_v51 = vcombine.low %v9175_v7, %v9199_v2  ;;  %v12270_v28 = vcombine.low %v9194_v38, %v9204_v26  ;;  %v12287_v26 = vld [vmem:[#allocation16_spill] sm:$0xff]  ;;  %v7937_v2 = vld [vmem:[#allocation2 + $0x10] sm:$0xf] }
 0x176   : > { %12267 = vst [vmem:[#allocation61_spill] sm:$0xff] %v9343_v8  ;;  %v3364_v22 = vcombine.low %v9339_v6, %v9311_v24  ;;  %v3390_v15 = vcombine.low %v9331_v33, %v9307_v45  ;;  %v9363_v32 = vsel %vm8849_vm12, %v2946_v37, %v2950_v25  ;;  %v3288_v55 = vcombine.low %v12273_v3, %v9327_v12  ;;  %v9436_v45 = vld [vmem:[#allocation2] sm:$0xf]  ;;  %v7939_v6 = vld [vmem:[#allocation2 + $0x1c] sm:$0xf] }
 0x177   : > { %v9355_v34 = vrot.slane %v12270_v28, %v12269_v63  ;;  %12272 = vst [vmem:[#allocation63_spill] sm:$0xff] %v9363_v32  ;;  %v9368_v61 = vrot.slane %v3330_v11, %v12269_v63  ;;  %v12275_v48 = vcombine.low %v9189_v44, %v9162_v16  ;;  %v12277_v37 = vcombine.low %v9180_v52, %v9157_v49  ;;  %v9471_v44 = vpop.permute.xlu1 %1587  ;;  %v9473_v33 = vld [vmem:[#allocation2 + $0x24] sm:$0xf]  ;;  %v7943_v52 = vld [vmem:[#allocation2 + $0x34] sm:$0xf] }
 0x178   : > { %1641 = vrot.lane.b32.xlu0 %v8904_v21, %s8145_s9  ;;  %v3356_v29 = vcombine.low %v9363_v32, %v9343_v8  ;;  %v9387_v11 = vrot.slane %v3398_v13, %v12269_v63  ;;  %v9392_v0 = vrot.slane %v3296_v46, %v12269_v63  ;;  %v9395_v14 = vrot.slane %v3322_v9, %v12269_v63  ;;  %v9481_v32 = vld [vmem:[#allocation2 + $0x30] sm:$0xf]  ;;  %v12303_v39 = vld [vmem:[#allocation20_spill] sm:$0xff] }
 0x179   : > { %12271 = vst [vmem:[#allocation62_spill] sm:$0xff] %v9355_v34  ;;  %12274 = vst [vmem:[#allocation64_spill] sm:$0xff] %v9368_v61  ;;  %v9376_v43 = vrot.slane %v12275_v48, %v12269_v63  ;;  %v9382_v25 = vrot.slane %v12277_v37, %v12269_v63  ;;  %1647 = vrot.lane.b32.xlu1 %v8982_v5, %s8145_s9  ;;  %v9398_v28 = vrot.slane %v3220_v51, %v12269_v63 }
 0x17a   : > { %12279 = vst [vmem:[#allocation67_spill] sm:$0xff] %v9387_v11  ;;  %12280 = vst [vmem:[#allocation68_spill] sm:$0xff] %v9392_v0  ;;  %v9403_v37 = vrot.slane %v3364_v22, %v12269_v63  ;;  %v9406_v13 = vrot.slane %v3390_v15, %v12269_v63  ;;  %v9409_v62 = vrot.slane %v3288_v55, %v12269_v63  ;;  %v9422_v15 = vld [vmem:[#allocation2 + $0x4] sm:$0xf]  ;;  %v4820_v7 = vrot.slane %v7941_v27, 5 }
 0x17b   : > { %12276 = vst [vmem:[#allocation65_spill] sm:$0xff] %v9376_v43  ;;  %12278 = vst [vmem:[#allocation66_spill] sm:$0xff] %v9382_v25  ;;  %v3270_v48 = vcombine.low %v9382_v25, %v9355_v34  ;;  %v3338_v46 = vcombine.low %v9395_v14, %v9368_v61  ;;  %v3236_v9 = vcombine.low %v9398_v28, %v9376_v43  ;;  %v9485_v56 = vpop.permute.xlu1 %1591  ;;  %v4813_v42 = vrot.slane %v7939_v6, 5  ;;  %v7947_v61 = vld [vmem:[#allocation2 + $0x4c] sm:$0xf]  ;;  %v12323_v34 = vld [vmem:[#allocation34_spill] sm:$0xff] }
 0x17c   : > { %12281 = vst [vmem:[#allocation69_spill] sm:$0xff] %v9395_v14  ;;  %12282 = vst [vmem:[#allocation70_spill] sm:$0xff] %v9398_v28  ;;  %1645 = vrot.lane.b32.xlu0 %v8950_v57, %s8145_s9  ;;  %v9418_v51 = vrot.slane %v3356_v29, %v12269_v63  ;;  %v3406_v22 = vcombine.low %v9406_v13, %v9387_v11  ;;  %v3304_v55 = vcombine.low %v9409_v62, %v9392_v0  ;;  %v12304_v0 = vld [vmem:[#allocation22_spill] sm:$0xff] }
 0x17d   : > { %12283 = vst [vmem:[#allocation71_spill] sm:$0xff] %v9403_v37  ;;  %12284 = vst [vmem:[#allocation72_spill] sm:$0xff] %v9406_v13  ;;  %2161 = vrot.lane.b32.xlu1 %v9422_v15, %s8155_s26  ;;  %v9429_v24 = vrot.slane %v3270_v48, %v12287_v26  ;;  %v9434_v29 = vrot.slane %v3338_v46, %v12287_v26  ;;  %v9441_v49 = vrot.slane %v3236_v9, %v12287_v26  ;;  %v9457_v9 = vld [vmem:[#allocation2 + $0xc] sm:$0xf] }
 0x17e   : > { %12285 = vst [vmem:[#allocation73_spill] sm:$0xff] %v9409_v62  ;;  %12286 = vst [vmem:[#allocation74_spill] sm:$0xff] %v9418_v51  ;;  %v3372_v16 = vcombine.low %v9418_v51, %v9403_v37  ;;  %v9444_v8 = vrot.slane %v3406_v22, %v12287_v26  ;;  %v9448_v48 = vrot.slane %v3304_v55, %v12287_v26  ;;  %v7689_v12 = vrot.slane %v9436_v45, 9  ;;  %v9497_v37 = vld [vmem:[#allocation2 + $0x3c] sm:$0xf] }
 0x17f   : > { %12288 = vst [vmem:[#allocation75_spill] sm:$0xff] %v9429_v24  ;;  %12289 = vst [vmem:[#allocation76_spill] sm:$0xff] %v9434_v29  ;;  %v4809_v3 = vrot.slane %v12303_v39, 5  ;;  %v4827_v51 = vrot.slane %v7943_v52, 5  ;;  %v4822_v14 = vrot.slane %v4820_v7, 4  ;;  %v9521_v28 = vpop.permute.xlu1 %1595  ;;  %v12322_v24 = vld [vmem:[#allocation42_spill] sm:$0xff] }
 0x180   : > { %12290 = vst [vmem:[#allocation77_spill] sm:$0xff] %v9436_v45  ;;  %2159 = vrot.lane.b32.xlu0 %v9436_v45, %s8155_s26  ;;  %12291 = vst [vmem:[#allocation78_spill] sm:$0xff] %v9441_v49  ;;  %v9451_v46 = vrot.slane %v3372_v16, %v12287_v26  ;;  %v3450_v38 = vpack.i.b16 %v9434_v29, %v9448_v48  ;;  %v9466_v16 = vld [vmem:[#allocation2 + $0x18] sm:$0xf]  ;;  %v4834_v29 = vrot.slane %v7945_v59, 5  ;;  %v4841_v49 = vrot.slane %v7947_v61, 5 }
 0x181   : > { %12292 = vst [vmem:[#allocation79_spill] sm:$0xff] %v9444_v8  ;;  %2165 = vrot.lane.b32.xlu1 %v7937_v2, %s8155_s26  ;;  %12293 = vst [vmem:[#allocation80_spill] sm:$0xff] %v9448_v48  ;;  %v7691_v48 = vrot.slane %v9466_v16, 9  ;;  %v4862_v25 = vrot.slane %v12322_v24, 5  ;;  %v4904_v45 = vrot.slane %v8982_v5, 5  ;;  %v7702_v5 = vrot.slane %v8902_v19, 9 }
 0x182   : > { %12294 = vst [vmem:[#allocation81_spill] sm:$0xff] %v9451_v46  ;;  %12295 = vst [vmem:[#allocation82_spill] sm:$0xff] %v9457_v9  ;;  %v3498_v22 = vpack.i.b16 %v9444_v8, %v9451_v46  ;;  %v4823_v46 = vrot.slane %v12249_v54, 5  ;;  %v7692_v8 = vrot.slane %v9473_v33, 9  ;;  %v4897_v19 = vrot.slane %v8892_v36, 5 }
 0x183   : > { %12297 = vst [vmem:[#allocation84_spill] sm:$0xff] %v9466_v16  ;;  %12298 = vst [vmem:[#allocation85_spill] sm:$0xff] %v9473_v33 }
 0x184   : > { %2163 = vrot.lane.b32.xlu0 %v9457_v9, %s8155_s26  ;;  %v9464_v55 = vcombine.low %v3450_v38, %v3498_v22  ;;  %v4799_v38 = vrot.slane %v9422_v15, 5  ;;  %v4806_v22 = vrot.slane %v7937_v2, 5  ;;  %12299 = vst [vmem:[#allocation86_spill] sm:$0xff] %v9481_v32  ;;  %v12302_v2 = vld [vmem:[#allocation18_spill] sm:$0xff] }
 0x185   : > { %2169 = vrot.lane.b32.xlu1 %v7939_v6, %s8155_s26  ;;  %v4802_v30 = vrot.slane %v12302_v2, 5  ;;  %12305 = vst [vmem:[#allocation18_spill] sm:$0xff] %v9497_v37  ;;  %v7690_v6 = vrot.slane %v9457_v9, 9  ;;  %v7693_v2 = vrot.slane %v9481_v32, 9 }
 0x186   : > { %12296 = vst [vmem:[#allocation83_spill] sm:$0xff] %v9464_v55  ;;  %v9479_v55 = vpop.permute.xlu0 %1585  ;;  %v4801_v20 = vrot.slane %v4799_v38, 4  ;;  %v4808_v62 = vrot.slane %v4806_v22, 4  ;;  %v9507_v39 = vsel %vm9489_vm15, %v7689_v12, %v4799_v38 }
 0x187   : > { %12306 = vst [vmem:[#allocation20_spill] sm:$0xff] %v9507_v39  ;;  %v9518_v54 = vsel %vm9489_vm15, %v7690_v6, %v4806_v22  ;;  %v9566_v6 = vpop.permute.xlu1 %1599 }
 0x188   : > { %2167 = vrot.lane.b32.xlu0 %v9466_v16, %s8155_s26  ;;  %v9514_v11 = vsel %vm9489_vm15, %v4801_v20, %v4802_v30  ;;  %12309 = vst [vmem:[#allocation88_spill] sm:$0xff] %v9518_v54  ;;  %v9525_v12 = vsel %vm9489_vm15, %v4808_v62, %v4809_v3  ;;  %v9533_v30 = vsel %vm9489_vm15, %v7691_v48, %v4813_v42  ;;  %v9535_v20 = vld [vmem:[#allocation2 + $0x48] sm:$0xf]  ;;  %v7949_v48 = vld [vmem:[#allocation2 + $0x58] sm:$0xf]  ;;  %v4883_v16 = vrot.slane %v12230_v23, 5 }
 0x189   : > { %2173 = vrot.lane.b32.xlu1 %v7941_v27, %s8155_s26  ;;  %v4816_v27 = vrot.slane %v12304_v0, 5  ;;  %v4830_v0 = vrot.slane %v9148_v53, 5  ;;  %12308 = vst [vmem:[#allocation87_spill] sm:$0xff] %v9514_v11  ;;  %12310 = vst [vmem:[#allocation89_spill] sm:$0xff] %v9525_v12  ;;  %v9545_v62 = vsel %vm9489_vm15, %v4822_v14, %v4823_v46  ;;  %v9549_v3 = vsel %vm9489_vm15, %v7693_v2, %v4827_v51 }
 0x18a   : > { %v9510_v13 = vpop.permute.xlu0 %1589  ;;  %12312 = vst [vmem:[#allocation91_spill] sm:$0xff] %v9533_v30  ;;  %12313 = vst [vmem:[#allocation92_spill] sm:$0xff] %v9535_v20  ;;  %v7695_v22 = vrot.slane %v9535_v20, 9  ;;  %v4843_v46 = vrot.slane %v4841_v49, 4  ;;  %v4848_v2 = vrot.slane %v7949_v48, 5  ;;  %v4890_v23 = vrot.slane %v8945_v17, 5 }
 0x18b   : > { %12307 = vst [vmem:[#allocation22_spill] sm:$0xff] %v9510_v13  ;;  %12315 = vst [vmem:[#allocation94_spill] sm:$0xff] %v9545_v62 }
 0x18c   : > { %2171 = vrot.lane.b32.xlu0 %v9473_v33, %s8155_s26  ;;  %12316 = vst [vmem:[#allocation95_spill] sm:$0xff] %v9549_v3  ;;  %v7701_v33 = vrot.slane %v8869_v47, 9  ;;  %v9588_v43 = vsel %vm9489_vm15, %v7695_v22, %v4841_v49  ;;  %v7700_v47 = vrot.slane %v8948_v31, 9  ;;  %v9618_v31 = vpop.permute.xlu1 %1603 }
 0x18d   : > { %2177 = vrot.lane.b32.xlu1 %v7943_v52, %s8155_s26  ;;  %v4815_v52 = vrot.slane %v4813_v42, 4  ;;  %v7694_v42 = vrot.slane %v9497_v37, 9 }
 0x18e   : > { %v9559_v14 = vpop.permute.xlu0 %1593 }
 0x18f   : > { %v9529_v53 = vsel %vm9489_vm15, %v4815_v52, %v4816_v27  ;;  %v4844_v27 = vrot.slane %v9182_v60, 5  ;;  %v9568_v52 = vld [vmem:[#allocation2 + $0x54] sm:$0xf]  ;;  %v12324_v60 = vld [vmem:[#allocation37_spill] sm:$0xff] }
 0x190   : > { %2175 = vrot.lane.b32.xlu0 %v9481_v32, %s8155_s26  ;;  %12311 = vst [vmem:[#allocation90_spill] sm:$0xff] %v9529_v53  ;;  %12319 = vst [vmem:[#allocation98_spill] sm:$0xff] %v9568_v52 }
 0x191   : > { %2181 = vrot.lane.b32.xlu1 %v7945_v59, %s8155_s26  ;;  %v4829_v59 = vrot.slane %v4827_v51, 4  ;;  %v9563_v51 = vsel %vm9489_vm15, %v7694_v42, %v4834_v29  ;;  %v4869_v42 = vrot.slane %v12324_v60, 5  ;;  %v9594_v32 = vsel %vm9489_vm15, %v4843_v46, %v4844_v27 }
 0x192   : > { %12318 = vst [vmem:[#allocation97_spill] sm:$0xff] %v9563_v51  ;;  %12329 = vst [vmem:[#allocation42_spill] sm:$0xff] %v9594_v32 }
 0x193   : > { %v9555_v38 = vsel %vm9489_vm15, %v4829_v59, %v4830_v0  ;;  %v12321_v59 = vld [vmem:[#allocation41_spill] sm:$0xff] }
 0x194   : > { %2179 = vrot.lane.b32.xlu0 %v9497_v37, %s8155_s26  ;;  %12317 = vst [vmem:[#allocation96_spill] sm:$0xff] %v9555_v38  ;;  %12327 = vst [vmem:[#allocation41_spill] sm:$0xff] %v9588_v43 }
 0x195   : > { %2185 = vrot.lane.b32.xlu1 %v7947_v61, %s8155_s26  ;;  %v9541_v61 = vsel %vm9489_vm15, %v7692_v8, %v4820_v7  ;;  %v4837_v7 = vrot.slane %v9164_v41, 5  ;;  %v4836_v8 = vrot.slane %v4834_v29, 4  ;;  %v12320_v41 = vld [vmem:[#allocation31_spill] sm:$0xff]  ;;  %v7699_v29 = vrot.slane %v12323_v34, 9 }
 0x196   : > { %12314 = vst [vmem:[#allocation93_spill] sm:$0xff] %v9541_v61  ;;  %v7697_v0 = vrot.slane %v12320_v41, 9  ;;  %v7696_v34 = vrot.slane %v9568_v52, 9 }
 0x197   : > { %v9584_v9 = vsel %vm9489_vm15, %v4836_v8, %v4837_v7  ;;  %v9599_v7 = vpop.permute.xlu0 %1597  ;;  %v12331_v8 = vrot.slane %v12321_v59, 5  ;;  %v9624_v46 = vsel %vm9489_vm15, %v7699_v29, %v4869_v42  ;;  %v9640_v29 = vsel %vm9489_vm15, %v7702_v5, %v4890_v23  ;;  %v9657_v5 = vpop.permute.xlu1 %1607 }
 0x198   : > { %2183 = vrot.lane.b32.xlu0 %v9535_v20, %s8155_s26  ;;  %12326 = vst [vmem:[#allocation31_spill] sm:$0xff] %v9584_v9  ;;  %v12328_v20 = vld [vmem:[#allocation40_spill] sm:$0xff]  ;;  %v9605_v49 = vsel %vm9489_vm15, %v7696_v34, %v4848_v2  ;;  %v4850_v34 = vrot.slane %v4848_v2, 4  ;;  %v4907_v2 = vrot.slane %v9248_v35, 5  ;;  %v4864_v35 = vrot.slane %v4862_v25, 4 }
 0x199   : > { %2189 = vrot.lane.b32.xlu1 %v7949_v48, %s8155_s26  ;;  %v4876_v48 = vrot.slane %v12325_v10, 5  ;;  %v7698_v37 = vrot.slane %v12328_v20, 9  ;;  %12330 = vst [vmem:[#allocation34_spill] sm:$0xff] %v9605_v49  ;;  %v9611_v22 = vsel %vm9489_vm15, %v7697_v0, %v12331_v8  ;;  %12334 = vst [vmem:[#allocation40_spill] sm:$0xff] %v9624_v46  ;;  %v7704_v0 = vrot.slane %v8950_v57, 9 }
 0x19a   : > { %12332 = vst [vmem:[#allocation37_spill] sm:$0xff] %v9611_v22 }
 0x19b   : > { %v9615_v17 = vsel %vm9489_vm15, %v7698_v37, %v4862_v25  ;;  %v9628_v27 = vsel %vm9489_vm15, %v7700_v47, %v4876_v48  ;;  %v7703_v37 = vrot.slane %v8904_v21, 9  ;;  %v9646_v13 = vpop.permute.xlu0 %1601  ;;  %v9652_v36 = vsel %vm9489_vm15, %v7704_v0, %v4904_v45 }
 0x19c   : > { %2187 = vrot.lane.b32.xlu0 %v9568_v52, %s8155_s26  ;;  %12333 = vst [vmem:[#allocation43_spill] sm:$0xff] %v9615_v17  ;;  %12335 = vst [vmem:[#allocation99_spill] sm:$0xff] %v9628_v27  ;;  %v4906_v52 = vrot.slane %v4904_v45, 4  ;;  %v4975_v21 = vcombine.low %v9518_v54, %v9563_v51  ;;  %v4878_v57 = vrot.slane %v4876_v48, 4  ;;  %v4892_v47 = vrot.slane %v4890_v23, 4  ;;  %v12342_v51 = vld [vmem:[#allocation36_spill] sm:$0xff] }
 0x19d   : > { %2193 = vrot.lane.b32.xlu1 %v12321_v59, %s8155_s26  ;;  %12339 = vst [vmem:[#allocation101_spill] sm:$0xff] %v9652_v36  ;;  %v9666_v45 = vsel %vm9489_vm15, %v7703_v37, %v4897_v19  ;;  %v4865_v0 = vrot.slane %v9265_v1, 5  ;;  %v4899_v23 = vrot.slane %v4897_v19, 4  ;;  %v4983_v37 = vcombine.low %v9541_v61, %v9605_v49 }
 0x19e   : > { %12340 = vst [vmem:[#allocation102_spill] sm:$0xff] %v9666_v45  ;;  %v5051_v25 = vcombine.low %v9628_v27, %v9652_v36  ;;  %v4858_v1 = vrot.slane %v9263_v58, 5  ;;  %v5017_v58 = vcombine.low %v9624_v46, %v9666_v45  ;;  %v5077_v36 = vcombine.low %v9514_v11, %v9555_v38  ;;  %v7954_v45 = vld [vmem:[#allocation2 + $0x90] sm:$0xf] }
 0x1a0   : > { %2191 = vrot.lane.b32.xlu0 %v12320_v41, %s8155_s26  ;;  %v9632_v41 = vsel %vm9489_vm15, %v7701_v33, %v4883_v16  ;;  %v4949_v33 = vcombine.low %v9533_v30, %v9588_v43  ;;  %v4900_v43 = vrot.slane %v9244_v4, 5  ;;  %v7951_v4 = vld [vmem:[#allocation2 + $0x78] sm:$0xf] }
 0x1a1   : > { %2197 = vrot.lane.b32.xlu1 %v12322_v24, %s8155_s26  ;;  %12336 = vst [vmem:[#allocation100_spill] sm:$0xff] %v9632_v41  ;;  %v12337_v24 = vld [vmem:[#allocation51_spill] sm:$0xff] }
 0x1a2   : > { %v4851_v8 = vrot.slane %v12337_v24, 5  ;;  %12338 = vst [vmem:[#allocation51_spill] sm:$0xff] %v9640_v29  ;;  %v4879_v24 = vrot.slane %v9242_v40, 5  ;;  %v4886_v40 = vrot.slane %v12342_v51, 5  ;;  %v4885_v51 = vrot.slane %v4883_v16, 4 }
 0x1a3   : > { %v9697_v19 = vsel %vm9489_vm15, %v4899_v23, %v4900_v43  ;;  %v7952_v23 = vld [vmem:[#allocation2 + $0x84] sm:$0xf]  ;;  %v9762_v15 = vrot.slane %v4949_v33, %v12269_v63 }
 0x1a4   : > { %2195 = vrot.lane.b32.xlu0 %v12328_v20, %s8155_s26  ;;  %v4893_v20 = vrot.slane %v9259_v18, 5  ;;  %v9670_v48 = vsel %vm9489_vm15, %v4850_v34, %v4851_v8  ;;  %v9677_v18 = vsel %vm9489_vm15, %v4906_v52, %v4907_v2  ;;  %v4871_v34 = vrot.slane %v4869_v42, 4  ;;  %12346 = vst [vmem:[#allocation106_spill] sm:$0xff] %v9697_v19  ;;  %v9699_v8 = vpop.permute.xlu0 %1605 }
 0x1a5   : > { %2201 = vrot.lane.b32.xlu1 %v12324_v60, %s8155_s26  ;;  %12341 = vst [vmem:[#allocation103_spill] sm:$0xff] %v9670_v48  ;;  %v4872_v60 = vrot.slane %v9235_v50, 5  ;;  %12343 = vst [vmem:[#allocation36_spill] sm:$0xff] %v9677_v18  ;;  %v9689_v50 = vsel %vm9489_vm15, %v4878_v57, %v4879_v24  ;;  %v5119_v42 = vcombine.low %v9545_v62, %v9670_v48  ;;  %v12347_v57 = vrot.slane %v12321_v59, 5  ;;  %v12380_v62 = vld [vmem:[#allocation44_spill] sm:$0xff] }
 0x1a6   : > { %12344 = vst [vmem:[#allocation104_spill] sm:$0xff] %v9689_v50  ;;  %v9693_v52 = vsel %vm9489_vm15, %v4892_v47, %v4893_v20  ;;  %v5187_v16 = vcombine.low %v9689_v50, %v9677_v18  ;;  %v9709_v47 = vpop.permute.xlu1 %1611  ;;  %v9715_v2 = vsel %vm9489_vm15, %v4864_v35, %v4865_v0  ;;  %v9723_v20 = vsel %vm9489_vm15, %v4885_v51, %v4886_v40 }
 0x1a7   : > { %12345 = vst [vmem:[#allocation105_spill] sm:$0xff] %v9693_v52  ;;  %v4857_v43 = vrot.slane %v12347_v57, 4  ;;  %12348 = vst [vmem:[#allocation107_spill] sm:$0xff] %v9715_v2  ;;  %v9719_v24 = vsel %vm9489_vm15, %v4871_v34, %v4872_v60  ;;  %v5111_v59 = vcombine.low %v9525_v12, %v9584_v9  ;;  %v5179_v0 = vcombine.low %v9715_v2, %v9693_v52  ;;  %v7953_v60 = vld [vmem:[#allocation2 + $0x94] sm:$0xf] }
 0x1a8   : > { %2199 = vrot.lane.b32.xlu0 %v7951_v4, %s8155_s26  ;;  %12349 = vst [vmem:[#allocation108_spill] sm:$0xff] %v9719_v24  ;;  %12350 = vst [vmem:[#allocation109_spill] sm:$0xff] %v9723_v20  ;;  %v5085_v4 = vcombine.low %v9529_v53, %v9594_v32  ;;  %v5153_v35 = vcombine.low %v9719_v24, %v9697_v19  ;;  %v9736_v40 = vrot.slane %v4983_v37, %v12269_v63 }
 0x1a9   : > { %2205 = vrot.lane.b32.xlu1 %v12325_v10, %s8155_s26  ;;  %v5043_v10 = vcombine.low %v9615_v17, %v9640_v29  ;;  %v5009_v34 = vcombine.low %v9611_v22, %v9632_v41  ;;  %v9741_v51 = vrot.slane %v5051_v25, %v12269_v63  ;;  %v9745_v57 = vsel %vm9489_vm15, %v4857_v43, %v4858_v1 }
 0x1aa   : > { %12351 = vst [vmem:[#allocation110_spill] sm:$0xff] %v9736_v40  ;;  %12353 = vst [vmem:[#allocation112_spill] sm:$0xff] %v9745_v57  ;;  %v5145_v37 = vcombine.low %v9745_v57, %v9723_v20  ;;  %v9757_v18 = vrot.slane %v5187_v16, %v12269_v63  ;;  %v9765_v1 = vrot.slane %v4975_v21, %v12269_v63 }
 0x1ab   : > { %12352 = vst [vmem:[#allocation111_spill] sm:$0xff] %v9741_v51  ;;  %12356 = vst [vmem:[#allocation115_spill] sm:$0xff] %v9762_v15  ;;  %v9768_v43 = vrot.slane %v5017_v58, %v12269_v63  ;;  %v9775_v16 = vrot.slane %v5085_v4, %v12269_v63  ;;  %v9778_v19 = vrot.slane %v5111_v59, %v12269_v63 }
 0x1ac   : > { %2203 = vrot.lane.b32.xlu0 %v7952_v23, %s8155_s26  ;;  %v9747_v23 = vpop.permute.xlu0 %1609  ;;  %12355 = vst [vmem:[#allocation114_spill] sm:$0xff] %v9757_v18  ;;  %12357 = vst [vmem:[#allocation116_spill] sm:$0xff] %v9765_v1  ;;  %v9781_v33 = vrot.slane %v5153_v35, %v12269_v63  ;;  %v9784_v21 = vrot.slane %v5179_v0, %v12269_v63  ;;  %v12364_v58 = vcombine.low %v9507_v39, %v9549_v3  ;;  %v12379_v3 = vld [vmem:[#allocation45_spill] sm:$0xff] }
 0x1ad   : > { %2209 = vrot.lane.b32.xlu1 %v7953_v60, %s8155_s26  ;;  %v9752_v60 = vrot.slane %v5119_v42, %v12269_v63  ;;  %12358 = vst [vmem:[#allocation117_spill] sm:$0xff] %v9768_v43  ;;  %v9771_v42 = vrot.slane %v5043_v10, %v12269_v63  ;;  %12360 = vst [vmem:[#allocation119_spill] sm:$0xff] %v9775_v16  ;;  %v9795_v4 = vrot.slane %v5009_v34, %v12269_v63 }
 0x1ae   : > { %12361 = vst [vmem:[#allocation120_spill] sm:$0xff] %v9778_v19  ;;  %12362 = vst [vmem:[#allocation121_spill] sm:$0xff] %v9781_v33  ;;  %v9790_v10 = vrot.slane %v12364_v58, %v12269_v63  ;;  %v9800_v29 = vrot.slane %v5077_v36, %v12269_v63  ;;  %v9805_v52 = vrot.slane %v5145_v37, %v12269_v63 }
 0x1af   : > { %12354 = vst [vmem:[#allocation113_spill] sm:$0xff] %v9752_v60  ;;  %v9759_v25 = vpop.permute.xlu1 %1457  ;;  %12359 = vst [vmem:[#allocation118_spill] sm:$0xff] %v9771_v42  ;;  %v5059_v59 = vcombine.low %v9771_v42, %v9741_v51  ;;  %v5127_v0 = vcombine.low %v9778_v19, %v9752_v60  ;;  %v5195_v58 = vcombine.low %v9784_v21, %v9757_v18 }
 0x1b0   : > { %2207 = vrot.lane.b32.xlu0 %v7954_v45, %s8155_s26  ;;  %12363 = vst [vmem:[#allocation122_spill] sm:$0xff] %v9784_v21  ;;  %12365 = vst [vmem:[#allocation123_spill] sm:$0xff] %v9790_v10  ;;  %v4991_v45 = vcombine.low %v9765_v1, %v9736_v40  ;;  %v4957_v34 = vcombine.low %v9790_v10, %v9762_v15  ;;  %v5025_v20 = vcombine.low %v9795_v4, %v9768_v43 }
 0x1b1   : > { %12366 = vst [vmem:[#allocation124_spill] sm:$0xff] %v9795_v4  ;;  %12367 = vst [vmem:[#allocation125_spill] sm:$0xff] %v9800_v29  ;;  %v5093_v36 = vcombine.low %v9800_v29, %v9775_v16  ;;  %v5161_v27 = vcombine.low %v9805_v52, %v9781_v33  ;;  %v9821_v46 = vrot.slane %v5059_v59, %v12287_v26  ;;  %v12396_v4 = vld [vmem:[#allocation85_spill] sm:$0xff] }
 0x1b2   : > { %v1496_v35 = vpop.permute.xlu0 %1495  ;;  %12368 = vst [vmem:[#allocation126_spill] sm:$0xff] %v9805_v52  ;;  %v9818_v50 = vrot.slane %v4991_v45, %v12287_v26  ;;  %v9824_v24 = vrot.slane %v5127_v0, %v12287_v26  ;;  %v9827_v17 = vrot.slane %v5195_v58, %v12287_v26  ;;  %v9830_v22 = vrot.slane %v4957_v34, %v12287_v26 }
 0x1b3   : > { %v1448_v41 = vpop.permute.xlu1 %1447  ;;  %12370 = vst [vmem:[#allocation128_spill] sm:$0xff] %v9821_v46  ;;  %v9833_v57 = vrot.slane %v5025_v20, %v12287_v26  ;;  %v9836_v45 = vrot.slane %v5093_v36, %v12287_v26  ;;  %v9839_v49 = vrot.slane %v5161_v27, %v12287_v26  ;;  %v2812_v43 = vshll.u32 %v12396_v4, 16 }
 0x1b4   : > { %12369 = vst [vmem:[#allocation127_spill] sm:$0xff] %v9818_v50  ;;  %12371 = vst [vmem:[#allocation129_spill] sm:$0xff] %v9824_v24  ;;  %v5215_v59 = vpack.i.b16 %v9818_v50, %v9830_v22  ;;  %v12395_v50 = vld [vmem:[#allocation84_spill] sm:$0xff] }
 0x1b5   : > { %12372 = vst [vmem:[#allocation130_spill] sm:$0xff] %v9827_v17  ;;  %12373 = vst [vmem:[#allocation131_spill] sm:$0xff] %v9830_v22  ;;  %v5263_v58 = vpack.i.b16 %v9821_v46, %v9833_v57  ;;  %v5239_v34 = vpack.i.b16 %v9824_v24, %v9836_v45  ;;  %v5287_v20 = vpack.i.b16 %v9827_v17, %v9839_v49  ;;  %v2785_v46 = vshrl.u32 %v12395_v50, 16 }
 0x1b6   : > { %v1443_v37 = vpop.permute.xlu0 %1442  ;;  %12374 = vst [vmem:[#allocation132_spill] sm:$0xff] %v9833_v57  ;;  %12375 = vst [vmem:[#allocation133_spill] sm:$0xff] %v9836_v45 }
 0x1b7   : > { %v1468_v2 = vpop.permute.xlu1 %1467  ;;  %12376 = vst [vmem:[#allocation134_spill] sm:$0xff] %v9839_v49  ;;  %v9849_v32 = vcombine.low %v5215_v59, %v5263_v58  ;;  %v9851_v36 = vcombine.low %v5239_v34, %v5287_v20  ;;  %v1515_v30 = vsel %vm1512_vm0, %v12380_v62, %v1443_v37 }
 0x1b8   : > { %v1518_v34 = vsel %vm1516_vm2, %v1515_v30, %v1448_v41 }
 0x1b9   : > { %12377 = vst [vmem:[#allocation135_spill] sm:$0xff] %v9849_v32  ;;  %12378 = vst [vmem:[#allocation136_spill] sm:$0xff] %v9851_v36 }
 0x1ba   : > { %v1463_v0 = vpop.permute.xlu0 %1462 }
 0x1bb   : > { %v1481_v48 = vpop.permute.xlu1 %1480 }
 0x1bc   : > { %v1537_v38 = vsel %vm1512_vm0, %v12379_v3, %v1481_v48 }
 0x1be   : > { %v1486_v27 = vpop.permute.xlu0 %1485 }
 0x1bf   : > { %v1501_v9 = vpop.permute.xlu1 %1500  ;;  %v1539_v53 = vsel %vm1516_vm2, %v1537_v38, %v1486_v27 }
 0x1c2   : > { %v1506_v61 = vpop.permute.xlu0 %1505 }
 0x1c3   : > { %v1491_v54 = vpop.permute.xlu1 %1490 }
 0x1c4   : > { %v1541_v59 = vsel %vm1519_vm1, %v1539_v53, %v1491_v54 }
 0x1c5   : > { %v1543_v58 = vsel %vm1522_vm3, %v1541_v59, %v1496_v35 }
 0x1c6   : > { %v1453_v20 = vpop.permute.xlu0 %1452  ;;  %v1545_v3 = vsel %vm1525_vm4, %v1543_v58, %v1501_v9 }
 0x1c7   : > { %v1521_v48 = vsel %vm1519_vm1, %v1518_v34, %v1453_v20  ;;  %v1511_v36 = vpop.permute.xlu1 %1510  ;;  %v1547_v62 = vsel %vm1528_vm5, %v1545_v3, %v1506_v61  ;;  %v1689_v3 = vcombine.low %v9559_v14, %v9747_v23  ;;  %v1851_v14 = vcombine.low %v9485_v56, %v9657_v5  ;;  %v12381_v23 = vld [vmem:[#allocation22_spill] sm:$0xff] }
 0x1c8   : > { %v1524_v38 = vsel %vm1522_vm3, %v1521_v48, %v9759_v25  ;;  %v1549_v37 = vsel %vm1531_vm6, %v1547_v62, %v1511_v36  ;;  %v1825_v36 = vcombine.low %v9521_v28, %v9709_v47 }
 0x1c9   : > { %1552 = vst [vmem:[#allocation3 + $0x8] sm:$0xff] %v1549_v37  ;;  %v1527_v54 = vsel %vm1525_vm4, %v1524_v38, %v1463_v0  ;;  %v1681_v38 = vcombine.low %v9479_v55, %v9646_v13 }
 0x1ca   : > { %v1530_v53 = vsel %vm1528_vm5, %v1527_v54, %v1468_v2  ;;  %v1473_v35 = vpop.permute.xlu0 %1472  ;;  %v1817_v2 = vcombine.low %v9471_v44, %v9618_v31  ;;  %v1832_v62 = vrot.slane %v1825_v36, %v12269_v63 }
 0x1cb   : > { %v1533_v30 = vsel %vm1531_vm6, %v1530_v53, %v1473_v35  ;;  %v1616_v41 = vpop.permute.xlu1 %1615  ;;  %v1696_v53 = vrot.slane %v1689_v3, %v12269_v63  ;;  %v1688_v31 = vrot.slane %v1681_v38, %v12269_v63  ;;  %v1858_v38 = vrot.slane %v1851_v14, %v12269_v63 }
 0x1cc   : > { %1551 = vst [vmem:[#allocation3] sm:$0xff] %v1533_v30  ;;  %v1824_v37 = vrot.slane %v1817_v2, %v12269_v63  ;;  %v1859_v28 = vcombine.low %v9566_v6, %v1616_v41  ;;  %v1715_v30 = vcombine.low %v12381_v23, %v9699_v8 }
 0x1cd   : > { %v1697_v36 = vcombine.low %v1688_v31, %v1696_v53  ;;  %v1698_v2 = vcombine.high %v1688_v31, %v1696_v53 }
 0x1ce   : > { %v1614_v9 = vpop.permute.xlu0 %1613  ;;  %v1833_v35 = vcombine.low %v1824_v37, %v1832_v62  ;;  %v1834_v13 = vcombine.high %v1824_v37, %v1832_v62  ;;  %v1866_v3 = vrot.slane %v1859_v28, %v12269_v63  ;;  %v1722_v5 = vrot.slane %v1715_v30, %v12269_v63 }
 0x1cf   : > { %v1620_v27 = vpop.permute.xlu1 %1619  ;;  %v1723_v44 = vcombine.low %v9599_v7, %v1614_v9  ;;  %v9902_v28 = vrot.slane %v1697_v36, %v12287_v26 }
 0x1d0   : > { %v9892_v6 = vrot.slane %v1833_v35, %v12287_v26  ;;  %v9898_v8 = vrot.slane %v1834_v13, %v12287_v26  ;;  %v9905_v35 = vrot.slane %v1698_v2, %v12287_v26 }
 0x1d1   : > { %v1730_v7 = vrot.slane %v1723_v44, %v12269_v63  ;;  %v12382_v44 = vmov 0  }
 0x1d2   : > { %v1618_v59 = vpop.permute.xlu0 %1617  ;;  %v9910_v31 = vcombine.high %v9892_v6, %v12382_v44 }
 0x1d3   : > { %v1624_v58 = vpop.permute.xlu1 %1623 }
 0x1d6   : > { %v9870_v61 = vpop.permute.xlu0 %1621 }
 0x1d7   : > { %v1628_v34 = vpop.permute.xlu1 %1627 }
 0x1da   : > { %v1626_v25 = vpop.permute.xlu0 %1625 }
 0x1db   : > { %v1632_v20 = vpop.permute.xlu1 %1631 }
 0x1de   : > { %v1630_v0 = vpop.permute.xlu0 %1629 }
 0x1df   : > { %v1636_v48 = vpop.permute.xlu1 %1635 }
 0x1e0   : > { %v1885_v41 = vcombine.low %v1620_v27, %v1636_v48  ;;  %v1868_v27 = vcombine.high %v1858_v38, %v1866_v3  ;;  %v1731_v48 = vcombine.low %v1722_v5, %v1730_v7 }
 0x1e2   : > { %v1634_v54 = vpop.permute.xlu0 %1633 }
 0x1e3   : > { %v1640_v47 = vpop.permute.xlu1 %1639  ;;  %v1749_v56 = vcombine.low %v1618_v59, %v1634_v54  ;;  %v1892_v59 = vrot.slane %v1885_v41, %v12269_v63  ;;  %v9919_v41 = vrot.slane %v1868_v27, %v12287_v26 }
 0x1e4   : > { %v1919_v62 = vcombine.low %v1624_v58, %v1640_v47  ;;  %v1732_v58 = vcombine.high %v1722_v5, %v1730_v7 }
 0x1e5   : > { %v1756_v47 = vrot.slane %v1749_v56, %v12269_v63 }
 0x1e6   : > { %v1638_v55 = vpop.permute.xlu0 %1637  ;;  %v1926_v30 = vrot.slane %v1919_v62, %v12269_v63  ;;  %v1956_v62 = vshrl.u32 %v9902_v28, 16 }
 0x1e7   : > { %v1644_v32 = vpop.permute.xlu1 %1643  ;;  %v1783_v14 = vcombine.low %v9870_v61, %v1638_v55  ;;  %v9924_v61 = vrot.slane %v1731_v48, %v12287_v26 }
 0x1e8   : > { %v1893_v9 = vcombine.low %v1628_v34, %v1644_v32 }
 0x1ea   : > { %v1900_v37 = vrot.slane %v1893_v9, %v12269_v63  ;;  %v1642_v53 = vpop.permute.xlu0 %1641 }
 0x1eb   : > { %v1757_v32 = vcombine.low %v1626_v25, %v1642_v53  ;;  %v1648_v34 = vpop.permute.xlu1 %1647  ;;  %v1746_v53 = vrot.slane %v1732_v58, %v12287_v26 }
 0x1ec   : > { %v1927_v54 = vcombine.low %v1632_v20, %v1648_v34  ;;  %v1902_v13 = vcombine.high %v1892_v59, %v1900_v37  ;;  %v1867_v20 = vcombine.low %v1858_v38, %v1866_v3  ;;  %v9932_v38 = vcombine.high %v9902_v28, %v12382_v44 }
 0x1ed   : > { %v1764_v23 = vrot.slane %v1757_v32, %v12269_v63  ;;  %v1790_v32 = vrot.slane %v1783_v14, %v12269_v63 }
 0x1ee   : > { %v1934_v25 = vrot.slane %v1927_v54, %v12269_v63  ;;  %v1646_v36 = vpop.permute.xlu0 %1645  ;;  %v9946_v58 = vrot.slane %v1867_v20, %v12287_v26 }
 0x1ef   : > { %v1765_v9 = vcombine.low %v1756_v47, %v1764_v23  ;;  %v1791_v7 = vcombine.low %v1630_v0, %v1646_v36  ;;  %v9921_v5 = vpop.permute.xlu1 %2161  ;;  %v1766_v55 = vcombine.high %v1756_v47, %v1764_v23  ;;  %v9935_v0 = vrot.slane %v1902_v13, %v12287_v26 }
 0x1f0   : > { %v1936_v56 = vcombine.high %v1926_v30, %v1934_v25  ;;  %v1935_v34 = vcombine.low %v1926_v30, %v1934_v25  ;;  %v1991_v13 = vpack.i.b16 %v9919_v41, %v9898_v8  ;;  %v1901_v36 = vcombine.low %v1892_v59, %v1900_v37 }
 0x1f1   : > { %v1798_v3 = vrot.slane %v1791_v7, %v12269_v63  ;;  %v9938_v27 = vrot.slane %v1765_v9, %v12287_v26  ;;  %v1780_v9 = vrot.slane %v1766_v55, %v12287_v26  ;;  %v1957_v25 = vshrl.u32 %v9924_v61, 16 }
 0x1f2   : > { %v9941_v48 = vrot.slane %v1936_v56, %v12287_v26  ;;  %v9943_v54 = vpop.permute.xlu0 %2159  ;;  %v1967_v56 = vpack.i.b16 %v1746_v53, %v9905_v35  ;;  %v1909_v29 = vrot.slane %v1901_v36, %v12287_v26  ;;  %v1968_v36 = vshrl.u32 %v9905_v35, 16 }
 0x1f3   : > { %v1799_v47 = vcombine.low %v1790_v32, %v1798_v3  ;;  %v1800_v14 = vcombine.high %v1790_v32, %v1798_v3  ;;  %v9948_v23 = vpop.permute.xlu1 %2165  ;;  %v9961_v32 = vcombine.high %v9924_v61, %v12382_v44  ;;  %v1943_v3 = vrot.slane %v1935_v34, %v12287_v26 }
 0x1f4   : > { %v2039_v30 = vpack.i.b16 %v9941_v48, %v9935_v0  ;;  %v2004_v55 = vshrl.u32 %v9938_v27, 16  ;;  %v9969_v2 = vcombine.high %v9938_v27, %v12382_v44  ;;  %v1958_v34 = vpack.i.b16 %v1957_v25, %v1956_v62 }
 0x1f5   : > { %v1807_v7 = vrot.slane %v1799_v47, %v12287_v26  ;;  %v1814_v20 = vrot.slane %v1800_v14, %v12287_v26  ;;  %v1961_v19 = vpack.i.b16 %v9961_v32, %v9932_v38  ;;  %v9990_v62 = vcombine.high %v9905_v35, %v12382_v44 }
 0x1f6   : > { %v9964_v37 = vpop.permute.xlu0 %2163  ;;  %v7621_v59 = vcombine.low %v1991_v13, %v2039_v30  ;;  %v1969_v13 = vshrl.u32 %v1746_v53, 16  ;;  %v2016_v30 = vshrl.u32 %v1780_v9, 16  ;;  %v9993_v25 = vcombine.high %v1746_v53, %v12382_v44 }
 0x1f7   : > { %v9971_v47 = vpop.permute.xlu1 %2169  ;;  %v2015_v14 = vpack.i.b16 %v1814_v20, %v1780_v9  ;;  %v2005_v12 = vshrl.u32 %v1807_v7, 16  ;;  %v9974_v39 = vcombine.high %v1807_v7, %v12382_v44  ;;  %v2017_v11 = vshrl.u32 %v1814_v20, 16 }
 0x1f8   : > { %2108 = vrot.lane.b32.xlu0 %v7621_v59, %s8148_s29  ;;  %v9981_v33 = vcombine.high %v1814_v20, %v12382_v44  ;;  %v9999_v59 = vcombine.high %v1780_v9, %v12382_v44  ;;  %v10006_v35 = vcombine.high %v9946_v58, %v12382_v44  ;;  %v1981_v53 = vshrl.u32 %v9946_v58, 16 }
 0x1f9   : > { %v7613_v16 = vcombine.low %v1967_v56, %v2015_v14  ;;  %v2006_v45 = vpack.i.b16 %v2005_v12, %v2004_v55  ;;  %v2009_v52 = vpack.i.b16 %v9974_v39, %v9969_v2  ;;  %v2018_v56 = vpack.i.b16 %v2017_v11, %v2016_v30 }
 0x1fa   : > { %v9983_v49 = vpop.permute.xlu0 %2167  ;;  %v10002_v55 = vcombine.high %v1943_v3, %v12382_v44  ;;  %v1970_v14 = vpack.i.b16 %v1969_v13, %v1968_v36  ;;  %v1979_v60 = vpack.i.b16 %v9946_v58, %v9892_v6  ;;  %v2021_v11 = vpack.i.b16 %v9981_v33, %v9999_v59 }
 0x1fb   : > { %v9995_v12 = vpop.permute.xlu1 %2173  ;;  %2070 = vrot.lane.b32.xlu1 %v7613_v16, %s8148_s29  ;;  %v7610_v20 = vcombine.low %v1958_v34, %v2006_v45  ;;  %v7611_v16 = vcombine.low %v1961_v19, %v2009_v52  ;;  %v1917_v45 = vcombine.high %v1909_v29, %v12382_v44  ;;  %v2029_v9 = vshrl.u32 %v1943_v3, 16 }
 0x1fc   : > { %v1973_v13 = vpack.i.b16 %v9993_v25, %v9990_v62  ;;  %v1955_v30 = vpack.i.b16 %v9924_v61, %v9902_v28  ;;  %v2003_v36 = vpack.i.b16 %v1807_v7, %v9938_v27  ;;  %v2027_v58 = vpack.i.b16 %v1943_v3, %v1909_v29 }
 0x1fd   : > { %2055 = vrot.lane.b32.xlu0 %v7610_v20, %s8150_s27  ;;  %v7614_v52 = vcombine.low %v1970_v14, %v2018_v56  ;;  %v2033_v19 = vpack.i.b16 %v10002_v55, %v1917_v45  ;;  %v2028_v20 = vshrl.u32 %v1909_v29, 16  ;;  %v10028_v21 = vcombine.high %v9941_v48, %v12382_v44 }
 0x1fe   : > { %v10015_v34 = vpop.permute.xlu0 %2171  ;;  %v1985_v18 = vpack.i.b16 %v10006_v35, %v9910_v31  ;;  %v10034_v28 = vcombine.high %v9919_v41, %v12382_v44  ;;  %v10036_v61 = vcombine.low %v1955_v30, %v2003_v36  ;;  %v10038_v27 = vcombine.low %v1979_v60, %v2027_v58 }
 0x1ff   : > { %v10022_v24 = vpop.permute.xlu1 %2177  ;;  %2060 = vrot.lane.b32.xlu1 %v7611_v16, %s8149_s7  ;;  %v7615_v7 = vcombine.low %v1973_v13, %v2021_v11  ;;  %v2030_v3 = vpack.i.b16 %v2029_v9, %v2028_v20  ;;  %v1918_v29 = vcombine.high %v9935_v0, %v12382_v44  ;;  %v2041_v56 = vshrl.u32 %v9941_v48, 16 }
 0x200   : > { %v12383_v16 = vshrl.u32 %v9892_v6, 16  ;;  %v1850_v30 = vcombine.high %v9898_v8, %v12382_v44  ;;  %v1993_v60 = vshrl.u32 %v9919_v41, 16  ;;  %v7619_v11 = vcombine.low %v1985_v18, %v2033_v19 }
 0x201   : > { %2075 = vrot.lane.b32.xlu0 %v7614_v52, %s8152_s6  ;;  %v2045_v9 = vpack.i.b16 %v10028_v21, %v1918_v29  ;;  %v2040_v13 = vshrl.u32 %v9935_v0, 16  ;;  %v2011_v48 = vshrl.u32 %v9974_v39, 16  ;;  %v1992_v6 = vshrl.u32 %v9898_v8, 16 }
 0x202   : > { %v10044_v14 = vpop.permute.xlu0 %2175  ;;  %v1982_v17 = vpack.i.b16 %v1981_v53, %v12383_v16  ;;  %v1997_v58 = vpack.i.b16 %v10034_v28, %v1850_v30  ;;  %v1963_v53 = vshrl.u32 %v9961_v32, 16  ;;  %v2010_v20 = vshrl.u32 %v9969_v2, 16 }
 0x203   : > { %v10051_v36 = vpop.permute.xlu1 %2181  ;;  %2080 = vrot.lane.b32.xlu1 %v7615_v7, %s8151_s10  ;;  %v2042_v52 = vpack.i.b16 %v2041_v56, %v2040_v13  ;;  %v2035_v18 = vshrl.u32 %v10002_v55, 16  ;;  %v1994_v7 = vpack.i.b16 %v1993_v60, %v1992_v6  ;;  %v1962_v0 = vshrl.u32 %v9932_v38, 16 }
 0x204   : > { %v7618_v41 = vcombine.low %v1982_v17, %v2030_v3  ;;  %v1987_v39 = vshrl.u32 %v10006_v35, 16  ;;  %v7623_v8 = vcombine.low %v1997_v58, %v2045_v9  ;;  %v2012_v57 = vpack.i.b16 %v2011_v48, %v2010_v20 }
 0x205   : > { %2098 = vrot.lane.b32.xlu0 %v7619_v11, %s8149_s7  ;;  %v2034_v32 = vshrl.u32 %v1917_v45, 16  ;;  %v2023_v11 = vshrl.u32 %v9981_v33, 16  ;;  %v1964_v17 = vpack.i.b16 %v1963_v53, %v1962_v0  ;;  %v1986_v3 = vshrl.u32 %v9910_v31, 16  ;;  %v7955_v0 = vld [vmem:[#allocation2 + $0x9c] sm:$0xf] }
 0x206   : > { %v2180_v19 = vpop.permute.xlu0 %2179  ;;  %v1975_v2 = vshrl.u32 %v9993_v25, 16  ;;  %v7622_v55 = vcombine.low %v1994_v7, %v2042_v52  ;;  %v2022_v38 = vshrl.u32 %v9999_v59, 16  ;;  %v2047_v35 = vshrl.u32 %v10028_v21, 16 }
 0x207   : > { %v2186_v16 = vpop.permute.xlu1 %2185  ;;  %2093 = vrot.lane.b32.xlu1 %v7618_v41, %s8150_s27  ;;  %v2036_v56 = vpack.i.b16 %v2035_v18, %v2034_v32  ;;  %v1988_v13 = vpack.i.b16 %v1987_v39, %v1986_v3  ;;  %v1974_v9 = vshrl.u32 %v9990_v62, 16  ;;  %v7612_v33 = vcombine.low %v1964_v17, %v2012_v57  ;;  %v7957_v17 = vld [vmem:[#allocation2 + $0xa8] sm:$0xf] }
 0x208   : > { %v2024_v48 = vpack.i.b16 %v2023_v11, %v2022_v38  ;;  %v1999_v31 = vshrl.u32 %v10034_v28, 16  ;;  %v2046_v25 = vshrl.u32 %v1918_v29, 16  ;;  %v1998_v53 = vshrl.u32 %v1850_v30, 16  ;;  %v7959_v38 = vld [vmem:[#allocation2 + $0xb4] sm:$0xf] }
 0x209   : > { %2118 = vrot.lane.b32.xlu0 %v7623_v8, %s8151_s10  ;;  %v1976_v6 = vpack.i.b16 %v1975_v2, %v1974_v9  ;;  %v2289_v59 = vcombine.low %v9964_v37, %v2180_v19  ;;  %v7620_v41 = vcombine.low %v1988_v13, %v2036_v56  ;;  %v2425_v52 = vcombine.low %v9948_v23, %v10051_v36  ;;  %v7956_v8 = vld [vmem:[#allocation2 + $0xa0] sm:$0xf]  ;;  %v7958_v2 = vld [vmem:[#allocation2 + $0xac] sm:$0xf] }
 0x20a   : > { %v2184_v60 = vpop.permute.xlu0 %2183  ;;  %v2048_v62 = vpack.i.b16 %v2047_v35, %v2046_v25  ;;  %v2399_v57 = vcombine.low %v9971_v47, %v2186_v16  ;;  %v2255_v28 = vcombine.low %v9943_v54, %v10044_v14  ;;  %v2000_v29 = vpack.i.b16 %v1999_v31, %v1998_v53  ;;  %v7960_v35 = vld [vmem:[#allocation2 + $0xb8] sm:$0xf] }
 0x20b   : > { %v2190_v45 = vpop.permute.xlu1 %2189  ;;  %2113 = vrot.lane.b32.xlu1 %v7622_v55, %s8152_s6  ;;  %v2263_v21 = vcombine.low %v9983_v49, %v2184_v60  ;;  %v7616_v37 = vcombine.low %v1976_v6, %v2024_v48  ;;  %v2391_v49 = vcombine.low %v9921_v5, %v10022_v24  ;;  %v10092_v23 = vrot.slane %v2289_v59, %v12269_v63 }
 0x20c   : > { %v2433_v58 = vcombine.low %v9995_v12, %v2190_v45  ;;  %v10102_v14 = vrot.slane %v2425_v52, %v12269_v63  ;;  %v10105_v24 = vrot.slane %v2399_v57, %v12269_v63  ;;  %v10108_v5 = vrot.slane %v2255_v28, %v12269_v63  ;;  %v12389_v52 = vld [vmem:[#allocation77_spill] sm:$0xff]  ;;  %v12390_v28 = vld [vmem:[#allocation86_spill] sm:$0xff] }
 0x20d   : > { %2065 = vrot.lane.b32.xlu0 %v7612_v33, %s8153_s30  ;;  %v10095_v47 = vrot.slane %v2263_v21, %v12269_v63  ;;  %v10114_v18 = vrot.slane %v2391_v49, %v12269_v63  ;;  %v2737_v57 = vshrl.u32 %v12389_v52, 16 }
 0x20e   : > { %v2188_v20 = vpop.permute.xlu0 %2187  ;;  %v10089_v30 = vrot.slane %v2433_v58, %v12269_v63 }
 0x20f   : > { %v2297_v12 = vcombine.low %v10015_v34, %v2188_v20  ;;  %2103 = vrot.lane.b32.xlu1 %v7620_v41, %s8153_s30  ;;  %v7624_v34 = vcombine.low %v2000_v29, %v2048_v62  ;;  %v2271_v7 = vcombine.low %v10108_v5, %v10095_v47  ;;  %v2407_v39 = vcombine.low %v10114_v18, %v10105_v24  ;;  %v10146_v13 = vpop.permute.xlu1 %2193  ;;  %v12391_v29 = vld [vmem:[#allocation18_spill] sm:$0xff] }
 0x210   : > { %v2441_v19 = vcombine.low %v10102_v14, %v10089_v30  ;;  %12386 = vst [vmem:[#allocation22_spill] sm:$0xff] %v10146_v13  ;;  %v2857_v49 = vshrl.u32 %v12391_v29, 16  ;;  %v2787_v13 = vrot.slane %v2785_v46, 4 }
 0x211   : > { %v10098_v54 = vrot.slane %v2297_v12, %v12269_v63  ;;  %2085 = vrot.lane.b32.xlu0 %v7616_v37, %s8154_s18  ;;  %v10131_v11 = vrot.slane %v2271_v7, %v12287_v26  ;;  %v10135_v3 = vrot.slane %v2407_v39, %v12287_v26  ;;  %v2833_v12 = vshrl.u32 %v12390_v28, 16  ;;  %v12392_v7 = vld [vmem:[#allocation92_spill] sm:$0xff] }
 0x212   : > { %v10128_v32 = vrot.slane %v2441_v19, %v12287_v26  ;;  %v10144_v60 = vpop.permute.xlu0 %2191  ;;  %v2836_v37 = vshll.u32 %v12390_v28, 16  ;;  %v2860_v19 = vshll.u32 %v12391_v29, 16  ;;  %v2884_v39 = vshll.u32 %v12392_v7, 16 }
 0x213   : > { %v2305_v36 = vcombine.low %v10092_v23, %v10098_v54  ;;  %2123 = vrot.lane.b32.xlu1 %v7624_v34, %s8154_s18  ;;  %v10150_v45 = vpop.permute.xlu1 %2197  ;;  %v2809_v29 = vshrl.u32 %v12396_v4, 16  ;;  %v2835_v22 = vrot.slane %v2833_v12, 4 }
 0x214   : > { %12385 = vst [vmem:[#allocation44_spill] sm:$0xff] %v10128_v32  ;;  %v2862_v51 = vrot.slane %v2860_v19, 5  ;;  %v2886_v40 = vrot.slane %v2884_v39, 5 }
 0x215   : > { %2211 = vrot.lane.b32.xlu0 %v7955_v0, %s8155_s26  ;;  %v10124_v16 = vrot.slane %v2305_v36, %v12287_v26  ;;  %v2740_v36 = vshll.u32 %v12389_v52, 16  ;;  %v2881_v0 = vshrl.u32 %v12392_v7, 16  ;;  %v2788_v52 = vshll.u32 %v12395_v50, 16 }
 0x216   : > { %v10148_v9 = vpop.permute.xlu0 %2195  ;;  %v2838_v7 = vrot.slane %v2836_v37, 5  ;;  %v2811_v12 = vrot.slane %v2809_v29, 4  ;;  %v2814_v37 = vrot.slane %v2812_v43, 5  ;;  %v12397_v29 = vld [vmem:[#allocation27_spill] sm:$0xff] }
 0x217   : > { %12384 = vst [vmem:[#allocation45_spill] sm:$0xff] %v10124_v16  ;;  %2213 = vrot.lane.b32.xlu1 %v7956_v8, %s8155_s26  ;;  %v10154_v48 = vpop.permute.xlu1 %2201  ;;  %v2739_v8 = vrot.slane %v2737_v57, 4  ;;  %v2859_v57 = vrot.slane %v2857_v49, 4  ;;  %v2883_v1 = vrot.slane %v2881_v0, 4  ;;  %v2742_v10 = vrot.slane %v2740_v36, 5 }
 0x218   : > { %v2839_v49 = vor.u32 %v2838_v7, %v2835_v22  ;;  %v2815_v43 = vor.u32 %v2814_v37, %v2811_v12  ;;  %v12403_v12 = vld [vmem:[#allocation28_spill] sm:$0xff]  ;;  %v12410_v7 = vld [vmem:[#allocation22_spill] sm:$0xff] }
 0x219   : > { %2215 = vrot.lane.b32.xlu0 %v7957_v17, %s8155_s26  ;;  %v12393_v17 = vld [vmem:[#allocation82_spill] sm:$0xff]  ;;  %v2863_v39 = vor.u32 %v2862_v51, %v2859_v57  ;;  %v12399_v57 = vld [vmem:[#allocation29_spill] sm:$0xff] }
 0x21a   : > { %v10152_v33 = vpop.permute.xlu0 %2199  ;;  %v2764_v28 = vshll.u32 %v12393_v17, 16 }
 0x21b   : > { %2217 = vrot.lane.b32.xlu1 %v7958_v2, %s8155_s26  ;;  %v10158_v25 = vpop.permute.xlu1 %2205  ;;  %v2761_v2 = vshrl.u32 %v12393_v17, 16 }
 0x21c   : > { %12387 = vst [vmem:[#allocation137_spill] sm:$0xff] %v10158_v25  ;;  %v2766_v50 = vrot.slane %v2764_v28, 5  ;;  %v2887_v25 = vor.u32 %v2886_v40, %v2883_v1 }
 0x21d   : > { %2219 = vrot.lane.b32.xlu0 %v7959_v38, %s8155_s26  ;;  %v2763_v17 = vrot.slane %v2761_v2, 4 }
 0x21e   : > { %v10156_v31 = vpop.permute.xlu0 %2203 }
 0x21f   : > { %2221 = vrot.lane.b32.xlu1 %v7960_v35, %s8155_s26  ;;  %v10162_v6 = vpop.permute.xlu1 %2209  ;;  %v12394_v35 = vld [vmem:[#allocation98_spill] sm:$0xff]  ;;  %v2767_v2 = vor.u32 %v2766_v50, %v2763_v17  ;;  %v12402_v17 = vld [vmem:[#allocation17_spill] sm:$0xff] }
 0x220   : > { %12388 = vst [vmem:[#allocation138_spill] sm:$0xff] %v10162_v6  ;;  %v2905_v56 = vshrl.u32 %v12394_v35, 16  ;;  %v2908_v55 = vshll.u32 %v12394_v35, 16  ;;  %v2790_v6 = vrot.slane %v2788_v52, 5 }
 0x222   : > { %v10160_v58 = vpop.permute.xlu0 %2207  ;;  %v2907_v32 = vrot.slane %v2905_v56, 4  ;;  %v2910_v16 = vrot.slane %v2908_v55, 5  ;;  %v2791_v28 = vor.u32 %v2790_v6, %v2787_v13 }
 0x224   : > { %v2911_v36 = vor.u32 %v2910_v16, %v2907_v32 }
 0x226   : > { %v2912_v6 = vrot.slane %v2911_v36, 4 }
 0x228   : > { %v10219_v37 = vsel %vm8849_vm12, %v2912_v6, %v12403_v12 }
 0x229   : > { %12404 = vst [vmem:[#allocation86_spill] sm:$0xff] %v10219_v37 }
 0x26a   : > { %v2109_v53 = vpop.permute.xlu0 %2108 }
 0x26d   : > { %v2071_v59 = vpop.permute.xlu1 %2070 }
 0x26f   : > { %v2056_v21 = vpop.permute.xlu0 %2055 }
 0x270   : > { %v2127_v35 = vsel %vm1512_vm0, %v10036_v61, %v2056_v21  ;;  %v2743_v21 = vor.u32 %v2742_v10, %v2739_v8  ;;  %v2864_v10 = vrot.slane %v2863_v39, 4  ;;  %v2888_v8 = vrot.slane %v2887_v25, 4  ;;  %v12406_v39 = vld [vmem:[#allocation21_spill] sm:$0xff] }
 0x271   : > { %v2061_v41 = vpop.permute.xlu1 %2060 }
 0x272   : > { %v2129_v19 = vsel %vm1516_vm2, %v2127_v35, %v2061_v41  ;;  %v2840_v41 = vrot.slane %v2839_v49, 4  ;;  %v2744_v16 = vrot.slane %v2743_v21, 4  ;;  %v12400_v35 = vld [vmem:[#allocation39_spill] sm:$0xff] }
 0x273   : > { %v2076_v62 = vpop.permute.xlu0 %2075  ;;  %v12405_v49 = vld [vmem:[#allocation19_spill] sm:$0xff] }
 0x274   : > { %v10199_v25 = vsel %vm8849_vm12, %v2840_v41, %v12397_v29  ;;  %v10214_v50 = vsel %vm8849_vm12, %v2744_v16, %v12402_v17  ;;  %v12409_v29 = vld [vmem:[#allocation138_spill] sm:$0xff] }
 0x275   : > { %v2081_v20 = vpop.permute.xlu1 %2080  ;;  %v3152_v21 = vcombine.low %v10214_v50, %v10199_v25 }
 0x277   : > { %v2099_v34 = vpop.permute.xlu0 %2098  ;;  %v10252_v41 = vrot.slane %v3152_v21, %v12269_v63 }
 0x279   : > { %v2094_v38 = vpop.permute.xlu1 %2093 }
 0x27a   : > { %v2143_v4 = vsel %vm1512_vm0, %v10038_v27, %v2094_v38  ;;  %v2792_v38 = vrot.slane %v2791_v28, 4 }
 0x27b   : > { %v2119_v42 = vpop.permute.xlu0 %2118  ;;  %v2145_v46 = vsel %vm1516_vm2, %v2143_v4, %v2099_v34 }
 0x27d   : > { %v2114_v15 = vpop.permute.xlu1 %2113 }
 0x27f   : > { %v2066_v0 = vpop.permute.xlu0 %2065 }
 0x280   : > { %v2131_v61 = vsel %vm1519_vm1, %v2129_v19, %v2066_v0  ;;  %v2323_v0 = vcombine.low %v10144_v60, %v10160_v58 }
 0x281   : > { %v2133_v56 = vsel %vm1522_vm3, %v2131_v61, %v2071_v59  ;;  %v2104_v55 = vpop.permute.xlu1 %2103  ;;  %v10231_v61 = vsel %vm8849_vm12, %v2792_v38, %v12406_v39 }
 0x282   : > { %v2147_v27 = vsel %vm1519_vm1, %v2145_v46, %v2104_v55  ;;  %v2135_v22 = vsel %vm1525_vm4, %v2133_v56, %v2076_v62  ;;  %v2768_v62 = vrot.slane %v2767_v2, 4  ;;  %v12407_v56 = vld [vmem:[#allocation23_spill] sm:$0xff]  ;;  %v2272_v46 = vcombine.high %v10108_v5, %v10095_v47 }
 0x283   : > { %v2149_v51 = vsel %vm1522_vm3, %v2147_v27, %v2109_v53  ;;  %v2137_v40 = vsel %vm1528_vm5, %v2135_v22, %v2081_v20  ;;  %v2086_v1 = vpop.permute.xlu0 %2085  ;;  %v2816_v53 = vrot.slane %v2815_v43, 4  ;;  %v2330_v22 = vrot.slane %v2323_v0, %v12269_v63 }
 0x284   : > { %v2139_v59 = vsel %vm1531_vm6, %v2137_v40, %v2086_v1  ;;  %v2151_v34 = vsel %vm1525_vm4, %v2149_v51, %v2114_v15  ;;  %v10204_v15 = vsel %vm8849_vm12, %v2864_v10, %v12399_v57  ;;  %v10224_v19 = vsel %vm8849_vm12, %v2768_v62, %v12405_v49 }
 0x285   : > { %2157 = vst [vmem:[#allocation3 + $0x10] sm:$0xff] %v2139_v59  ;;  %v2124_v32 = vpop.permute.xlu1 %2123  ;;  %v2153_v13 = vsel %vm1528_vm5, %v2151_v34, %v2119_v42  ;;  %v10209_v42 = vsel %vm8849_vm12, %v2888_v8, %v12400_v35  ;;  %v10238_v55 = vsel %vm8849_vm12, %v2816_v53, %v12407_v56  ;;  %v3186_v58 = vcombine.low %v10224_v19, %v10204_v15  ;;  %v12411_v35 = vld [vmem:[#allocation45_spill] sm:$0xff] }
 0x286   : > { %v2155_v52 = vsel %vm1531_vm6, %v2153_v13, %v2124_v32  ;;  %12401 = vst [vmem:[#allocation77_spill] sm:$0xff] %v10209_v42  ;;  %v3160_v60 = vcombine.low %v10231_v61, %v10209_v42  ;;  %v3194_v28 = vcombine.low %v10238_v55, %v10219_v37  ;;  %v10255_v47 = vrot.slane %v2272_v46, %v12287_v26 }
 0x287   : > { %2158 = vst [vmem:[#allocation3 + $0x18] sm:$0xff] %v2155_v52  ;;  %v2212_v20 = vpop.permute.xlu0 %2211  ;;  %v2306_v1 = vcombine.high %v10092_v23, %v10098_v54  ;;  %v2530_v54 = vshrl.u32 %v10131_v11, 16  ;;  %v12408_v52 = vld [vmem:[#allocation137_spill] sm:$0xff]  ;;  %v2459_v57 = vcombine.low %v12410_v7, %v12409_v29  ;;  %v2321_v17 = vcombine.high %v12411_v35, %v12382_v44 }
 0x288   : > { %v2357_v5 = vcombine.low %v10148_v9, %v2212_v20  ;;  %v10259_v40 = vrot.slane %v3160_v60, %v12269_v63  ;;  %v10268_v59 = vrot.slane %v3194_v28, %v12269_v63  ;;  %v10304_v46 = vcombine.high %v10255_v47, %v12382_v44 }
 0x289   : > { %v2214_v4 = vpop.permute.xlu1 %2213  ;;  %v2320_v20 = vrot.slane %v2306_v1, %v12287_v26 }
 0x28a   : > { %v2493_v16 = vcombine.low %v10150_v45, %v2214_v4  ;;  %v2364_v62 = vrot.slane %v2357_v5, %v12269_v63  ;;  %v2542_v45 = vshrl.u32 %v10255_v47, 16 }
 0x28b   : > { %v2216_v36 = vpop.permute.xlu0 %2215  ;;  %v2543_v5 = vshrl.u32 %v2320_v20, 16 }
 0x28c   : > { %v2331_v2 = vcombine.low %v10152_v33, %v2216_v36  ;;  %v10262_v33 = vrot.slane %v3186_v58, %v12269_v63  ;;  %v10294_v4 = vrot.slane %v2493_v16, %v12269_v63  ;;  %v12412_v58 = vld [vmem:[#allocation44_spill] sm:$0xff] }
 0x28d   : > { %v2218_v27 = vpop.permute.xlu1 %2217  ;;  %v10311_v28 = vcombine.high %v12412_v58, %v12382_v44 }
 0x28e   : > { %v2338_v43 = vrot.slane %v2331_v2, %v12269_v63  ;;  %v2467_v23 = vcombine.low %v10154_v48, %v2218_v27  ;;  %v2531_v48 = vshrl.u32 %v12411_v35, 16  ;;  %v2555_v2 = vshrl.u32 %v12412_v58, 16 }
 0x28f   : > { %v2220_v51 = vpop.permute.xlu0 %2219  ;;  %v10314_v27 = vrot.slane %v2459_v57, %v12269_v63 }
 0x290   : > { %v2339_v10 = vcombine.low %v2330_v22, %v2338_v43  ;;  %v2365_v8 = vcombine.low %v10156_v31, %v2220_v51  ;;  %v2287_v31 = vcombine.high %v10131_v11, %v12382_v44  ;;  %v2340_v39 = vcombine.high %v2330_v22, %v2338_v43 }
 0x291   : > { %v2222_v32 = vpop.permute.xlu1 %2221  ;;  %v10298_v21 = vrot.slane %v2467_v23, %v12269_v63  ;;  %v2532_v43 = vpack.i.b16 %v2531_v48, %v2530_v54  ;;  %v2537_v23 = vshrl.u32 %v2321_v17, 16 }
 0x292   : > { %v10277_v6 = vrot.slane %v2339_v10, %v12287_v26  ;;  %v2372_v38 = vrot.slane %v2365_v8, %v12269_v63  ;;  %v2501_v53 = vcombine.low %v12408_v52, %v2222_v32  ;;  %v2535_v8 = vpack.i.b16 %v2321_v17, %v2287_v31 }
 0x293   : > { %v2354_v16 = vrot.slane %v2340_v39, %v12287_v26  ;;  %v2475_v32 = vcombine.low %v10314_v27, %v10298_v21  ;;  %v2536_v54 = vshrl.u32 %v2287_v31, 16  ;;  %v2541_v39 = vpack.i.b16 %v2320_v20, %v10255_v47 }
 0x294   : > { %v2373_v12 = vcombine.low %v2364_v62, %v2372_v38  ;;  %v2374_v49 = vcombine.high %v2364_v62, %v2372_v38  ;;  %v2508_v0 = vrot.slane %v2501_v53, %v12269_v63  ;;  %v2355_v56 = vcombine.high %v10277_v6, %v12382_v44 }
 0x295   : > { %v2578_v51 = vshrl.u32 %v10277_v6, 16  ;;  %v2483_v9 = vrot.slane %v2475_v32, %v12287_v26  ;;  %v2590_v13 = vshrl.u32 %v2354_v16, 16  ;;  %v2322_v17 = vcombine.high %v2320_v20, %v12382_v44 }
 0x296   : > { %v2381_v36 = vrot.slane %v2373_v12, %v12287_v26  ;;  %v2509_v60 = vcombine.low %v10294_v4, %v2508_v0  ;;  %v2388_v22 = vrot.slane %v2374_v49, %v12287_v26  ;;  %v2584_v62 = vshrl.u32 %v2355_v56, 16 }
 0x297   : > { %v2538_v31 = vpack.i.b16 %v2537_v23, %v2536_v54 }
 0x298   : > { %v2579_v1 = vshrl.u32 %v2381_v36, 16  ;;  %v2389_v10 = vcombine.high %v2381_v36, %v12382_v44  ;;  %v2517_v38 = vrot.slane %v2509_v60, %v12287_v26  ;;  %v2589_v7 = vpack.i.b16 %v2388_v22, %v2354_v16 }
 0x299   : > { %v2591_v57 = vshrl.u32 %v2388_v22, 16  ;;  %v2390_v48 = vcombine.high %v2388_v22, %v12382_v44  ;;  %v2356_v60 = vcombine.high %v2354_v16, %v12382_v44  ;;  %v2544_v22 = vpack.i.b16 %v2543_v5, %v2542_v45 }
 0x29a   : > { %v2580_v52 = vpack.i.b16 %v2579_v1, %v2578_v51  ;;  %v2583_v53 = vpack.i.b16 %v2389_v10, %v2355_v56  ;;  %v2585_v29 = vshrl.u32 %v2389_v10, 16  ;;  %v2510_v56 = vcombine.high %v10294_v4, %v2508_v0 }
 0x29b   : > { %v7629_v51 = vcombine.low %v2541_v39, %v2589_v7  ;;  %v2592_v1 = vpack.i.b16 %v2591_v57, %v2590_v13  ;;  %v2595_v10 = vpack.i.b16 %v2390_v48, %v2356_v60  ;;  %v2597_v47 = vshrl.u32 %v2390_v48, 16 }
 0x29c   : > { %v7626_v12 = vcombine.low %v2532_v43, %v2580_v52  ;;  %v7627_v49 = vcombine.low %v2535_v8, %v2583_v53  ;;  %v2586_v34 = vpack.i.b16 %v2585_v29, %v2584_v62  ;;  %v2603_v43 = vshrl.u32 %v2517_v38, 16 }
 0x29d   : > { %v2525_v32 = vcombine.high %v2517_v38, %v12382_v44  ;;  %v2577_v20 = vpack.i.b16 %v2381_v36, %v10277_v6  ;;  %v2601_v62 = vpack.i.b16 %v2517_v38, %v2483_v9  ;;  %v2476_v4 = vcombine.high %v10314_v27, %v10298_v21 }
 0x29e   : > { %2629 = vrot.lane.b32.xlu0 %v7626_v12, %s8150_s27  ;;  %2634 = vrot.lane.b32.xlu1 %v7627_v49, %s8149_s7  ;;  %v7628_v8 = vcombine.low %v2538_v31, %v2586_v34  ;;  %v2547_v0 = vpack.i.b16 %v2322_v17, %v10304_v46  ;;  %v2549_v16 = vshrl.u32 %v2322_v17, 16  ;;  %v2602_v52 = vshrl.u32 %v2483_v9, 16 }
 0x29f   : > { %v2596_v13 = vshrl.u32 %v2356_v60, 16  ;;  %v2491_v45 = vcombine.high %v2483_v9, %v12382_v44  ;;  %v12413_v34 = vpack.i.b16 %v12411_v35, %v10131_v11  ;;  %v12414_v6 = vpack.i.b16 %v12412_v58, %v10135_v3 }
 0x2a0   : > { %v2524_v36 = vrot.slane %v2510_v56, %v12287_v26  ;;  %v2548_v27 = vshrl.u32 %v10304_v46, 16  ;;  %v2604_v23 = vpack.i.b16 %v2603_v43, %v2602_v52  ;;  %v2423_v38 = vcombine.high %v10135_v3, %v12382_v44 }
 0x2a1   : > { %v10342_v5 = vcombine.low %v12413_v34, %v2577_v20  ;;  %v10347_v21 = vcombine.low %v12414_v6, %v2601_v62  ;;  %v7630_v53 = vcombine.low %v2544_v22, %v2592_v1  ;;  %v7631_v9 = vcombine.low %v2547_v0, %v2595_v10  ;;  %v12418_v6 = vld [vmem:[#allocation62_spill] sm:$0xff] }
 0x2a2   : > { %2639 = vrot.lane.b32.xlu0 %v7628_v8, %s8153_s30  ;;  %2644 = vrot.lane.b32.xlu1 %v7629_v51, %s8148_s29  ;;  %v2598_v29 = vpack.i.b16 %v2597_v47, %v2596_v13  ;;  %v2609_v54 = vshrl.u32 %v2525_v32, 16  ;;  %v12415_v11 = vshrl.u32 %v10135_v3, 16  ;;  %v2561_v7 = vshrl.u32 %v10311_v28, 16 }
 0x2a3   : > { %v3168_v58 = vcombine.low %v10252_v41, %v10259_v40  ;;  %v3202_v57 = vcombine.low %v10262_v33, %v10268_v59  ;;  %v12416_v46 = vcombine.high %v10102_v14, %v10089_v30  ;;  %v2490_v12 = vrot.slane %v2476_v4, %v12287_v26 }
 0x2a4   : > { %v2556_v35 = vpack.i.b16 %v2555_v2, %v12415_v11  ;;  %v2550_v3 = vpack.i.b16 %v2549_v16, %v2548_v27  ;;  %v2608_v2 = vshrl.u32 %v2491_v45, 16  ;;  %v12417_v49 = vcombine.high %v10114_v18, %v10105_v24  ;;  %v12421_v11 = vld [vmem:[#allocation65_spill] sm:$0xff] }
 0x2a5   : > { %v2456_v48 = vrot.slane %v12416_v46, %v12287_v26  ;;  %v2560_v60 = vshrl.u32 %v2423_v38, 16  ;;  %v2615_v56 = vshrl.u32 %v2524_v36, 16  ;;  %v2607_v22 = vpack.i.b16 %v2525_v32, %v2491_v45  ;;  %v12423_v46 = vld [vmem:[#allocation78_spill] sm:$0xff] }
 0x2a6   : > { %2649 = vrot.lane.b32.xlu0 %v7630_v53, %s8152_s6  ;;  %2654 = vrot.lane.b32.xlu1 %v7631_v9, %s8151_s10  ;;  %v2422_v39 = vrot.slane %v12417_v49, %v12287_v26  ;;  %v7634_v17 = vcombine.low %v2556_v35, %v2604_v23  ;;  %v7632_v31 = vcombine.low %v2550_v3, %v2598_v29  ;;  %v2614_v18 = vshrl.u32 %v2490_v12, 16  ;;  %v12420_v9 = vld [vmem:[#allocation75_spill] sm:$0xff]  ;;  %v12422_v35 = vld [vmem:[#allocation70_spill] sm:$0xff] }
 0x2a7   : > { %v2610_v30 = vpack.i.b16 %v2609_v54, %v2608_v2  ;;  %v2526_v14 = vcombine.high %v2524_v36, %v12382_v44  ;;  %v2559_v43 = vpack.i.b16 %v10311_v28, %v2423_v38  ;;  %v2562_v51 = vpack.i.b16 %v2561_v7, %v2560_v60 }
 0x2a8   : > { %v10374_v1 = vrot.slane %v3168_v58, %v12287_v26  ;;  %v10377_v10 = vrot.slane %v3202_v57, %v12287_v26  ;;  %v2567_v24 = vshrl.u32 %v2456_v48, 16  ;;  %v2458_v47 = vcombine.high %v2456_v48, %v12382_v44 }
 0x2a9   : > { %v2492_v8 = vcombine.high %v2490_v12, %v12382_v44  ;;  %v2613_v32 = vpack.i.b16 %v2524_v36, %v2490_v12  ;;  %v2566_v20 = vshrl.u32 %v2422_v39, 16  ;;  %v2424_v28 = vcombine.high %v2422_v39, %v12382_v44  ;;  %v12419_v36 = vld [vmem:[#allocation66_spill] sm:$0xff] }
 0x2aa   : > { %2659 = vrot.lane.b32.xlu0 %v7632_v31, %s8154_s18  ;;  %2667 = vrot.lane.b32.xlu1 %v7634_v17, %s8150_s27  ;;  %v3169_v62 = vcombine.high %v10252_v41, %v10259_v40  ;;  %v7635_v4 = vcombine.low %v2559_v43, %v2607_v22  ;;  %v7636_v0 = vcombine.low %v2562_v51, %v2610_v30  ;;  %v2621_v52 = vshrl.u32 %v2526_v14, 16 }
 0x2ab   : > { %v2616_v16 = vpack.i.b16 %v2615_v56, %v2614_v18  ;;  %v3428_v13 = vshrl.u32 %v10377_v10, 16  ;;  %v3218_v45 = vcombine.high %v10377_v10, %v12382_v44  ;;  %v3203_v34 = vcombine.high %v10262_v33, %v10268_v59 }
 0x2ac   : > { %v3271_v27 = vcombine.high %v12419_v36, %v12418_v6  ;;  %v2565_v41 = vpack.i.b16 %v2456_v48, %v2422_v39  ;;  %v2568_v40 = vpack.i.b16 %v2567_v24, %v2566_v20  ;;  %v2573_v23 = vshrl.u32 %v2458_v47, 16 }
 0x2ad   : > { %v2620_v38 = vshrl.u32 %v2492_v8, 16  ;;  %v2572_v53 = vshrl.u32 %v2424_v28, 16  ;;  %v3476_v29 = vshrl.u32 %v12420_v9, 16  ;;  %v3286_v54 = vcombine.high %v12420_v9, %v12382_v44 }
 0x2ae   : > { %2672 = vrot.lane.b32.xlu0 %v7635_v4, %s8149_s7  ;;  %2677 = vrot.lane.b32.xlu1 %v7636_v0, %s8153_s30  ;;  %v3237_v33 = vcombine.high %v12422_v35, %v12421_v11  ;;  %v7637_v59 = vcombine.low %v2565_v41, %v2613_v32  ;;  %v7638_v7 = vcombine.low %v2568_v40, %v2616_v16  ;;  %v3475_v12 = vshrl.u32 %v12423_v46, 16 }
 0x2af   : > { %v2619_v58 = vpack.i.b16 %v2526_v14, %v2492_v8  ;;  %v2622_v57 = vpack.i.b16 %v2621_v52, %v2620_v38  ;;  %v3183_v48 = vrot.slane %v3169_v62, %v12287_v26  ;;  %v3217_v3 = vrot.slane %v3203_v34, %v12287_v26 }
 0x2b0   : > { %v3285_v2 = vrot.slane %v3271_v27, %v12287_v26  ;;  %v2571_v49 = vpack.i.b16 %v2458_v47, %v2424_v28  ;;  %v2574_v39 = vpack.i.b16 %v2573_v23, %v2572_v53  ;;  %v3252_v17 = vcombine.high %v12423_v46, %v12382_v44 }
 0x2b1   : > { %v3427_v60 = vshrl.u32 %v10374_v1, 16  ;;  %v3477_v56 = vpack.i.b16 %v3476_v29, %v3475_v12  ;;  %v3184_v31 = vcombine.high %v10374_v1, %v12382_v44  ;;  %v3251_v22 = vrot.slane %v3237_v33, %v12287_v26  ;;  %v12426_v12 = vld [vmem:[#allocation72_spill] sm:$0xff] }
 0x2b2   : > { %2682 = vrot.lane.b32.xlu0 %v7637_v59, %s8148_s29  ;;  %2687 = vrot.lane.b32.xlu1 %v7638_v7, %s8152_s6  ;;  %v7639_v30 = vcombine.low %v2571_v49, %v2619_v58  ;;  %v7640_v14 = vcombine.low %v2574_v39, %v2622_v57  ;;  %v3480_v43 = vpack.i.b16 %v3286_v54, %v3252_v17  ;;  %v3482_v51 = vshrl.u32 %v3286_v54, 16  ;;  %v12424_v59 = vld [vmem:[#allocation79_spill] sm:$0xff]  ;;  %v12427_v49 = vld [vmem:[#allocation76_spill] sm:$0xff] }
 0x2b3   : > { %v3429_v24 = vpack.i.b16 %v3428_v13, %v3427_v60  ;;  %v3432_v18 = vpack.i.b16 %v3218_v45, %v3184_v31  ;;  %v3434_v8 = vshrl.u32 %v3218_v45, 16  ;;  %v3488_v47 = vshrl.u32 %v3285_v2, 16  ;;  %v12425_v57 = vld [vmem:[#allocation67_spill] sm:$0xff]  ;;  %v12429_v60 = vld [vmem:[#allocation69_spill] sm:$0xff] }
 0x2b4   : > { %v3481_v32 = vshrl.u32 %v3252_v17, 16  ;;  %v3440_v20 = vshrl.u32 %v3217_v3, 16  ;;  %v3185_v28 = vcombine.high %v3183_v48, %v12382_v44  ;;  %v3219_v62 = vcombine.high %v3217_v3, %v12382_v44  ;;  %v12428_v17 = vld [vmem:[#allocation64_spill] sm:$0xff] }
 0x2b5   : > { %v3433_v4 = vshrl.u32 %v3184_v31, 16  ;;  %v3486_v0 = vpack.i.b16 %v3285_v2, %v3251_v22  ;;  %v3487_v16 = vshrl.u32 %v3251_v22, 16  ;;  %v3287_v52 = vcombine.high %v3285_v2, %v12382_v44 }
 0x2b6   : > { %2692 = vrot.lane.b32.xlu0 %v7639_v30, %s8151_s10  ;;  %2697 = vrot.lane.b32.xlu1 %v7640_v14, %s8154_s18  ;;  %v7642_v34 = vcombine.low %v3429_v24, %v3477_v56  ;;  %v7643_v13 = vcombine.low %v3432_v18, %v3480_v43  ;;  %v3483_v6 = vpack.i.b16 %v3482_v51, %v3481_v32  ;;  %v3439_v45 = vshrl.u32 %v3183_v48, 16  ;;  %v12431_v43 = vld [vmem:[#allocation71_spill] sm:$0xff]  ;;  %v12432_v51 = vld [vmem:[#allocation74_spill] sm:$0xff] }
 0x2b7   : > { %v3438_v36 = vpack.i.b16 %v3217_v3, %v3183_v48  ;;  %v3489_v27 = vpack.i.b16 %v3488_v47, %v3487_v16  ;;  %v3253_v41 = vcombine.high %v3251_v22, %v12382_v44  ;;  %v3435_v40 = vpack.i.b16 %v3434_v8, %v3433_v4  ;;  %v12430_v22 = vld [vmem:[#allocation81_spill] sm:$0xff]  ;;  %v12433_v47 = vld [vmem:[#allocation80_spill] sm:$0xff] }
 0x2b8   : > { %v3441_v23 = vpack.i.b16 %v3440_v20, %v3439_v45  ;;  %v3444_v38 = vpack.i.b16 %v3219_v62, %v3185_v28  ;;  %v3445_v53 = vshrl.u32 %v3185_v28, 16  ;;  %v3446_v11 = vshrl.u32 %v3219_v62, 16  ;;  %v12434_v20 = vld [vmem:[#allocation68_spill] sm:$0xff]  ;;  %v12435_v28 = vld [vmem:[#allocation73_spill] sm:$0xff] }
 0x2b9   : > { %v7645_v29 = vcombine.low %v3438_v36, %v3486_v0  ;;  %v3492_v54 = vpack.i.b16 %v3287_v52, %v3253_v41  ;;  %v3494_v35 = vshrl.u32 %v3287_v52, 16  ;;  %v7644_v33 = vcombine.low %v3435_v40, %v3483_v6 }
 0x2ba   : > { %3526 = vrot.lane.b32.xlu0 %v7642_v34, %s8150_s27  ;;  %3531 = vrot.lane.b32.xlu1 %v7643_v13, %s8149_s7  ;;  %v3500_v7 = vshrl.u32 %v12424_v59, 16  ;;  %v3422_v58 = vcombine.high %v12424_v59, %v12382_v44  ;;  %v3407_v48 = vcombine.high %v12426_v12, %v12425_v57  ;;  %v7646_v3 = vcombine.low %v3441_v23, %v3489_v27 }
 0x2bb   : > { %v3493_v2 = vshrl.u32 %v3253_v41, 16  ;;  %v3354_v39 = vcombine.high %v12427_v49, %v12382_v44  ;;  %v3339_v56 = vcombine.high %v12429_v60, %v12428_v17  ;;  %v3452_v31 = vshrl.u32 %v12427_v49, 16 }
 0x2bc   : > { %v3499_v30 = vshrl.u32 %v12430_v22, 16  ;;  %v3388_v14 = vcombine.high %v12430_v22, %v12382_v44  ;;  %v3373_v24 = vcombine.high %v12432_v51, %v12431_v43  ;;  %v7647_v18 = vcombine.low %v3444_v38, %v3492_v54 }
 0x2bd   : > { %v3495_v8 = vpack.i.b16 %v3494_v35, %v3493_v2  ;;  %v3320_v32 = vcombine.high %v12433_v47, %v12382_v44  ;;  %v3305_v62 = vcombine.high %v12435_v28, %v12434_v20  ;;  %v3451_v4 = vshrl.u32 %v12433_v47, 16  ;;  %v12436_v20 = vld [vmem:[#allocation25_spill] sm:$0xff]  ;;  %v12437_v28 = vld [vmem:[#allocation35_spill] sm:$0xff] }
 0x2be   : > { %3536 = vrot.lane.b32.xlu0 %v7644_v33, %s8153_s30  ;;  %3541 = vrot.lane.b32.xlu1 %v7645_v29, %s8148_s29  ;;  %v3501_v0 = vpack.i.b16 %v3500_v7, %v3499_v30  ;;  %v3506_v16 = vshrl.u32 %v3422_v58, 16  ;;  %v3421_v52 = vrot.slane %v3407_v48, %v12287_v26  ;;  %v3447_v34 = vpack.i.b16 %v3446_v11, %v3445_v53 }
 0x2bf   : > { %v3458_v13 = vshrl.u32 %v3354_v39, 16  ;;  %v3453_v6 = vpack.i.b16 %v3452_v31, %v3451_v4  ;;  %v3505_v45 = vshrl.u32 %v3388_v14, 16  ;;  %v3353_v36 = vrot.slane %v3339_v56, %v12287_v26  ;;  %v12439_v4 = vld [vmem:[#allocation26_spill] sm:$0xff] }
 0x2c0   : > { %v3387_v27 = vrot.slane %v3373_v24, %v12287_v26  ;;  %v7648_v41 = vcombine.low %v3447_v34, %v3495_v8  ;;  %v3504_v40 = vpack.i.b16 %v3422_v58, %v3388_v14  ;;  %v3457_v23 = vshrl.u32 %v3320_v32, 16  ;;  %v12443_v34 = vld [vmem:[#allocation53_spill] sm:$0xff] }
 0x2c1   : > { %v3319_v38 = vrot.slane %v3305_v62, %v12287_v26  ;;  %v7650_v29 = vcombine.low %v3453_v6, %v3501_v0  ;;  %v3507_v54 = vpack.i.b16 %v3506_v16, %v3505_v45  ;;  %v3512_v35 = vshrl.u32 %v3421_v52, 16  ;;  %v12438_v62 = vld [vmem:[#allocation33_spill] sm:$0xff]  ;;  %v12440_v0 = vld [vmem:[#allocation32_spill] sm:$0xff]  ;;  %v12445_v6 = vld [vmem:[#allocation63_spill] sm:$0xff] }
 0x2c2   : > { %3546 = vrot.lane.b32.xlu0 %v7646_v3, %s8152_s6  ;;  %3551 = vrot.lane.b32.xlu1 %v7647_v18, %s8151_s10  ;;  %v3423_v53 = vcombine.high %v3421_v52, %v12382_v44  ;;  %v3456_v11 = vpack.i.b16 %v3354_v39, %v3320_v32  ;;  %v3459_v33 = vpack.i.b16 %v3458_v13, %v3457_v23  ;;  %v3464_v59 = vshrl.u32 %v3353_v36, 16  ;;  %v12441_v16 = vld [vmem:[#allocation52_spill] sm:$0xff]  ;;  %v12444_v13 = vld [vmem:[#allocation30_spill] sm:$0xff] }
 0x2c3   : > { %v3511_v7 = vshrl.u32 %v3387_v27, 16  ;;  %v3355_v57 = vcombine.high %v3353_v36, %v12382_v44  ;;  %v3389_v58 = vcombine.high %v3387_v27, %v12382_v44  ;;  %v3463_v48 = vshrl.u32 %v3319_v38, 16  ;;  %v12446_v45 = vld [vmem:[#allocation46_spill] sm:$0xff]  ;;  %v12451_v23 = vld [vmem:[#allocation56_spill] sm:$0xff] }
 0x2c4   : > { %v7651_v12 = vcombine.low %v3456_v11, %v3504_v40  ;;  %v3321_v3 = vcombine.high %v3319_v38, %v12382_v44  ;;  %v7652_v2 = vcombine.low %v3459_v33, %v3507_v54  ;;  %v3510_v49 = vpack.i.b16 %v3421_v52, %v3387_v27  ;;  %v12442_v52 = vld [vmem:[#allocation55_spill] sm:$0xff]  ;;  %v12450_v40 = vld [vmem:[#allocation48_spill] sm:$0xff]  ;;  %v12454_v54 = vld [vmem:[#allocation38_spill] sm:$0xff] }
 0x2c5   : > { %v3513_v17 = vpack.i.b16 %v3512_v35, %v3511_v7  ;;  %v3518_v60 = vshrl.u32 %v3423_v53, 16  ;;  %v3462_v39 = vpack.i.b16 %v3353_v36, %v3319_v38  ;;  %v3465_v56 = vpack.i.b16 %v3464_v59, %v3463_v48  ;;  %v12447_v36 = vld [vmem:[#allocation59_spill] sm:$0xff]  ;;  %v12452_v38 = vld [vmem:[#allocation49_spill] sm:$0xff]  ;;  %v12457_v11 = vld [vmem:[#allocation58_spill] sm:$0xff] }
 0x2c6   : > { %3556 = vrot.lane.b32.xlu0 %v7648_v41, %s8154_s18  ;;  %3564 = vrot.lane.b32.xlu1 %v7650_v29, %s8150_s27  ;;  %v3470_v31 = vshrl.u32 %v3355_v57, 16  ;;  %v3517_v22 = vshrl.u32 %v3389_v58, 16  ;;  %v3469_v30 = vshrl.u32 %v3321_v3, 16  ;;  %v3516_v51 = vpack.i.b16 %v3423_v53, %v3389_v58  ;;  %v12448_v27 = vld [vmem:[#allocation47_spill] sm:$0xff]  ;;  %v12449_v41 = vld [vmem:[#allocation60_spill] sm:$0xff]  ;;  %v12453_v29 = vld [vmem:[#allocation61_spill] sm:$0xff] }
 0x2c7   : > { %v7653_v14 = vcombine.low %v3462_v39, %v3510_v49  ;;  %v7654_v43 = vcombine.low %v3465_v56, %v3513_v17  ;;  %v3468_v18 = vpack.i.b16 %v3355_v57, %v3321_v3  ;;  %v12455_v35 = vld [vmem:[#allocation57_spill] sm:$0xff]  ;;  %v12456_v53 = vld [vmem:[#allocation14_spill] sm:$0xff] }
 0x2c8   : > { %v3519_v24 = vpack.i.b16 %v3518_v60, %v3517_v22  ;;  %v3471_v8 = vpack.i.b16 %v3470_v31, %v3469_v30  ;;  %v12458_v57 = vld [vmem:[#allocation50_spill] sm:$0xff] }
 0x2c9   : > { %v7655_v47 = vcombine.low %v3468_v18, %v3516_v51  ;;  %v12459_v58 = vld [vmem:[#allocation54_spill] sm:$0xff] }
 0x2ca   : > { %3569 = vrot.lane.b32.xlu0 %v7651_v12, %s8149_s7  ;;  %3574 = vrot.lane.b32.xlu1 %v7652_v2, %s8153_s30  ;;  %v7656_v32 = vcombine.low %v3471_v8, %v3519_v24 }
 0x2ce   : > { %3579 = vrot.lane.b32.xlu0 %v7653_v14, %s8148_s29  ;;  %3584 = vrot.lane.b32.xlu1 %v7654_v43, %s8152_s6 }
 0x2d2   : > { %3589 = vrot.lane.b32.xlu0 %v7655_v47, %s8151_s10  ;;  %3594 = vrot.lane.b32.xlu1 %v7656_v32, %s8154_s18 }
 0x2d6   : > { %3630 = vrot.lane.b32.xlu0 %v10214_v50, %s8145_s9  ;;  %3632 = vrot.lane.b32.xlu1 %v12436_v20, %s8145_s9 }
 0x2da   : > { %3634 = vrot.lane.b32.xlu0 %v10224_v19, %s8145_s9  ;;  %3636 = vrot.lane.b32.xlu1 %v12437_v28, %s8145_s9 }
 0x2de   : > { %3638 = vrot.lane.b32.xlu0 %v10231_v61, %s8145_s9  ;;  %3640 = vrot.lane.b32.xlu1 %v12438_v62, %s8145_s9 }
 0x2e2   : > { %3642 = vrot.lane.b32.xlu0 %v10238_v55, %s8145_s9  ;;  %3644 = vrot.lane.b32.xlu1 %v12439_v4, %s8145_s9 }
 0x2e6   : > { %3646 = vrot.lane.b32.xlu0 %v10199_v25, %s8145_s9  ;;  %3648 = vrot.lane.b32.xlu1 %v12440_v0, %s8145_s9 }
 0x2ea   : > { %3650 = vrot.lane.b32.xlu0 %v10204_v15, %s8145_s9  ;;  %3652 = vrot.lane.b32.xlu1 %v12441_v16, %s8145_s9 }
 0x2ee   : > { %3654 = vrot.lane.b32.xlu0 %v10209_v42, %s8145_s9  ;;  %3656 = vrot.lane.b32.xlu1 %v12442_v52, %s8145_s9 }
 0x2f2   : > { %3658 = vrot.lane.b32.xlu0 %v10219_v37, %s8145_s9  ;;  %3660 = vrot.lane.b32.xlu1 %v12443_v34, %s8145_s9 }
 0x2f6   : > { %3662 = vrot.lane.b32.xlu0 %v12444_v13, %s8145_s9  ;;  %3664 = vrot.lane.b32.xlu1 %v12445_v6, %s8145_s9 }
 0x2fa   : > { %3666 = vrot.lane.b32.xlu0 %v12446_v45, %s8145_s9  ;;  %3668 = vrot.lane.b32.xlu1 %v12447_v36, %s8145_s9 }
 0x2fe   : > { %3670 = vrot.lane.b32.xlu0 %v12448_v27, %s8145_s9  ;;  %3672 = vrot.lane.b32.xlu1 %v12449_v41, %s8145_s9 }
 0x302   : > { %3674 = vrot.lane.b32.xlu0 %v12450_v40, %s8145_s9  ;;  %3676 = vrot.lane.b32.xlu1 %v12451_v23, %s8145_s9 }
 0x306   : > { %3678 = vrot.lane.b32.xlu0 %v12452_v38, %s8145_s9  ;;  %3680 = vrot.lane.b32.xlu1 %v12453_v29, %s8145_s9 }
 0x30a   : > { %3682 = vrot.lane.b32.xlu0 %v12454_v54, %s8145_s9  ;;  %3684 = vrot.lane.b32.xlu1 %v12455_v35, %s8145_s9 }
 0x30e   : > { %3686 = vrot.lane.b32.xlu0 %v12456_v53, %s8145_s9  ;;  %3688 = vrot.lane.b32.xlu1 %v12457_v11, %s8145_s9 }
 0x310   : > { %v2630_v33 = vpop.permute.xlu0 %2629  ;;  %v2635_v59 = vpop.permute.xlu1 %2634 }
 0x311   : > { %v2701_v7 = vsel %vm1512_vm0, %v10342_v5, %v2630_v33 }
 0x312   : > { %3690 = vrot.lane.b32.xlu0 %v12458_v57, %s8145_s9  ;;  %3692 = vrot.lane.b32.xlu1 %v12459_v58, %s8145_s9  ;;  %v2703_v12 = vsel %vm1516_vm2, %v2701_v7, %v2635_v59 }
 0x314   : > { %v2640_v48 = vpop.permute.xlu0 %2639  ;;  %v2645_v3 = vpop.permute.xlu1 %2644 }
 0x315   : > { %v2705_v2 = vsel %vm1519_vm1, %v2703_v12, %v2640_v48  ;;  %v3426_v12 = vpack.i.b16 %v10377_v10, %v10374_v1  ;;  %v12460_v48 = vpack.i.b16 %v12420_v9, %v12423_v46 }
 0x316   : > { %v2707_v49 = vsel %vm1522_vm3, %v2705_v2, %v2645_v3 }
 0x317   : > { %v7641_v3 = vcombine.low %v3426_v12, %v12460_v48 }
 0x318   : > { %v2650_v17 = vpop.permute.xlu0 %2649  ;;  %v2655_v60 = vpop.permute.xlu1 %2654 }
 0x319   : > { %v2709_v39 = vsel %vm1525_vm4, %v2707_v49, %v2650_v17 }
 0x31a   : > { %v2711_v5 = vsel %vm1528_vm5, %v2709_v39, %v2655_v60 }
 0x31c   : > { %v2660_v56 = vpop.permute.xlu0 %2659  ;;  %v2668_v31 = vpop.permute.xlu1 %2667 }
 0x31d   : > { %v2713_v22 = vsel %vm1531_vm6, %v2711_v5, %v2660_v56  ;;  %v2717_v30 = vsel %vm1512_vm0, %v10347_v21, %v2668_v31 }
 0x31e   : > { %2731 = vst [vmem:[#allocation3 + $0x20] sm:$0xff] %v2713_v22 }
 0x320   : > { %v2673_v14 = vpop.permute.xlu0 %2672  ;;  %v2678_v43 = vpop.permute.xlu1 %2677 }
 0x321   : > { %v2719_v51 = vsel %vm1516_vm2, %v2717_v30, %v2673_v14 }
 0x322   : > { %v2721_v24 = vsel %vm1519_vm1, %v2719_v51, %v2678_v43  ;;  %v12461_v43 = vld [vmem:[#allocation83_spill] sm:$0xff] }
 0x324   : > { %v2683_v18 = vpop.permute.xlu0 %2682  ;;  %v2688_v8 = vpop.permute.xlu1 %2687 }
 0x325   : > { %v2723_v47 = vsel %vm1522_vm3, %v2721_v24, %v2683_v18 }
 0x326   : > { %v2725_v32 = vsel %vm1525_vm4, %v2723_v47, %v2688_v8 }
 0x328   : > { %v2693_v33 = vpop.permute.xlu0 %2692  ;;  %v2698_v59 = vpop.permute.xlu1 %2697 }
 0x329   : > { %v2727_v7 = vsel %vm1528_vm5, %v2725_v32, %v2693_v33 }
 0x32a   : > { %v2729_v21 = vsel %vm1531_vm6, %v2727_v7, %v2698_v59 }
 0x32b   : > { %2732 = vst [vmem:[#allocation3 + $0x28] sm:$0xff] %v2729_v21 }
 0x32c   : > { %v3527_v2 = vpop.permute.xlu0 %3526  ;;  %v3532_v49 = vpop.permute.xlu1 %3531 }
 0x32d   : > { %v3598_v17 = vsel %vm1512_vm0, %v7641_v3, %v3527_v2 }
 0x32e   : > { %v3600_v60 = vsel %vm1516_vm2, %v3598_v17, %v3532_v49 }
 0x330   : > { %v3537_v39 = vpop.permute.xlu0 %3536  ;;  %v3542_v5 = vpop.permute.xlu1 %3541 }
 0x331   : > { %v3602_v56 = vsel %vm1519_vm1, %v3600_v60, %v3537_v39 }
 0x332   : > { %v3604_v31 = vsel %vm1522_vm3, %v3602_v56, %v3542_v5 }
 0x334   : > { %v3547_v1 = vpop.permute.xlu0 %3546  ;;  %v3552_v10 = vpop.permute.xlu1 %3551 }
 0x335   : > { %v3606_v22 = vsel %vm1525_vm4, %v3604_v31, %v3547_v1 }
 0x336   : > { %v3608_v30 = vsel %vm1528_vm5, %v3606_v22, %v3552_v10 }
 0x338   : > { %v3557_v9 = vpop.permute.xlu0 %3556  ;;  %v3565_v46 = vpop.permute.xlu1 %3564 }
 0x339   : > { %v3610_v14 = vsel %vm1531_vm6, %v3608_v30, %v3557_v9  ;;  %v3614_v51 = vsel %vm1512_vm0, %v12461_v43, %v3565_v46 }
 0x33a   : > { %3628 = vst [vmem:[#allocation3 + $0x30] sm:$0xff] %v3610_v14 }
 0x33c   : > { %v3570_v24 = vpop.permute.xlu0 %3569  ;;  %v3575_v18 = vpop.permute.xlu1 %3574 }
 0x33d   : > { %v3616_v8 = vsel %vm1516_vm2, %v3614_v51, %v3570_v24 }
 0x33e   : > { %v3618_v47 = vsel %vm1519_vm1, %v3616_v8, %v3575_v18 }
 0x340   : > { %v3580_v32 = vpop.permute.xlu0 %3579  ;;  %v3585_v33 = vpop.permute.xlu1 %3584 }
 0x341   : > { %v3620_v59 = vsel %vm1522_vm3, %v3618_v47, %v3580_v32 }
 0x342   : > { %v3622_v7 = vsel %vm1525_vm4, %v3620_v59, %v3585_v33 }
 0x344   : > { %v3590_v12 = vpop.permute.xlu0 %3589  ;;  %v3595_v21 = vpop.permute.xlu1 %3594 }
 0x345   : > { %v3624_v48 = vsel %vm1528_vm5, %v3622_v7, %v3590_v12 }
 0x346   : > { %v3626_v3 = vsel %vm1531_vm6, %v3624_v48, %v3595_v21 }
 0x347   : > { %3629 = vst [vmem:[#allocation3 + $0x38] sm:$0xff] %v3626_v3 }
 0x348   : > { %v3631_v2 = vpop.permute.xlu0 %3630  ;;  %v3633_v49 = vpop.permute.xlu1 %3632 }
 0x34c   : > { %v3635_v17 = vpop.permute.xlu0 %3634  ;;  %v3637_v60 = vpop.permute.xlu1 %3636 }
 0x350   : > { %v3639_v39 = vpop.permute.xlu0 %3638  ;;  %v3641_v5 = vpop.permute.xlu1 %3640 }
 0x354   : > { %v3643_v56 = vpop.permute.xlu0 %3642  ;;  %v3645_v31 = vpop.permute.xlu1 %3644 }
 0x358   : > { %v3647_v1 = vpop.permute.xlu0 %3646  ;;  %v3649_v10 = vpop.permute.xlu1 %3648 }
 0x359   : > { %v3726_v33 = vcombine.low %v3631_v2, %v3647_v1  ;;  %v3862_v59 = vcombine.low %v3633_v49, %v3649_v10 }
 0x35b   : > { %v3733_v2 = vrot.slane %v3726_v33, %v12269_v63  ;;  %v10576_v49 = vrot.slane %v3862_v59, %v12269_v63 }
 0x35c   : > { %v3651_v22 = vpop.permute.xlu0 %3650  ;;  %v3653_v30 = vpop.permute.xlu1 %3652 }
 0x35d   : > { %v3760_v51 = vcombine.low %v3635_v17, %v3651_v22  ;;  %v3896_v24 = vcombine.low %v3637_v60, %v3653_v30 }
 0x35f   : > { %v3767_v3 = vrot.slane %v3760_v51, %v12269_v63  ;;  %v10568_v57 = vrot.slane %v3896_v24, %v12269_v63 }
 0x360   : > { %v3655_v9 = vpop.permute.xlu0 %3654  ;;  %v3657_v46 = vpop.permute.xlu1 %3656 }
 0x361   : > { %v3734_v18 = vcombine.low %v3639_v39, %v3655_v9  ;;  %v3870_v8 = vcombine.low %v3641_v5, %v3657_v46 }
 0x363   : > { %v3741_v17 = vrot.slane %v3734_v18, %v12269_v63  ;;  %v10572_v60 = vrot.slane %v3870_v8, %v12269_v63 }
 0x364   : > { %v3659_v14 = vpop.permute.xlu0 %3658  ;;  %v3661_v43 = vpop.permute.xlu1 %3660 }
 0x365   : > { %v3768_v47 = vcombine.low %v3643_v56, %v3659_v14  ;;  %v3904_v32 = vcombine.low %v3645_v31, %v3661_v43  ;;  %v3742_v1 = vcombine.low %v3733_v2, %v3741_v17  ;;  %v3878_v10 = vcombine.low %v10576_v49, %v10572_v60 }
 0x367   : > { %v3775_v7 = vrot.slane %v3768_v47, %v12269_v63  ;;  %v10562_v12 = vrot.slane %v3904_v32, %v12269_v63  ;;  %v10589_v14 = vrot.slane %v3742_v1, %v12287_v26  ;;  %v10592_v43 = vrot.slane %v3878_v10, %v12287_v26 }
 0x368   : > { %v3663_v21 = vpop.permute.xlu0 %3662  ;;  %v10564_v48 = vpop.permute.xlu1 %3664  ;;  %v3743_v1 = vcombine.high %v3733_v2, %v3741_v17 }
 0x369   : > { %v3776_v39 = vcombine.low %v3767_v3, %v3775_v7  ;;  %v3912_v5 = vcombine.low %v10568_v57, %v10562_v12  ;;  %v10602_v18 = vcombine.high %v10589_v14, %v12382_v44  ;;  %v3777_v29 = vcombine.high %v3767_v3, %v3775_v7 }
 0x36a   : > { %v10605_v8 = vrot.slane %v3743_v1, %v12287_v26  ;;  %v10611_v2 = vcombine.high %v10592_v43, %v12382_v44 }
 0x36b   : > { %v10583_v22 = vrot.slane %v3776_v39, %v12287_v26  ;;  %v10586_v30 = vrot.slane %v3912_v5, %v12287_v26  ;;  %v4007_v1 = vshrl.u32 %v10602_v18, 16  ;;  %v3791_v17 = vrot.slane %v3777_v29, %v12287_v26 }
 0x36c   : > { %v3667_v56 = vpop.permute.xlu0 %3666  ;;  %v3669_v31 = vpop.permute.xlu1 %3668 }
 0x370   : > { %v3671_v9 = vpop.permute.xlu0 %3670  ;;  %v3673_v46 = vpop.permute.xlu1 %3672 }
 0x374   : > { %v3675_v51 = vpop.permute.xlu0 %3674  ;;  %v3677_v24 = vpop.permute.xlu1 %3676 }
 0x378   : > { %v3679_v47 = vpop.permute.xlu0 %3678  ;;  %v3681_v32 = vpop.permute.xlu1 %3680 }
 0x379   : > { %v3794_v39 = vcombine.low %v3663_v21, %v3679_v47 }
 0x37b   : > { %v3801_v10 = vrot.slane %v3794_v39, %v12269_v63  ;;  %v4001_v39 = vshrl.u32 %v10589_v14, 16 }
 0x37c   : > { %v3683_v33 = vpop.permute.xlu0 %3682  ;;  %v3685_v59 = vpop.permute.xlu1 %3684 }
 0x37d   : > { %v3828_v54 = vcombine.low %v3667_v56, %v3683_v33  ;;  %v3964_v47 = vcombine.low %v3669_v31, %v3685_v59 }
 0x380   : > { %v3687_v5 = vpop.permute.xlu0 %3686  ;;  %v3689_v58 = vpop.permute.xlu1 %3688 }
 0x381   : > { %v3802_v53 = vcombine.low %v3671_v9, %v3687_v5  ;;  %v3938_v33 = vcombine.low %v3673_v46, %v3689_v58  ;;  %v3835_v5 = vrot.slane %v3828_v54, %v12269_v63  ;;  %v4013_v58 = vshrl.u32 %v10605_v8, 16 }
 0x382   : > { %v4002_v54 = vshrl.u32 %v10583_v22, 16 }
 0x383   : > { %v3809_v11 = vrot.slane %v3802_v53, %v12269_v63  ;;  %v10635_v29 = vrot.slane %v3938_v33, %v12269_v63  ;;  %v4014_v33 = vshrl.u32 %v3791_v17, 16 }
 0x384   : > { %v3691_v35 = vpop.permute.xlu0 %3690  ;;  %v3693_v38 = vpop.permute.xlu1 %3692 }
 0x385   : > { %v3810_v21 = vcombine.low %v3801_v10, %v3809_v11  ;;  %v3836_v53 = vcombine.low %v3675_v51, %v3691_v35  ;;  %v3972_v56 = vcombine.low %v3677_v24, %v3693_v38  ;;  %v3930_v38 = vcombine.low %v10564_v48, %v3681_v32 }
 0x386   : > { %v10631_v51 = vcombine.high %v10605_v8, %v12382_v44  ;;  %v3971_v24 = vrot.slane %v3964_v47, %v12269_v63  ;;  %v3811_v59 = vcombine.high %v3801_v10, %v3809_v11  ;;  %v3792_v48 = vcombine.high %v10583_v22, %v12382_v44 }
 0x387   : > { %v10618_v7 = vrot.slane %v3810_v21, %v12287_v26  ;;  %v3843_v3 = vrot.slane %v3836_v53, %v12269_v63  ;;  %v10625_v35 = vrot.slane %v3972_v56, %v12269_v63  ;;  %v10641_v32 = vcombine.high %v10586_v30, %v12382_v44 }
 0x388   : > { %v10648_v47 = vrot.slane %v3930_v38, %v12269_v63  ;;  %v4006_v56 = vpack.i.b16 %v3792_v48, %v10602_v18  ;;  %v4008_v38 = vshrl.u32 %v3792_v48, 16  ;;  %v4015_v42 = vpack.i.b16 %v4014_v33, %v4013_v58 }
 0x389   : > { %v3844_v31 = vcombine.low %v3835_v5, %v3843_v3  ;;  %v3845_v46 = vcombine.high %v3835_v5, %v3843_v3  ;;  %v3826_v53 = vcombine.high %v10618_v7, %v12382_v44  ;;  %v3980_v10 = vcombine.low %v3971_v24, %v10625_v35 }
 0x38a   : > { %v4003_v5 = vpack.i.b16 %v4002_v54, %v4001_v39  ;;  %v4049_v3 = vshrl.u32 %v10618_v7, 16  ;;  %v3946_v23 = vcombine.low %v10648_v47, %v10635_v29  ;;  %v4012_v39 = vpack.i.b16 %v3791_v17, %v10605_v8 }
 0x38b   : > { %v3852_v21 = vrot.slane %v3844_v31, %v12287_v26  ;;  %v3859_v11 = vrot.slane %v3845_v46, %v12287_v26  ;;  %v3825_v31 = vrot.slane %v3811_v59, %v12287_v26  ;;  %v4055_v46 = vshrl.u32 %v3826_v53, 16 }
 0x38c   : > { %v3988_v45 = vrot.slane %v3980_v10, %v12287_v26  ;;  %v3954_v34 = vrot.slane %v3946_v23, %v12287_v26  ;;  %v3981_v48 = vcombine.high %v3971_v24, %v10625_v35  ;;  %v3947_v24 = vcombine.high %v10648_v47, %v10635_v29 }
 0x38d   : > { %v4050_v9 = vshrl.u32 %v3852_v21, 16  ;;  %v3860_v40 = vcombine.high %v3852_v21, %v12382_v44  ;;  %v4060_v54 = vpack.i.b16 %v3859_v11, %v3825_v31  ;;  %v4062_v36 = vshrl.u32 %v3859_v11, 16 }
 0x38e   : > { %v3861_v59 = vcombine.high %v3859_v11, %v12382_v44  ;;  %v4061_v18 = vshrl.u32 %v3825_v31, 16  ;;  %v3827_v8 = vcombine.high %v3825_v31, %v12382_v44  ;;  %v4074_v23 = vshrl.u32 %v3988_v45, 16 }
 0x38f   : > { %v4051_v63 = vpack.i.b16 %v4050_v9, %v4049_v3  ;;  %v4054_v27 = vpack.i.b16 %v3860_v40, %v3826_v53  ;;  %v4056_v41 = vshrl.u32 %v3860_v40, 16  ;;  %v3793_v9 = vcombine.high %v3791_v17, %v12382_v44 }
 0x390   : > { %v4009_v40 = vpack.i.b16 %v4008_v38, %v4007_v1  ;;  %v4063_v53 = vpack.i.b16 %v4062_v36, %v4061_v18  ;;  %v4068_v11 = vshrl.u32 %v3861_v59, 16  ;;  %v4048_v17 = vpack.i.b16 %v3852_v21, %v10618_v7 }
 0x391   : > { %v7658_v13 = vcombine.low %v4003_v5, %v4051_v63  ;;  %v7659_v6 = vcombine.low %v4006_v56, %v4054_v27  ;;  %v4057_v37 = vpack.i.b16 %v4056_v41, %v4055_v46  ;;  %v4026_v63 = vshrl.u32 %v10586_v30, 16 }
 0x392   : > { %v3996_v27 = vcombine.high %v3988_v45, %v12382_v44  ;;  %v7661_v41 = vcombine.low %v4012_v39, %v4060_v54  ;;  %v4066_v56 = vpack.i.b16 %v3861_v59, %v3827_v8  ;;  %v3962_v35 = vcombine.high %v3954_v34, %v12382_v44 }
 0x393   : > { %4100 = vrot.lane.b32.xlu0 %v7658_v13, %s8150_s27  ;;  %4105 = vrot.lane.b32.xlu1 %v7659_v6, %s8149_s7  ;;  %v7660_v58 = vcombine.low %v4009_v40, %v4057_v37  ;;  %v4018_v13 = vpack.i.b16 %v3793_v9, %v10631_v51  ;;  %v4020_v6 = vshrl.u32 %v3793_v9, 16  ;;  %v4072_v1 = vpack.i.b16 %v3988_v45, %v3954_v34 }
 0x394   : > { %v4067_v36 = vshrl.u32 %v3827_v8, 16  ;;  %v4073_v10 = vshrl.u32 %v3954_v34, 16  ;;  %v12462_v37 = vpack.i.b16 %v10583_v22, %v10589_v14  ;;  %v3995_v7 = vrot.slane %v3981_v48, %v12287_v26 }
 0x395   : > { %v4019_v21 = vshrl.u32 %v10631_v51, 16  ;;  %v4080_v5 = vshrl.u32 %v3996_v27, 16  ;;  %v12463_v45 = vpack.i.b16 %v10586_v30, %v10592_v43  ;;  %v7662_v47 = vcombine.low %v4015_v42, %v4063_v53 }
 0x396   : > { %v10679_v33 = vcombine.low %v12462_v37, %v4048_v17  ;;  %v7663_v3 = vcombine.low %v4018_v13, %v4066_v56  ;;  %v4069_v31 = vpack.i.b16 %v4068_v11, %v4067_v36  ;;  %v4075_v38 = vpack.i.b16 %v4074_v23, %v4073_v10 }
 0x397   : > { %4110 = vrot.lane.b32.xlu0 %v7660_v58, %s8153_s30  ;;  %4115 = vrot.lane.b32.xlu1 %v7661_v41, %s8148_s29  ;;  %v10686_v29 = vcombine.low %v12463_v45, %v4072_v1  ;;  %v12464_v34 = vcombine.high %v10568_v57, %v10562_v12  ;;  %v4032_v14 = vshrl.u32 %v10641_v32, 16  ;;  %v4079_v46 = vshrl.u32 %v3962_v35, 16 }
 0x398   : > { %v3961_v51 = vrot.slane %v3947_v24, %v12287_v26  ;;  %v4021_v30 = vpack.i.b16 %v4020_v6, %v4019_v21  ;;  %v12465_v42 = vshrl.u32 %v10592_v43, 16  ;;  %v12466_v54 = vcombine.high %v10576_v49, %v10572_v60 }
 0x399   : > { %v3927_v22 = vrot.slane %v12464_v34, %v12287_v26  ;;  %v3997_v57 = vcombine.high %v3995_v7, %v12382_v44  ;;  %v4031_v12 = vshrl.u32 %v10611_v2, 16  ;;  %v4081_v18 = vpack.i.b16 %v4080_v5, %v4079_v46  ;;  %v12484_v34 = vld [vmem:[#allocation54_spill] sm:$0xff] }
 0x39a   : > { %v4027_v39 = vpack.i.b16 %v4026_v63, %v12465_v42  ;;  %v3893_v59 = vrot.slane %v12466_v54, %v12287_v26  ;;  %v7664_v9 = vcombine.low %v4021_v30, %v4069_v31  ;;  %v4078_v40 = vpack.i.b16 %v3996_v27, %v3962_v35  ;;  %v12482_v31 = vld [vmem:[#allocation58_spill] sm:$0xff] }
 0x39b   : > { %4120 = vrot.lane.b32.xlu0 %v7662_v47, %s8152_s6  ;;  %4125 = vrot.lane.b32.xlu1 %v7663_v3, %s8151_s10  ;;  %v4086_v8 = vshrl.u32 %v3995_v7, 16  ;;  %v3929_v41 = vcombine.high %v3927_v22, %v12382_v44  ;;  %v4033_v53 = vpack.i.b16 %v4032_v14, %v4031_v12  ;;  %v3963_v43 = vcombine.high %v3961_v51, %v12382_v44  ;;  %v12480_v47 = vld [vmem:[#allocation57_spill] sm:$0xff]  ;;  %v12481_v3 = vld [vmem:[#allocation38_spill] sm:$0xff] }
 0x39c   : > { %v7666_v48 = vcombine.low %v4027_v39, %v4075_v38  ;;  %v4030_v60 = vpack.i.b16 %v10641_v32, %v10611_v2  ;;  %v4038_v49 = vshrl.u32 %v3927_v22, 16  ;;  %v4085_v63 = vshrl.u32 %v3961_v51, 16  ;;  %v12483_v38 = vld [vmem:[#allocation14_spill] sm:$0xff] }
 0x39d   : > { %v3895_v23 = vcombine.high %v3893_v59, %v12382_v44  ;;  %v7668_v58 = vcombine.low %v4033_v53, %v4081_v18  ;;  %v4037_v56 = vshrl.u32 %v3893_v59, 16  ;;  %v4084_v17 = vpack.i.b16 %v3995_v7, %v3961_v51 }
 0x39e   : > { %v7667_v27 = vcombine.low %v4030_v60, %v4078_v40  ;;  %v4087_v11 = vpack.i.b16 %v4086_v8, %v4085_v63  ;;  %v4092_v35 = vshrl.u32 %v3997_v57, 16  ;;  %v4036_v6 = vpack.i.b16 %v3927_v22, %v3893_v59  ;;  %v12485_v22 = vld [vmem:[#allocation50_spill] sm:$0xff] }
 0x39f   : > { %4130 = vrot.lane.b32.xlu0 %v7664_v9, %s8154_s18  ;;  %4138 = vrot.lane.b32.xlu1 %v7666_v48, %s8150_s27  ;;  %v4039_v13 = vpack.i.b16 %v4038_v49, %v4037_v56  ;;  %v4044_v1 = vshrl.u32 %v3929_v41, 16  ;;  %v4091_v24 = vshrl.u32 %v3963_v43, 16  ;;  %v4043_v36 = vshrl.u32 %v3895_v23, 16 }
 0x3a0   : > { %v7669_v32 = vcombine.low %v4036_v6, %v4084_v17  ;;  %v4090_v37 = vpack.i.b16 %v3997_v57, %v3963_v43  ;;  %v4042_v7 = vpack.i.b16 %v3929_v41, %v3895_v23 }
 0x3a1   : > { %v7670_v2 = vcombine.low %v4039_v13, %v4087_v11  ;;  %v4093_v10 = vpack.i.b16 %v4092_v35, %v4091_v24  ;;  %v4045_v21 = vpack.i.b16 %v4044_v1, %v4043_v36 }
 0x3a2   : > { %v7671_v45 = vcombine.low %v4042_v7, %v4090_v37 }
 0x3a3   : > { %4148 = vrot.lane.b32.xlu1 %v7668_v58, %s8153_s30  ;;  %4143 = vrot.lane.b32.xlu0 %v7667_v27, %s8149_s7  ;;  %v7672_v5 = vcombine.low %v4045_v21, %v4093_v10 }
 0x3a7   : > { %4158 = vrot.lane.b32.xlu1 %v7670_v2, %s8152_s6  ;;  %4153 = vrot.lane.b32.xlu0 %v7669_v32, %s8148_s29 }
 0x3ab   : > { %4168 = vrot.lane.b32.xlu1 %v7672_v5, %s8154_s18  ;;  %4163 = vrot.lane.b32.xlu0 %v7671_v45, %s8151_s10 }
 0x3af   : > { %4206 = vrot.lane.b32.xlu1 %v12436_v20, %s8155_s26  ;;  %4204 = vrot.lane.b32.xlu0 %v10214_v50, %s8155_s26  ;;  %v12467_v50 = vld [vmem:[#allocation77_spill] sm:$0xff]  ;;  %v12473_v20 = vld [vmem:[#allocation46_spill] sm:$0xff] }
 0x3b3   : > { %4210 = vrot.lane.b32.xlu1 %v12437_v28, %s8155_s26  ;;  %4208 = vrot.lane.b32.xlu0 %v10224_v19, %s8155_s26  ;;  %v12468_v19 = vld [vmem:[#allocation53_spill] sm:$0xff]  ;;  %v12474_v28 = vld [vmem:[#allocation60_spill] sm:$0xff] }
 0x3b7   : > { %4214 = vrot.lane.b32.xlu1 %v12438_v62, %s8155_s26  ;;  %4212 = vrot.lane.b32.xlu0 %v10231_v61, %s8155_s26  ;;  %v12469_v61 = vld [vmem:[#allocation86_spill] sm:$0xff]  ;;  %v12475_v62 = vld [vmem:[#allocation47_spill] sm:$0xff] }
 0x3bb   : > { %4218 = vrot.lane.b32.xlu1 %v12439_v4, %s8155_s26  ;;  %4216 = vrot.lane.b32.xlu0 %v10238_v55, %s8155_s26  ;;  %v12471_v55 = vld [vmem:[#allocation30_spill] sm:$0xff]  ;;  %v12476_v4 = vld [vmem:[#allocation56_spill] sm:$0xff] }
 0x3bf   : > { %4222 = vrot.lane.b32.xlu1 %v12440_v0, %s8155_s26  ;;  %4220 = vrot.lane.b32.xlu0 %v10199_v25, %s8155_s26  ;;  %v12470_v25 = vld [vmem:[#allocation63_spill] sm:$0xff]  ;;  %v12477_v0 = vld [vmem:[#allocation48_spill] sm:$0xff] }
 0x3c3   : > { %4226 = vrot.lane.b32.xlu1 %v12441_v16, %s8155_s26  ;;  %4224 = vrot.lane.b32.xlu0 %v10204_v15, %s8155_s26  ;;  %v12472_v15 = vld [vmem:[#allocation59_spill] sm:$0xff]  ;;  %v12478_v16 = vld [vmem:[#allocation61_spill] sm:$0xff] }
 0x3c7   : > { %4230 = vrot.lane.b32.xlu1 %v12442_v52, %s8155_s26  ;;  %4228 = vrot.lane.b32.xlu0 %v12467_v50, %s8155_s26  ;;  %v12479_v52 = vld [vmem:[#allocation49_spill] sm:$0xff] }
 0x3cb   : > { %4234 = vrot.lane.b32.xlu1 %v12468_v19, %s8155_s26  ;;  %4232 = vrot.lane.b32.xlu0 %v12469_v61, %s8155_s26 }
 0x3cf   : > { %4238 = vrot.lane.b32.xlu1 %v12470_v25, %s8155_s26  ;;  %4236 = vrot.lane.b32.xlu0 %v12471_v55, %s8155_s26 }
 0x3d3   : > { %4242 = vrot.lane.b32.xlu1 %v12472_v15, %s8155_s26  ;;  %4240 = vrot.lane.b32.xlu0 %v12473_v20, %s8155_s26 }
 0x3d7   : > { %4246 = vrot.lane.b32.xlu1 %v12474_v28, %s8155_s26  ;;  %4244 = vrot.lane.b32.xlu0 %v12475_v62, %s8155_s26 }
 0x3db   : > { %4250 = vrot.lane.b32.xlu1 %v12476_v4, %s8155_s26  ;;  %4248 = vrot.lane.b32.xlu0 %v12477_v0, %s8155_s26 }
 0x3df   : > { %4254 = vrot.lane.b32.xlu1 %v12478_v16, %s8155_s26  ;;  %4252 = vrot.lane.b32.xlu0 %v12479_v52, %s8155_s26 }
 0x3e3   : > { %4258 = vrot.lane.b32.xlu1 %v12480_v47, %s8155_s26  ;;  %4256 = vrot.lane.b32.xlu0 %v12481_v3, %s8155_s26 }
 0x3e7   : > { %4262 = vrot.lane.b32.xlu1 %v12482_v31, %s8155_s26  ;;  %4260 = vrot.lane.b32.xlu0 %v12483_v38, %s8155_s26  ;;  %v12486_v31 = vld [vmem:[#allocation15_spill] sm:$0xff] }
 0x3eb   : > { %4266 = vrot.lane.b32.xlu1 %v12484_v34, %s8155_s26  ;;  %4264 = vrot.lane.b32.xlu0 %v12485_v22, %s8155_s26 }
 0x405   : > { %v4101_v14 = vpop.permute.xlu0 %4100  ;;  %v4106_v46 = vpop.permute.xlu1 %4105 }
 0x406   : > { %v4172_v51 = vsel %vm1512_vm0, %v10679_v33, %v4101_v14 }
 0x407   : > { %v4174_v30 = vsel %vm1516_vm2, %v4172_v51, %v4106_v46 }
 0x409   : > { %v4111_v42 = vpop.permute.xlu0 %4110  ;;  %v4116_v39 = vpop.permute.xlu1 %4115 }
 0x40a   : > { %v4176_v54 = vsel %vm1519_vm1, %v4174_v30, %v4111_v42 }
 0x40b   : > { %v4178_v59 = vsel %vm1522_vm3, %v4176_v54, %v4116_v39 }
 0x40d   : > { %v4121_v57 = vpop.permute.xlu0 %4120  ;;  %v4126_v12 = vpop.permute.xlu1 %4125 }
 0x40e   : > { %v4180_v18 = vsel %vm1525_vm4, %v4178_v59, %v4121_v57 }
 0x40f   : > { %v4182_v9 = vsel %vm1528_vm5, %v4180_v18, %v4126_v12 }
 0x411   : > { %v4131_v48 = vpop.permute.xlu0 %4130  ;;  %v4139_v40 = vpop.permute.xlu1 %4138 }
 0x412   : > { %v4184_v8 = vsel %vm1531_vm6, %v4182_v9, %v4131_v48  ;;  %v4188_v33 = vsel %vm1512_vm0, %v10686_v29, %v4139_v40 }
 0x413   : > { %4202 = vst [vmem:[#allocation3 + $0x40] sm:$0xff] %v4184_v8 }
 0x415   : > { %v4144_v41 = vpop.permute.xlu0 %4143  ;;  %v4149_v53 = vpop.permute.xlu1 %4148 }
 0x416   : > { %v4190_v43 = vsel %vm1516_vm2, %v4188_v33, %v4144_v41 }
 0x417   : > { %v4192_v60 = vsel %vm1519_vm1, %v4190_v43, %v4149_v53 }
 0x419   : > { %v4154_v49 = vpop.permute.xlu0 %4153  ;;  %v4159_v63 = vpop.permute.xlu1 %4158 }
 0x41a   : > { %v4194_v23 = vsel %vm1522_vm3, %v4192_v60, %v4154_v49 }
 0x41b   : > { %v4196_v58 = vsel %vm1525_vm4, %v4194_v23, %v4159_v63 }
 0x41d   : > { %v4164_v56 = vpop.permute.xlu0 %4163  ;;  %v4169_v27 = vpop.permute.xlu1 %4168 }
 0x41e   : > { %v4198_v11 = vsel %vm1528_vm5, %v4196_v58, %v4164_v56 }
 0x41f   : > { %v4200_v17 = vsel %vm1531_vm6, %v4198_v11, %v4169_v27 }
 0x420   : > { %4203 = vst [vmem:[#allocation3 + $0x48] sm:$0xff] %v4200_v17 }
 0x421   : > { %v4205_v29 = vpop.permute.xlu0 %4204  ;;  %v4207_v35 = vpop.permute.xlu1 %4206 }
 0x425   : > { %v4209_v13 = vpop.permute.xlu0 %4208  ;;  %v4211_v6 = vpop.permute.xlu1 %4210 }
 0x429   : > { %v4213_v1 = vpop.permute.xlu0 %4212  ;;  %v4215_v24 = vpop.permute.xlu1 %4214 }
 0x42d   : > { %v4217_v36 = vpop.permute.xlu0 %4216  ;;  %v4219_v2 = vpop.permute.xlu1 %4218 }
 0x431   : > { %v4221_v32 = vpop.permute.xlu0 %4220  ;;  %v4223_v10 = vpop.permute.xlu1 %4222 }
 0x432   : > { %v4300_v16 = vcombine.low %v4205_v29, %v4221_v32  ;;  %v4436_v3 = vcombine.low %v4207_v35, %v4223_v10 }
 0x434   : > { %v4307_v46 = vrot.slane %v4300_v16, %v12486_v31  ;;  %v10813_v42 = vrot.slane %v4436_v3, %v12486_v31 }
 0x435   : > { %v4225_v37 = vpop.permute.xlu0 %4224  ;;  %v4227_v21 = vpop.permute.xlu1 %4226 }
 0x436   : > { %v4334_v47 = vcombine.low %v4209_v13, %v4225_v37  ;;  %v4470_v9 = vcombine.low %v4211_v6, %v4227_v21 }
 0x438   : > { %v4341_v30 = vrot.slane %v4334_v47, %v12486_v31  ;;  %v10830_v63 = vrot.slane %v4470_v9, %v12486_v31 }
 0x439   : > { %v4229_v7 = vpop.permute.xlu0 %4228  ;;  %v4231_v5 = vpop.permute.xlu1 %4230 }
 0x43a   : > { %v4308_v28 = vcombine.low %v4213_v1, %v4229_v7  ;;  %v4444_v52 = vcombine.low %v4215_v24, %v4231_v5 }
 0x43c   : > { %v4315_v38 = vrot.slane %v4308_v28, %v12486_v31  ;;  %v10809_v51 = vrot.slane %v4444_v52, %v12486_v31 }
 0x43d   : > { %v4233_v45 = vpop.permute.xlu0 %4232  ;;  %v4235_v50 = vpop.permute.xlu1 %4234 }
 0x43e   : > { %v4342_v62 = vcombine.low %v4217_v36, %v4233_v45  ;;  %v4316_v39 = vcombine.low %v4307_v46, %v4315_v38  ;;  %v4478_v59 = vcombine.low %v4219_v2, %v4235_v50  ;;  %v4452_v18 = vcombine.low %v10813_v42, %v10809_v51 }
 0x43f   : > { %v4317_v43 = vcombine.high %v4307_v46, %v4315_v38  ;;  %v4453_v1 = vcombine.high %v10813_v42, %v10809_v51 }
 0x440   : > { %v4349_v34 = vrot.slane %v4342_v62, %v12486_v31  ;;  %v10818_v48 = vrot.slane %v4316_v39, %v12287_v26  ;;  %v10824_v33 = vrot.slane %v4478_v59, %v12486_v31  ;;  %v10827_v60 = vrot.slane %v4452_v18, %v12287_v26 }
 0x441   : > { %v4237_v19 = vpop.permute.xlu0 %4236  ;;  %v10797_v61 = vpop.permute.xlu1 %4238  ;;  %v10843_v6 = vrot.slane %v4317_v43, %v12287_v26 }
 0x442   : > { %v4350_v54 = vcombine.low %v4341_v30, %v4349_v34  ;;  %v4351_v23 = vcombine.high %v4341_v30, %v4349_v34  ;;  %v10836_v27 = vcombine.high %v10818_v48, %v12382_v44  ;;  %v4486_v11 = vcombine.low %v10830_v63, %v10824_v33 }
 0x443   : > { %v10849_v24 = vcombine.high %v10827_v60, %v12382_v44  ;;  %v4487_v2 = vcombine.high %v10830_v63, %v10824_v33  ;;  %v4575_v37 = vshrl.u32 %v10818_v48, 16  ;;  %v4599_v52 = vshrl.u32 %v10827_v60, 16 }
 0x444   : > { %v10821_v8 = vrot.slane %v4350_v54, %v12287_v26  ;;  %v4365_v21 = vrot.slane %v4351_v23, %v12287_v26  ;;  %v4581_v45 = vshrl.u32 %v10836_v27, 16  ;;  %v10859_v50 = vrot.slane %v4486_v11, %v12287_v26 }
 0x445   : > { %v4241_v25 = vpop.permute.xlu0 %4240  ;;  %v10799_v55 = vpop.permute.xlu1 %4242  ;;  %v4605_v63 = vshrl.u32 %v10849_v24, 16 }
 0x446   : > { %v4574_v13 = vpack.i.b16 %v10821_v8, %v10818_v48  ;;  %v4576_v16 = vshrl.u32 %v10821_v8, 16  ;;  %v4366_v38 = vcombine.high %v10821_v8, %v12382_v44  ;;  %v10886_v34 = vcombine.high %v10859_v50, %v12382_v44 }
 0x447   : > { %v4588_v46 = vshrl.u32 %v4365_v21, 16  ;;  %v10897_v59 = vcombine.high %v4365_v21, %v12382_v44 }
 0x448   : > { %v4582_v43 = vshrl.u32 %v4366_v38, 16  ;;  %v4606_v48 = vshrl.u32 %v10886_v34, 16  ;;  %v4604_v42 = vpack.i.b16 %v10886_v34, %v10849_v24  ;;  %v12494_v34 = vld [vmem:[#allocation117_spill] sm:$0xff] }
 0x449   : > { %v4245_v15 = vpop.permute.xlu0 %4244  ;;  %v10801_v20 = vpop.permute.xlu1 %4246 }
 0x44d   : > { %v4249_v4 = vpop.permute.xlu0 %4248  ;;  %v4251_v0 = vpop.permute.xlu1 %4250 }
 0x451   : > { %v4253_v22 = vpop.permute.xlu0 %4252  ;;  %v10805_v14 = vpop.permute.xlu1 %4254 }
 0x452   : > { %v4368_v40 = vcombine.low %v4237_v19, %v4253_v22  ;;  %v4504_v28 = vcombine.low %v10797_v61, %v10805_v14 }
 0x454   : > { %v4375_v58 = vrot.slane %v4368_v40, %v12486_v31  ;;  %v10892_v30 = vrot.slane %v4504_v28, %v12486_v31  ;;  %v4600_v28 = vshrl.u32 %v10859_v50, 16 }
 0x455   : > { %v4257_v57 = vpop.permute.xlu0 %4256  ;;  %v4259_v12 = vpop.permute.xlu1 %4258 }
 0x456   : > { %v4402_v17 = vcombine.low %v4241_v25, %v4257_v57  ;;  %v4538_v7 = vcombine.low %v10799_v55, %v4259_v12  ;;  %v4587_v55 = vshrl.u32 %v10843_v6, 16  ;;  %v4577_v57 = vpack.i.b16 %v4576_v16, %v4575_v37 }
 0x458   : > { %v4409_v19 = vrot.slane %v4402_v17, %v12486_v31  ;;  %v4545_v47 = vrot.slane %v4538_v7, %v12486_v31  ;;  %v4586_v17 = vpack.i.b16 %v4365_v21, %v10843_v6 }
 0x459   : > { %v4261_v41 = vpop.permute.xlu0 %4260  ;;  %v4263_v53 = vpop.permute.xlu1 %4262 }
 0x45a   : > { %v4376_v49 = vcombine.low %v4245_v15, %v4261_v41  ;;  %v4512_v5 = vcombine.low %v10801_v20, %v4263_v53  ;;  %v10874_v20 = vcombine.high %v10843_v6, %v12382_v44  ;;  %v4580_v53 = vpack.i.b16 %v4366_v38, %v10836_v27 }
 0x45b   : > { %v4583_v6 = vpack.i.b16 %v4582_v43, %v4581_v45  ;;  %v4598_v45 = vpack.i.b16 %v10859_v50, %v10827_v60  ;;  %v4467_v43 = vrot.slane %v4453_v1, %v12287_v26  ;;  %v12488_v60 = vld [vmem:[#allocation123_spill] sm:$0xff] }
 0x45c   : > { %v4383_v56 = vrot.slane %v4376_v49, %v12486_v31  ;;  %v10880_v61 = vrot.slane %v4512_v5, %v12486_v31  ;;  %v4589_v5 = vpack.i.b16 %v4588_v46, %v4587_v55 }
 0x45d   : > { %v4265_v29 = vpop.permute.xlu0 %4264  ;;  %v4267_v35 = vpop.permute.xlu1 %4266 }
 0x45e   : > { %v4384_v36 = vcombine.low %v4375_v58, %v4383_v56  ;;  %v4410_v32 = vcombine.low %v4249_v4, %v4265_v29  ;;  %v4546_v10 = vcombine.low %v4251_v0, %v4267_v35  ;;  %v4385_v3 = vcombine.high %v4375_v58, %v4383_v56 }
 0x45f   : > { %v4520_v41 = vcombine.low %v10892_v30, %v10880_v61 }
 0x460   : > { %v10863_v25 = vrot.slane %v4384_v36, %v12287_v26  ;;  %v4417_v15 = vrot.slane %v4410_v32, %v12486_v31  ;;  %v10869_v62 = vrot.slane %v4546_v10, %v12486_v31  ;;  %v4399_v40 = vrot.slane %v4385_v3, %v12287_v26 }
 0x461   : > { %v4528_v7 = vrot.slane %v4520_v41, %v12287_v26  ;;  %v4501_v41 = vrot.slane %v4487_v2, %v12287_v26 }
 0x462   : > { %v4418_v4 = vcombine.low %v4409_v19, %v4417_v15  ;;  %v4419_v0 = vcombine.high %v4409_v19, %v4417_v15  ;;  %v4400_v14 = vcombine.high %v10863_v25, %v12382_v44  ;;  %v4554_v54 = vcombine.low %v4545_v47, %v10869_v62 }
 0x463   : > { %v4623_v12 = vshrl.u32 %v10863_v25, 16  ;;  %v4635_v27 = vshrl.u32 %v4399_v40, 16  ;;  %v4592_v19 = vpack.i.b16 %v10897_v59, %v10874_v20  ;;  %v4555_v15 = vcombine.high %v4545_v47, %v10869_v62 }
 0x464   : > { %v4426_v22 = vrot.slane %v4418_v4, %v12287_v26  ;;  %v4433_v39 = vrot.slane %v4419_v0, %v12287_v26  ;;  %v4629_v58 = vshrl.u32 %v4400_v14, 16  ;;  %v4562_v11 = vrot.slane %v4554_v54, %v12287_v26 }
 0x465   : > { %v4401_v21 = vcombine.high %v4399_v40, %v12382_v44  ;;  %v4536_v62 = vcombine.high %v4528_v7, %v12382_v44  ;;  %v4594_v47 = vshrl.u32 %v10897_v59, 16  ;;  %v4521_v54 = vcombine.high %v10892_v30, %v10880_v61 }
 0x466   : > { %v4624_v18 = vshrl.u32 %v4426_v22, 16  ;;  %v4434_v9 = vcombine.high %v4426_v22, %v12382_v44  ;;  %v4634_v29 = vpack.i.b16 %v4433_v39, %v4399_v40  ;;  %v4636_v35 = vshrl.u32 %v4433_v39, 16 }
 0x467   : > { %v4435_v37 = vcombine.high %v4433_v39, %v12382_v44  ;;  %v4570_v4 = vcombine.high %v4562_v11, %v12382_v44  ;;  %v4648_v55 = vshrl.u32 %v4562_v11, 16  ;;  %v4622_v46 = vpack.i.b16 %v4426_v22, %v10863_v25 }
 0x468   : > { %v4625_v49 = vpack.i.b16 %v4624_v18, %v4623_v12  ;;  %v4628_v23 = vpack.i.b16 %v4434_v9, %v4400_v14  ;;  %v4630_v56 = vshrl.u32 %v4434_v9, 16  ;;  %v7677_v0 = vcombine.low %v4586_v17, %v4634_v29  ;;  %v12487_v29 = vld [vmem:[#allocation115_spill] sm:$0xff] }
 0x469   : > { %v4637_v16 = vpack.i.b16 %v4636_v35, %v4635_v27  ;;  %v4640_v38 = vpack.i.b16 %v4435_v37, %v4401_v21  ;;  %v4642_v14 = vshrl.u32 %v4435_v37, 16  ;;  %v4646_v39 = vpack.i.b16 %v4562_v11, %v4528_v7  ;;  %v12489_v35 = vld [vmem:[#allocation110_spill] sm:$0xff]  ;;  %v12491_v27 = vld [vmem:[#allocation111_spill] sm:$0xff] }
 0x46a   : > { %v7674_v36 = vcombine.low %v4577_v57, %v4625_v49  ;;  %v7675_v32 = vcombine.low %v4580_v53, %v4628_v23  ;;  %v4631_v10 = vpack.i.b16 %v4630_v56, %v4629_v58  ;;  %v4641_v57 = vshrl.u32 %v4401_v21, 16 }
 0x46b   : > { %v4647_v12 = vshrl.u32 %v4528_v7, 16  ;;  %v10929_v25 = vcombine.low %v4574_v13, %v4622_v46  ;;  %v4569_v22 = vrot.slane %v4555_v15, %v12287_v26  ;;  %v4593_v59 = vshrl.u32 %v10874_v20, 16 }
 0x46c   : > { %4674 = vrot.lane.b32.xlu0 %v7674_v36, %s8150_s27  ;;  %4679 = vrot.lane.b32.xlu1 %v7675_v32, %s8149_s7  ;;  %v7676_v3 = vcombine.low %v4583_v6, %v4631_v10  ;;  %v4654_v50 = vshrl.u32 %v4570_v4, 16  ;;  %v10933_v18 = vcombine.low %v4598_v45, %v4646_v39  ;;  %v7678_v9 = vcombine.low %v4589_v5, %v4637_v16  ;;  %v12490_v36 = vld [vmem:[#allocation116_spill] sm:$0xff] }
 0x46d   : > { %v7679_v61 = vcombine.low %v4592_v19, %v4640_v38  ;;  %v4643_v30 = vpack.i.b16 %v4642_v14, %v4641_v57  ;;  %v4649_v40 = vpack.i.b16 %v4648_v55, %v4647_v12  ;;  %v4653_v8 = vshrl.u32 %v4536_v62, 16  ;;  %v12492_v19 = vld [vmem:[#allocation118_spill] sm:$0xff]  ;;  %v12496_v39 = vld [vmem:[#allocation128_spill] sm:$0xff] }
 0x46e   : > { %v4535_v13 = vrot.slane %v4521_v54, %v12287_v26  ;;  %v4595_v20 = vpack.i.b16 %v4594_v47, %v4593_v59  ;;  %v4601_v53 = vpack.i.b16 %v4600_v28, %v4599_v52  ;;  %v4571_v33 = vcombine.high %v4569_v22, %v12382_v44 }
 0x46f   : > { %v4655_v2 = vpack.i.b16 %v4654_v50, %v4653_v8  ;;  %v4652_v58 = vpack.i.b16 %v4570_v4, %v4536_v62  ;;  %v4660_v56 = vshrl.u32 %v4569_v22, 16  ;;  %v4503_v11 = vcombine.high %v4501_v41, %v12382_v44 }
 0x470   : > { %4684 = vrot.lane.b32.xlu0 %v7676_v3, %s8153_s30  ;;  %4689 = vrot.lane.b32.xlu1 %v7677_v0, %s8148_s29  ;;  %v7680_v49 = vcombine.low %v4595_v20, %v4643_v30  ;;  %v7682_v23 = vcombine.low %v4601_v53, %v4649_v40  ;;  %v4607_v17 = vpack.i.b16 %v4606_v48, %v4605_v63  ;;  %v4612_v1 = vshrl.u32 %v4501_v41, 16  ;;  %v12493_v0 = vld [vmem:[#allocation131_spill] sm:$0xff]  ;;  %v12495_v3 = vld [vmem:[#allocation124_spill] sm:$0xff] }
 0x471   : > { %v4958_v52 = vcombine.high %v12488_v60, %v12487_v29  ;;  %v4992_v32 = vcombine.high %v12490_v36, %v12489_v35  ;;  %v4537_v51 = vcombine.high %v4535_v13, %v12382_v44  ;;  %v4659_v10 = vshrl.u32 %v4535_v13, 16  ;;  %v12498_v40 = vld [vmem:[#allocation132_spill] sm:$0xff] }
 0x472   : > { %v4469_v37 = vcombine.high %v4467_v43, %v12382_v44  ;;  %v7684_v7 = vcombine.low %v4607_v17, %v4655_v2  ;;  %v4611_v5 = vshrl.u32 %v4467_v43, 16  ;;  %v5060_v15 = vcombine.high %v12492_v19, %v12491_v27 }
 0x473   : > { %v7683_v6 = vcombine.low %v4604_v42, %v4652_v58  ;;  %v4661_v21 = vpack.i.b16 %v4660_v56, %v4659_v10  ;;  %v4658_v28 = vpack.i.b16 %v4569_v22, %v4535_v13  ;;  %v4666_v4 = vshrl.u32 %v4571_v33, 16 }
 0x474   : > { %4694 = vrot.lane.b32.xlu0 %v7678_v9, %s8152_s6  ;;  %4699 = vrot.lane.b32.xlu1 %v7679_v61, %s8151_s10  ;;  %v4973_v16 = vcombine.high %v12493_v0, %v12382_v44  ;;  %v4972_v55 = vrot.slane %v4958_v52, %v12287_v26  ;;  %v5006_v24 = vrot.slane %v4992_v32, %v12287_v26  ;;  %v4618_v62 = vshrl.u32 %v4503_v11, 16  ;;  %v12497_v61 = vld [vmem:[#allocation127_spill] sm:$0xff] }
 0x475   : > { %v5026_v38 = vcombine.high %v12495_v3, %v12494_v34  ;;  %v4613_v14 = vpack.i.b16 %v4612_v1, %v4611_v5  ;;  %v4610_v46 = vpack.i.b16 %v4501_v41, %v4467_v43  ;;  %v4665_v47 = vshrl.u32 %v4537_v51, 16 }
 0x476   : > { %v4617_v45 = vshrl.u32 %v4469_v37, 16  ;;  %v5075_v54 = vcombine.high %v12496_v39, %v12382_v44  ;;  %v5265_v57 = vshrl.u32 %v12496_v39, 16  ;;  %v5074_v12 = vrot.slane %v5060_v15, %v12287_v26  ;;  %v12502_v39 = vld [vmem:[#allocation129_spill] sm:$0xff] }
 0x477   : > { %v7686_v22 = vcombine.low %v4613_v14, %v4661_v21  ;;  %v7685_v59 = vcombine.low %v4610_v46, %v4658_v28  ;;  %v4667_v50 = vpack.i.b16 %v4666_v4, %v4665_v47  ;;  %v4664_v9 = vpack.i.b16 %v4571_v33, %v4537_v51  ;;  %v12501_v47 = vld [vmem:[#allocation122_spill] sm:$0xff] }
 0x478   : > { %4704 = vrot.lane.b32.xlu0 %v7680_v49, %s8154_s18  ;;  %4712 = vrot.lane.b32.xlu1 %v7682_v23, %s8150_s27  ;;  %v5007_v30 = vcombine.high %v12497_v61, %v12382_v44  ;;  %v5041_v41 = vcombine.high %v12498_v40, %v12382_v44  ;;  %v5216_v48 = vshrl.u32 %v12493_v0, 16  ;;  %v5040_v8 = vrot.slane %v5026_v38, %v12287_v26  ;;  %v12499_v38 = vld [vmem:[#allocation130_spill] sm:$0xff] }
 0x479   : > { %v4619_v13 = vpack.i.b16 %v4618_v62, %v4617_v45  ;;  %v4616_v20 = vpack.i.b16 %v4503_v11, %v4469_v37  ;;  %v5217_v53 = vshrl.u32 %v12497_v61, 16  ;;  %v5264_v43 = vshrl.u32 %v12498_v40, 16  ;;  %v12500_v62 = vld [vmem:[#allocation114_spill] sm:$0xff] }
 0x47a   : > { %v5269_v33 = vpack.i.b16 %v5075_v54, %v5041_v41  ;;  %v5222_v63 = vshrl.u32 %v4973_v16, 16  ;;  %v5271_v2 = vshrl.u32 %v5075_v54, 16  ;;  %v5076_v49 = vcombine.high %v5074_v12, %v12382_v44  ;;  %v12507_v40 = vld [vmem:[#allocation126_spill] sm:$0xff] }
 0x47b   : > { %v7688_v23 = vcombine.low %v4619_v13, %v4667_v50  ;;  %v7687_v58 = vcombine.low %v4616_v20, %v4664_v9  ;;  %v5266_v56 = vpack.i.b16 %v5265_v57, %v5264_v43  ;;  %v5277_v17 = vshrl.u32 %v5074_v12, 16  ;;  %v12503_v57 = vld [vmem:[#allocation113_spill] sm:$0xff]  ;;  %v12505_v50 = vld [vmem:[#allocation134_spill] sm:$0xff] }
 0x47c   : > { %4722 = vrot.lane.b32.xlu1 %v7684_v7, %s8153_s30  ;;  %4717 = vrot.lane.b32.xlu0 %v7683_v6, %s8149_s7  ;;  %v5223_v29 = vshrl.u32 %v5007_v30, 16  ;;  %v5270_v60 = vshrl.u32 %v5041_v41, 16  ;;  %v5008_v52 = vcombine.high %v5006_v24, %v12382_v44  ;;  %v5042_v35 = vcombine.high %v5040_v8, %v12382_v44  ;;  %v12508_v13 = vld [vmem:[#allocation133_spill] sm:$0xff] }
 0x47d   : > { %v5221_v11 = vpack.i.b16 %v5007_v30, %v4973_v16  ;;  %v5218_v36 = vpack.i.b16 %v5217_v53, %v5216_v48  ;;  %v5229_v32 = vshrl.u32 %v5006_v24, 16  ;;  %v5276_v51 = vshrl.u32 %v5040_v8, 16  ;;  %v12506_v30 = vld [vmem:[#allocation121_spill] sm:$0xff]  ;;  %v12509_v53 = vld [vmem:[#allocation119_spill] sm:$0xff] }
 0x47e   : > { %v5275_v42 = vpack.i.b16 %v5074_v12, %v5040_v8  ;;  %v5272_v1 = vpack.i.b16 %v5271_v2, %v5270_v60  ;;  %v4974_v10 = vcombine.high %v4972_v55, %v12382_v44  ;;  %v5281_v37 = vpack.i.b16 %v5076_v49, %v5042_v35  ;;  %v12504_v12 = vld [vmem:[#allocation120_spill] sm:$0xff]  ;;  %v12510_v43 = vld [vmem:[#allocation125_spill] sm:$0xff] }
 0x47f   : > { %v7707_v7 = vcombine.low %v5221_v11, %v5269_v33  ;;  %v7706_v5 = vcombine.low %v5218_v36, %v5266_v56  ;;  %v5228_v27 = vshrl.u32 %v4972_v55, 16  ;;  %v5278_v19 = vpack.i.b16 %v5277_v17, %v5276_v51 }
 0x480   : > { %4732 = vrot.lane.b32.xlu1 %v7686_v22, %s8152_s6  ;;  %4727 = vrot.lane.b32.xlu0 %v7685_v59, %s8148_s29  ;;  %v5227_v15 = vpack.i.b16 %v5006_v24, %v4972_v55  ;;  %v5224_v6 = vpack.i.b16 %v5223_v29, %v5222_v63  ;;  %v5233_v21 = vpack.i.b16 %v5008_v52, %v4974_v10  ;;  %v5283_v34 = vshrl.u32 %v5076_v49, 16 }
 0x481   : > { %v5230_v28 = vpack.i.b16 %v5229_v32, %v5228_v27  ;;  %v5289_v14 = vshrl.u32 %v12499_v38, 16  ;;  %v5211_v46 = vcombine.high %v12499_v38, %v12382_v44  ;;  %v5196_v55 = vcombine.high %v12501_v47, %v12500_v62 }
 0x482   : > { %v7709_v4 = vcombine.low %v5227_v15, %v5275_v42  ;;  %v7708_v0 = vcombine.low %v5224_v6, %v5272_v1  ;;  %v7711_v16 = vcombine.low %v5233_v21, %v5281_v37  ;;  %v5235_v24 = vshrl.u32 %v5008_v52, 16 }
 0x483   : > { %v7710_v3 = vcombine.low %v5230_v28, %v5278_v19  ;;  %v5282_v45 = vshrl.u32 %v5042_v35, 16  ;;  %v5143_v54 = vcombine.high %v12502_v39, %v12382_v44  ;;  %v5128_v22 = vcombine.high %v12504_v12, %v12503_v57 }
 0x484   : > { %4742 = vrot.lane.b32.xlu1 %v7688_v23, %s8154_s18  ;;  %4737 = vrot.lane.b32.xlu0 %v7687_v58, %s8151_s10  ;;  %v5241_v59 = vshrl.u32 %v12502_v39, 16  ;;  %v5288_v9 = vshrl.u32 %v12505_v50, 16  ;;  %v5177_v61 = vcombine.high %v12505_v50, %v12382_v44  ;;  %v5162_v41 = vcombine.high %v12507_v40, %v12506_v30  ;;  %v12513_v50 = vld [vmem:[#allocation89_spill] sm:$0xff]  ;;  %v12516_v30 = vld [vmem:[#allocation91_spill] sm:$0xff]  ;;  %v12517_v40 = vld [vmem:[#allocation94_spill] sm:$0xff] }
 0x485   : > { %v5234_v48 = vshrl.u32 %v4974_v10, 16  ;;  %v5284_v8 = vpack.i.b16 %v5283_v34, %v5282_v45  ;;  %v5109_v20 = vcombine.high %v12508_v13, %v12382_v44  ;;  %v5094_v33 = vcombine.high %v12510_v43, %v12509_v53  ;;  %v12523_v53 = vld [vmem:[#allocation42_spill] sm:$0xff]  ;;  %v12524_v43 = vld [vmem:[#allocation41_spill] sm:$0xff] }
 0x486   : > { %v5240_v63 = vshrl.u32 %v12508_v13, 16  ;;  %v5290_v2 = vpack.i.b16 %v5289_v14, %v5288_v9  ;;  %v5295_v49 = vshrl.u32 %v5211_v46, 16  ;;  %v5210_v23 = vrot.slane %v5196_v55, %v12287_v26  ;;  %v12514_v9 = vld [vmem:[#allocation88_spill] sm:$0xff]  ;;  %v12521_v13 = vld [vmem:[#allocation31_spill] sm:$0xff] }
 0x487   : > { %v5236_v58 = vpack.i.b16 %v5235_v24, %v5234_v48  ;;  %v5247_v56 = vshrl.u32 %v5143_v54, 16  ;;  %v5294_v29 = vshrl.u32 %v5177_v61, 16  ;;  %v5142_v60 = vrot.slane %v5128_v22, %v12287_v26  ;;  %v12511_v22 = vld [vmem:[#allocation87_spill] sm:$0xff]  ;;  %v12519_v48 = vld [vmem:[#allocation96_spill] sm:$0xff] }
 0x488   : > { %5320 = vrot.lane.b32.xlu1 %v7707_v7, %s8149_s7  ;;  %5315 = vrot.lane.b32.xlu0 %v7706_v5, %s8150_s27  ;;  %v5242_v17 = vpack.i.b16 %v5241_v59, %v5240_v63  ;;  %v5176_v52 = vrot.slane %v5162_v41, %v12287_v26  ;;  %v5246_v11 = vshrl.u32 %v5109_v20, 16  ;;  %v5293_v36 = vpack.i.b16 %v5211_v46, %v5177_v61  ;;  %v12512_v59 = vld [vmem:[#allocation20_spill] sm:$0xff]  ;;  %v12515_v61 = vld [vmem:[#allocation90_spill] sm:$0xff]  ;;  %v12518_v41 = vld [vmem:[#allocation93_spill] sm:$0xff] }
 0x489   : > { %v7712_v35 = vcombine.low %v5236_v58, %v5284_v8  ;;  %v5108_v32 = vrot.slane %v5094_v33, %v12287_v26  ;;  %v5296_v42 = vpack.i.b16 %v5295_v49, %v5294_v29  ;;  %v5301_v1 = vshrl.u32 %v5210_v23, 16  ;;  %v12520_v8 = vld [vmem:[#allocation95_spill] sm:$0xff]  ;;  %v12526_v63 = vld [vmem:[#allocation34_spill] sm:$0xff]  ;;  %v12528_v49 = vld [vmem:[#allocation37_spill] sm:$0xff] }
 0x48a   : > { %v7714_v51 = vcombine.low %v5242_v17, %v5290_v2  ;;  %v5212_v10 = vcombine.high %v5210_v23, %v12382_v44  ;;  %v5248_v37 = vpack.i.b16 %v5247_v56, %v5246_v11  ;;  %v5245_v7 = vpack.i.b16 %v5143_v54, %v5109_v20  ;;  %v12522_v20 = vld [vmem:[#allocation97_spill] sm:$0xff]  ;;  %v12525_v33 = vld [vmem:[#allocation103_spill] sm:$0xff]  ;;  %v12527_v2 = vld [vmem:[#allocation112_spill] sm:$0xff] }
 0x48b   : > { %v5253_v5 = vshrl.u32 %v5142_v60, 16  ;;  %v5300_v27 = vshrl.u32 %v5176_v52, 16  ;;  %v5144_v19 = vcombine.high %v5142_v60, %v12382_v44  ;;  %v5178_v15 = vcombine.high %v5176_v52, %v12382_v44  ;;  %v12530_v58 = vld [vmem:[#allocation43_spill] sm:$0xff]  ;;  %v12531_v56 = vld [vmem:[#allocation108_spill] sm:$0xff]  ;;  %v12537_v11 = vld [vmem:[#allocation105_spill] sm:$0xff] }
 0x48c   : > { %5330 = vrot.lane.b32.xlu1 %v7709_v4, %s8148_s29  ;;  %5325 = vrot.lane.b32.xlu0 %v7708_v0, %s8153_s30  ;;  %v7715_v6 = vcombine.low %v5245_v7, %v5293_v36  ;;  %v5252_v21 = vshrl.u32 %v5108_v32, 16  ;;  %v5110_v28 = vcombine.high %v5108_v32, %v12382_v44  ;;  %v7716_v4 = vcombine.low %v5248_v37, %v5296_v42  ;;  %v12532_v17 = vld [vmem:[#allocation40_spill] sm:$0xff]  ;;  %v12538_v36 = vld [vmem:[#allocation51_spill] sm:$0xff]  ;;  %v12542_v7 = vld [vmem:[#allocation101_spill] sm:$0xff] }
 0x48d   : > { %v5302_v0 = vpack.i.b16 %v5301_v1, %v5300_v27  ;;  %v5307_v34 = vshrl.u32 %v5212_v10, 16  ;;  %v5251_v38 = vpack.i.b16 %v5142_v60, %v5108_v32  ;;  %v5259_v14 = vshrl.u32 %v5144_v19, 16  ;;  %v12533_v29 = vld [vmem:[#allocation104_spill] sm:$0xff]  ;;  %v12534_v60 = vld [vmem:[#allocation99_spill] sm:$0xff]  ;;  %v12539_v32 = vld [vmem:[#allocation106_spill] sm:$0xff] }
 0x48e   : > { %v5306_v46 = vshrl.u32 %v5178_v15, 16  ;;  %v5258_v62 = vshrl.u32 %v5110_v28, 16  ;;  %v5305_v45 = vpack.i.b16 %v5212_v10, %v5178_v15  ;;  %v5257_v54 = vpack.i.b16 %v5144_v19, %v5110_v28  ;;  %v12541_v37 = vld [vmem:[#allocation36_spill] sm:$0xff] }
 0x490   : > { %5340 = vrot.lane.b32.xlu1 %v7711_v16, %s8151_s10  ;;  %5335 = vrot.lane.b32.xlu0 %v7710_v3, %s8152_s6  ;;  %v5299_v16 = vpack.i.b16 %v5210_v23, %v5176_v52  ;;  %v5254_v3 = vpack.i.b16 %v5253_v5, %v5252_v21  ;;  %v5308_v24 = vpack.i.b16 %v5307_v34, %v5306_v46  ;;  %v12529_v23 = vld [vmem:[#allocation107_spill] sm:$0xff]  ;;  %v12535_v52 = vld [vmem:[#allocation109_spill] sm:$0xff] }
 0x491   : > { %v5260_v39 = vpack.i.b16 %v5259_v14, %v5258_v62  ;;  %v7719_v12 = vcombine.low %v5257_v54, %v5305_v45 }
 0x492   : > { %v7718_v47 = vcombine.low %v5254_v3, %v5302_v0  ;;  %v7717_v55 = vcombine.low %v5251_v38, %v5299_v16 }
 0x493   : > { %v7720_v57 = vcombine.low %v5260_v39, %v5308_v24 }
 0x494   : > { %5353 = vrot.lane.b32.xlu1 %v7714_v51, %s8150_s27  ;;  %5345 = vrot.lane.b32.xlu0 %v7712_v35, %s8154_s18  ;;  %v12536_v35 = vld [vmem:[#allocation100_spill] sm:$0xff]  ;;  %v12540_v51 = vld [vmem:[#allocation102_spill] sm:$0xff] }
 0x498   : > { %5363 = vrot.lane.b32.xlu1 %v7716_v4, %s8153_s30  ;;  %5358 = vrot.lane.b32.xlu0 %v7715_v6, %s8149_s7 }
 0x49c   : > { %5373 = vrot.lane.b32.xlu1 %v7718_v47, %s8152_s6  ;;  %5368 = vrot.lane.b32.xlu0 %v7717_v55, %s8148_s29 }
 0x4a0   : > { %5383 = vrot.lane.b32.xlu1 %v7720_v57, %s8154_s18  ;;  %5378 = vrot.lane.b32.xlu0 %v7719_v12, %s8151_s10 }
 0x4a4   : > { %5421 = vrot.lane.b32.xlu1 %v12511_v22, %s8145_s9  ;;  %5419 = vrot.lane.b32.xlu0 %v12512_v59, %s8145_s9 }
 0x4a8   : > { %5425 = vrot.lane.b32.xlu1 %v12513_v50, %s8145_s9  ;;  %5423 = vrot.lane.b32.xlu0 %v12514_v9, %s8145_s9 }
 0x4ac   : > { %5429 = vrot.lane.b32.xlu1 %v12515_v61, %s8145_s9  ;;  %5427 = vrot.lane.b32.xlu0 %v12516_v30, %s8145_s9 }
 0x4b0   : > { %5433 = vrot.lane.b32.xlu1 %v12517_v40, %s8145_s9  ;;  %5431 = vrot.lane.b32.xlu0 %v12518_v41, %s8145_s9 }
 0x4b4   : > { %5437 = vrot.lane.b32.xlu1 %v12519_v48, %s8145_s9  ;;  %5435 = vrot.lane.b32.xlu0 %v12520_v8, %s8145_s9 }
 0x4b8   : > { %5441 = vrot.lane.b32.xlu1 %v12521_v13, %s8145_s9  ;;  %5439 = vrot.lane.b32.xlu0 %v12522_v20, %s8145_s9 }
 0x4bc   : > { %5445 = vrot.lane.b32.xlu1 %v12523_v53, %s8145_s9  ;;  %5443 = vrot.lane.b32.xlu0 %v12524_v43, %s8145_s9 }
 0x4c0   : > { %5449 = vrot.lane.b32.xlu1 %v12525_v33, %s8145_s9  ;;  %5447 = vrot.lane.b32.xlu0 %v12526_v63, %s8145_s9 }
 0x4c4   : > { %5453 = vrot.lane.b32.xlu1 %v12527_v2, %s8145_s9  ;;  %5451 = vrot.lane.b32.xlu0 %v12528_v49, %s8145_s9 }
 0x4c8   : > { %5457 = vrot.lane.b32.xlu1 %v12529_v23, %s8145_s9  ;;  %5455 = vrot.lane.b32.xlu0 %v12530_v58, %s8145_s9 }
 0x4cc   : > { %5461 = vrot.lane.b32.xlu1 %v12531_v56, %s8145_s9  ;;  %5459 = vrot.lane.b32.xlu0 %v12532_v17, %s8145_s9 }
 0x4d0   : > { %5465 = vrot.lane.b32.xlu1 %v12533_v29, %s8145_s9  ;;  %5463 = vrot.lane.b32.xlu0 %v12534_v60, %s8145_s9 }
 0x4d4   : > { %5469 = vrot.lane.b32.xlu1 %v12535_v52, %s8145_s9  ;;  %5467 = vrot.lane.b32.xlu0 %v12536_v35, %s8145_s9 }
 0x4d8   : > { %5473 = vrot.lane.b32.xlu1 %v12537_v11, %s8145_s9  ;;  %5471 = vrot.lane.b32.xlu0 %v12538_v36, %s8145_s9 }
 0x4dc   : > { %5477 = vrot.lane.b32.xlu1 %v12539_v32, %s8145_s9  ;;  %5475 = vrot.lane.b32.xlu0 %v12540_v51, %s8145_s9 }
 0x4de   : > { %v4675_v42 = vpop.permute.xlu0 %4674  ;;  %v4680_v1 = vpop.permute.xlu1 %4679 }
 0x4df   : > { %v4746_v10 = vsel %vm1512_vm0, %v10929_v25, %v4675_v42 }
 0x4e0   : > { %5481 = vrot.lane.b32.xlu1 %v12541_v37, %s8145_s9  ;;  %5479 = vrot.lane.b32.xlu0 %v12542_v7, %s8145_s9  ;;  %v4748_v5 = vsel %vm1516_vm2, %v4746_v10, %v4680_v1 }
 0x4e2   : > { %v4685_v27 = vpop.permute.xlu0 %4684  ;;  %v4690_v19 = vpop.permute.xlu1 %4689 }
 0x4e3   : > { %v4750_v15 = vsel %vm1519_vm1, %v4748_v5, %v4685_v27 }
 0x4e4   : > { %5995 = vrot.lane.b32.xlu1 %v12511_v22, %s8155_s26  ;;  %5993 = vrot.lane.b32.xlu0 %v12512_v59, %s8155_s26  ;;  %v4752_v25 = vsel %vm1522_vm3, %v4750_v15, %v4690_v19  ;;  %v12543_v59 = vld [vmem:[#allocation135_spill] sm:$0xff] }
 0x4e6   : > { %v4695_v6 = vpop.permute.xlu0 %4694  ;;  %v4700_v21 = vpop.permute.xlu1 %4699 }
 0x4e7   : > { %v4754_v28 = vsel %vm1525_vm4, %v4752_v25, %v4695_v6 }
 0x4e8   : > { %5999 = vrot.lane.b32.xlu1 %v12513_v50, %s8155_s26  ;;  %5997 = vrot.lane.b32.xlu0 %v12514_v9, %s8155_s26  ;;  %v4756_v4 = vsel %vm1528_vm5, %v4754_v28, %v4700_v21 }
 0x4ea   : > { %v4705_v0 = vpop.permute.xlu0 %4704  ;;  %v4713_v16 = vpop.permute.xlu1 %4712 }
 0x4eb   : > { %v4758_v34 = vsel %vm1531_vm6, %v4756_v4, %v4705_v0  ;;  %v4762_v3 = vsel %vm1512_vm0, %v10933_v18, %v4713_v16 }
 0x4ec   : > { %4776 = vst [vmem:[#allocation3 + $0x50] sm:$0xff] %v4758_v34  ;;  %6003 = vrot.lane.b32.xlu1 %v12515_v61, %s8155_s26  ;;  %6001 = vrot.lane.b32.xlu0 %v12516_v30, %s8155_s26 }
 0x4ee   : > { %v4718_v38 = vpop.permute.xlu0 %4717  ;;  %v4723_v14 = vpop.permute.xlu1 %4722 }
 0x4ef   : > { %v4764_v46 = vsel %vm1516_vm2, %v4762_v3, %v4718_v38 }
 0x4f0   : > { %6007 = vrot.lane.b32.xlu1 %v12517_v40, %s8155_s26  ;;  %6005 = vrot.lane.b32.xlu0 %v12518_v41, %s8155_s26  ;;  %v4766_v62 = vsel %vm1519_vm1, %v4764_v46, %v4723_v14 }
 0x4f2   : > { %v4728_v47 = vpop.permute.xlu0 %4727  ;;  %v4733_v55 = vpop.permute.xlu1 %4732 }
 0x4f3   : > { %v4768_v24 = vsel %vm1522_vm3, %v4766_v62, %v4728_v47 }
 0x4f4   : > { %6011 = vrot.lane.b32.xlu1 %v12519_v48, %s8155_s26  ;;  %6009 = vrot.lane.b32.xlu0 %v12520_v8, %s8155_s26  ;;  %v4770_v18 = vsel %vm1525_vm4, %v4768_v24, %v4733_v55 }
 0x4f6   : > { %v4738_v45 = vpop.permute.xlu0 %4737  ;;  %v4743_v39 = vpop.permute.xlu1 %4742 }
 0x4f7   : > { %v4772_v54 = vsel %vm1528_vm5, %v4770_v18, %v4738_v45 }
 0x4f8   : > { %v4774_v57 = vsel %vm1531_vm6, %v4772_v54, %v4743_v39  ;;  %6015 = vrot.lane.b32.xlu1 %v12521_v13, %s8155_s26  ;;  %6013 = vrot.lane.b32.xlu0 %v12522_v20, %s8155_s26 }
 0x4f9   : > { %4777 = vst [vmem:[#allocation3 + $0x58] sm:$0xff] %v4774_v57 }
 0x4fa   : > { %v5316_v12 = vpop.permute.xlu0 %5315  ;;  %v5321_v22 = vpop.permute.xlu1 %5320 }
 0x4fb   : > { %v5387_v50 = vsel %vm1512_vm0, %v12543_v59, %v5316_v12 }
 0x4fc   : > { %6019 = vrot.lane.b32.xlu1 %v12523_v53, %s8155_s26  ;;  %6017 = vrot.lane.b32.xlu0 %v12524_v43, %s8155_s26  ;;  %v5389_v9 = vsel %vm1516_vm2, %v5387_v50, %v5321_v22 }
 0x4fe   : > { %v5326_v61 = vpop.permute.xlu0 %5325  ;;  %v5331_v30 = vpop.permute.xlu1 %5330 }
 0x4ff   : > { %v5391_v40 = vsel %vm1519_vm1, %v5389_v9, %v5326_v61 }
 0x500   : > { %6023 = vrot.lane.b32.xlu1 %v12525_v33, %s8155_s26  ;;  %6021 = vrot.lane.b32.xlu0 %v12526_v63, %s8155_s26  ;;  %v5393_v41 = vsel %vm1522_vm3, %v5391_v40, %v5331_v30  ;;  %v12544_v63 = vld [vmem:[#allocation136_spill] sm:$0xff] }
 0x502   : > { %v5336_v48 = vpop.permute.xlu0 %5335  ;;  %v5341_v8 = vpop.permute.xlu1 %5340 }
 0x503   : > { %v5395_v13 = vsel %vm1525_vm4, %v5393_v41, %v5336_v48 }
 0x504   : > { %6027 = vrot.lane.b32.xlu1 %v12527_v2, %s8155_s26  ;;  %6025 = vrot.lane.b32.xlu0 %v12528_v49, %s8155_s26  ;;  %v5397_v20 = vsel %vm1528_vm5, %v5395_v13, %v5341_v8 }
 0x506   : > { %v5346_v53 = vpop.permute.xlu0 %5345  ;;  %v5354_v43 = vpop.permute.xlu1 %5353 }
 0x507   : > { %v5399_v33 = vsel %vm1531_vm6, %v5397_v20, %v5346_v53  ;;  %v5403_v42 = vsel %vm1512_vm0, %v12544_v63, %v5354_v43 }
 0x508   : > { %5417 = vst [vmem:[#allocation3 + $0x60] sm:$0xff] %v5399_v33  ;;  %6031 = vrot.lane.b32.xlu1 %v12529_v23, %s8155_s26  ;;  %6029 = vrot.lane.b32.xlu0 %v12530_v58, %s8155_s26 }
 0x50a   : > { %v5359_v2 = vpop.permute.xlu0 %5358  ;;  %v5364_v1 = vpop.permute.xlu1 %5363 }
 0x50b   : > { %v5405_v49 = vsel %vm1516_vm2, %v5403_v42, %v5359_v2 }
 0x50c   : > { %6035 = vrot.lane.b32.xlu1 %v12531_v56, %s8155_s26  ;;  %6033 = vrot.lane.b32.xlu0 %v12532_v17, %s8155_s26  ;;  %v5407_v10 = vsel %vm1519_vm1, %v5405_v49, %v5364_v1 }
 0x50e   : > { %v5369_v5 = vpop.permute.xlu0 %5368  ;;  %v5374_v23 = vpop.permute.xlu1 %5373 }
 0x50f   : > { %v5409_v27 = vsel %vm1522_vm3, %v5407_v10, %v5369_v5 }
 0x510   : > { %6039 = vrot.lane.b32.xlu1 %v12533_v29, %s8155_s26  ;;  %6037 = vrot.lane.b32.xlu0 %v12534_v60, %s8155_s26  ;;  %v5411_v58 = vsel %vm1525_vm4, %v5409_v27, %v5374_v23 }
 0x512   : > { %v5379_v19 = vpop.permute.xlu0 %5378  ;;  %v5384_v15 = vpop.permute.xlu1 %5383 }
 0x513   : > { %v5413_v56 = vsel %vm1528_vm5, %v5411_v58, %v5379_v19 }
 0x514   : > { %v5415_v17 = vsel %vm1531_vm6, %v5413_v56, %v5384_v15  ;;  %6043 = vrot.lane.b32.xlu1 %v12535_v52, %s8155_s26  ;;  %6041 = vrot.lane.b32.xlu0 %v12536_v35, %s8155_s26 }
 0x515   : > { %5418 = vst [vmem:[#allocation3 + $0x68] sm:$0xff] %v5415_v17 }
 0x516   : > { %v5420_v25 = vpop.permute.xlu0 %5419  ;;  %v5422_v29 = vpop.permute.xlu1 %5421 }
 0x518   : > { %6047 = vrot.lane.b32.xlu1 %v12537_v11, %s8155_s26  ;;  %6045 = vrot.lane.b32.xlu0 %v12538_v36, %s8155_s26 }
 0x51a   : > { %v5424_v60 = vpop.permute.xlu0 %5423  ;;  %v5426_v6 = vpop.permute.xlu1 %5425 }
 0x51c   : > { %6051 = vrot.lane.b32.xlu1 %v12539_v32, %s8155_s26  ;;  %6049 = vrot.lane.b32.xlu0 %v12540_v51, %s8155_s26 }
 0x51e   : > { %v5428_v52 = vpop.permute.xlu0 %5427  ;;  %v5430_v21 = vpop.permute.xlu1 %5429 }
 0x520   : > { %6055 = vrot.lane.b32.xlu1 %v12541_v37, %s8155_s26  ;;  %6053 = vrot.lane.b32.xlu0 %v12542_v7, %s8155_s26 }
 0x522   : > { %v5432_v35 = vpop.permute.xlu0 %5431  ;;  %v5434_v11 = vpop.permute.xlu1 %5433 }
 0x526   : > { %v5436_v28 = vpop.permute.xlu0 %5435  ;;  %v5438_v36 = vpop.permute.xlu1 %5437 }
 0x527   : > { %v5515_v16 = vcombine.low %v5420_v25, %v5436_v28  ;;  %v5651_v34 = vcombine.low %v5422_v29, %v5438_v36 }
 0x529   : > { %v5522_v14 = vrot.slane %v5515_v16, %v12486_v31  ;;  %v5658_v46 = vrot.slane %v5651_v34, %v12486_v31 }
 0x52a   : > { %v5440_v4 = vpop.permute.xlu0 %5439  ;;  %v5442_v0 = vpop.permute.xlu1 %5441 }
 0x52b   : > { %v5549_v62 = vcombine.low %v5424_v60, %v5440_v4  ;;  %v5685_v47 = vcombine.low %v5426_v6, %v5442_v0 }
 0x52d   : > { %v5556_v40 = vrot.slane %v5549_v62, %v12486_v31  ;;  %v5692_v41 = vrot.slane %v5685_v47, %v12486_v31 }
 0x52e   : > { %v5444_v32 = vpop.permute.xlu0 %5443  ;;  %v5446_v3 = vpop.permute.xlu1 %5445 }
 0x52f   : > { %v5523_v38 = vcombine.low %v5428_v52, %v5444_v32  ;;  %v5659_v51 = vcombine.low %v5430_v21, %v5446_v3 }
 0x531   : > { %v5530_v37 = vrot.slane %v5523_v38, %v12486_v31  ;;  %v5666_v7 = vrot.slane %v5659_v51, %v12486_v31 }
 0x532   : > { %v5448_v55 = vpop.permute.xlu0 %5447  ;;  %v5450_v24 = vpop.permute.xlu1 %5449 }
 0x533   : > { %v5531_v18 = vcombine.low %v5522_v14, %v5530_v37  ;;  %v5532_v45 = vcombine.high %v5522_v14, %v5530_v37  ;;  %v5667_v39 = vcombine.low %v5658_v46, %v5666_v7  ;;  %v5668_v54 = vcombine.high %v5658_v46, %v5666_v7 }
 0x534   : > { %v5557_v57 = vcombine.low %v5432_v35, %v5448_v55  ;;  %v5693_v12 = vcombine.low %v5434_v11, %v5450_v24 }
 0x535   : > { %v11199_v22 = vrot.slane %v5531_v18, %v12287_v26  ;;  %v11202_v59 = vrot.slane %v5667_v39, %v12287_v26  ;;  %v11213_v48 = vrot.slane %v5532_v45, %v12287_v26  ;;  %v11220_v33 = vrot.slane %v5668_v54, %v12287_v26 }
 0x536   : > { %v5564_v50 = vrot.slane %v5557_v57, %v12486_v31  ;;  %v5700_v9 = vrot.slane %v5693_v12, %v12486_v31  ;;  %v11206_v61 = vpop.permute.xlu0 %5451  ;;  %v11208_v30 = vpop.permute.xlu1 %5453 }
 0x537   : > { %12545 = vst [vmem:[#allocation18_spill] sm:$0xff] %v11202_v59  ;;  %v11217_v43 = vcombine.high %v11199_v22, %v12382_v44  ;;  %v11224_v63 = vcombine.high %v11202_v59, %v12382_v44  ;;  %v5802_v23 = vshrl.u32 %v11213_v48, 16  ;;  %v5826_v19 = vshrl.u32 %v11220_v33, 16 }
 0x538   : > { %v5565_v8 = vcombine.low %v5556_v40, %v5564_v50  ;;  %v5566_v13 = vcombine.high %v5556_v40, %v5564_v50  ;;  %v5701_v20 = vcombine.low %v5692_v41, %v5700_v9  ;;  %v5702_v53 = vcombine.high %v5692_v41, %v5700_v9 }
 0x539   : > { %v5796_v29 = vshrl.u32 %v11217_v43, 16  ;;  %v5820_v52 = vshrl.u32 %v11224_v63, 16  ;;  %v11278_v34 = vcombine.high %v11213_v48, %v12382_v44  ;;  %v11290_v46 = vcombine.high %v11220_v33, %v12382_v44 }
 0x53a   : > { %v11226_v42 = vpop.permute.xlu0 %5455  ;;  %v11228_v2 = vpop.permute.xlu1 %5457  ;;  %v11231_v1 = vrot.slane %v5565_v8, %v12287_v26  ;;  %v11234_v49 = vrot.slane %v5566_v13, %v12287_v26  ;;  %v11237_v10 = vrot.slane %v5701_v20, %v12287_v26  ;;  %v11240_v5 = vrot.slane %v5702_v53, %v12287_v26 }
 0x53b   : > { %v5808_v18 = vshrl.u32 %v11278_v34, 16  ;;  %v5832_v40 = vshrl.u32 %v11290_v46, 16  ;;  %v5790_v8 = vshrl.u32 %v11199_v22, 16 }
 0x53c   : > { %12546 = vst [vmem:[#allocation92_spill] sm:$0xff] %v11237_v10  ;;  %v11245_v27 = vcombine.high %v11231_v1, %v12382_v44  ;;  %v5803_v58 = vshrl.u32 %v11234_v49, 16  ;;  %v11251_v15 = vcombine.high %v11237_v10, %v12382_v44  ;;  %v5827_v56 = vshrl.u32 %v11240_v5, 16 }
 0x53d   : > { %v11263_v35 = vcombine.high %v11234_v49, %v12382_v44  ;;  %v11284_v51 = vcombine.high %v11240_v5, %v12382_v44 }
 0x53e   : > { %v5460_v17 = vpop.permute.xlu0 %5459  ;;  %v5462_v25 = vpop.permute.xlu1 %5461  ;;  %v5797_v6 = vshrl.u32 %v11245_v27, 16  ;;  %v5821_v28 = vshrl.u32 %v11251_v15, 16  ;;  %v11272_v0 = vpack.i.b16 %v5803_v58, %v5802_v23  ;;  %v11274_v16 = vpack.i.b16 %v5827_v56, %v5826_v19 }
 0x53f   : > { %v5809_v45 = vshrl.u32 %v11263_v35, 16  ;;  %v5833_v41 = vshrl.u32 %v11284_v51, 16  ;;  %v5791_v23 = vshrl.u32 %v11231_v1, 16  ;;  %v5815_v58 = vshrl.u32 %v11237_v10, 16 }
 0x540   : > { %v11270_v4 = vpack.i.b16 %v5797_v6, %v5796_v29  ;;  %v11280_v38 = vpack.i.b16 %v5821_v28, %v5820_v52 }
 0x541   : > { %v11298_v12 = vpack.i.b16 %v5809_v45, %v5808_v18  ;;  %v11307_v53 = vpack.i.b16 %v5833_v41, %v5832_v40 }
 0x542   : > { %v5464_v32 = vpop.permute.xlu0 %5463  ;;  %v5466_v3 = vpop.permute.xlu1 %5465 }
 0x546   : > { %v5468_v37 = vpop.permute.xlu0 %5467  ;;  %v5470_v7 = vpop.permute.xlu1 %5469 }
 0x547   : > { %v5583_v24 = vcombine.low %v11206_v61, %v5468_v37  ;;  %v5719_v39 = vcombine.low %v11208_v30, %v5470_v7  ;;  %v5814_v37 = vshrl.u32 %v11202_v59, 16  ;;  %v12551_v59 = vpack.i.b16 %v11245_v27, %v11217_v43 }
 0x549   : > { %v5590_v61 = vrot.slane %v5583_v24, %v12486_v31  ;;  %v5726_v13 = vrot.slane %v5719_v39, %v12486_v31  ;;  %v5816_v40 = vpack.i.b16 %v5815_v58, %v5814_v37 }
 0x54a   : > { %v5472_v47 = vpop.permute.xlu0 %5471  ;;  %v5474_v55 = vpop.permute.xlu1 %5473 }
 0x54b   : > { %v5617_v19 = vcombine.low %v11226_v42, %v5472_v47  ;;  %v5753_v56 = vcombine.low %v11228_v2, %v5474_v55 }
 0x54e   : > { %v5476_v54 = vpop.permute.xlu0 %5475  ;;  %v5478_v57 = vpop.permute.xlu1 %5477 }
 0x54f   : > { %v5591_v50 = vcombine.low %v5460_v17, %v5476_v54  ;;  %v5727_v9 = vcombine.low %v5462_v25, %v5478_v57  ;;  %v5624_v57 = vrot.slane %v5617_v19, %v12486_v31 }
 0x551   : > { %v5598_v20 = vrot.slane %v5591_v50, %v12486_v31  ;;  %v5734_v30 = vrot.slane %v5727_v9, %v12486_v31  ;;  %v5760_v50 = vrot.slane %v5753_v56, %v12486_v31  ;;  %v5792_v9 = vpack.i.b16 %v5791_v23, %v5790_v8 }
 0x552   : > { %v5480_v17 = vpop.permute.xlu0 %5479  ;;  %v5482_v25 = vpop.permute.xlu1 %5481 }
 0x553   : > { %v5599_v29 = vcombine.low %v5590_v61, %v5598_v20  ;;  %v5600_v6 = vcombine.high %v5590_v61, %v5598_v20  ;;  %v5735_v52 = vcombine.low %v5726_v13, %v5734_v30  ;;  %v5736_v28 = vcombine.high %v5726_v13, %v5734_v30 }
 0x554   : > { %v5625_v7 = vcombine.low %v5464_v32, %v5480_v17  ;;  %v5761_v24 = vcombine.low %v5466_v3, %v5482_v25 }
 0x555   : > { %v11317_v45 = vrot.slane %v5599_v29, %v12287_v26  ;;  %v11320_v42 = vrot.slane %v5600_v6, %v12287_v26  ;;  %v11323_v2 = vrot.slane %v5735_v52, %v12287_v26  ;;  %v11326_v47 = vrot.slane %v5736_v28, %v12287_v26 }
 0x556   : > { %v5632_v55 = vrot.slane %v5625_v7, %v12486_v31  ;;  %v5768_v32 = vrot.slane %v5761_v24, %v12486_v31  ;;  %v11330_v3 = vpop.permute.xlu0 %5993  ;;  %v11332_v39 = vpop.permute.xlu1 %5995 }
 0x557   : > { %12547 = vst [vmem:[#allocation82_spill] sm:$0xff] %v11330_v3  ;;  %12548 = vst [vmem:[#allocation98_spill] sm:$0xff] %v11332_v39  ;;  %v5615_v41 = vcombine.high %v11317_v45, %v12382_v44  ;;  %v11342_v61 = vcombine.high %v11320_v42, %v12382_v44  ;;  %v5751_v13 = vcombine.high %v11323_v2, %v12382_v44  ;;  %v5838_v8 = vshrl.u32 %v11317_v45, 16 }
 0x558   : > { %v11348_v20 = vcombine.high %v11326_v47, %v12382_v44  ;;  %v5633_v30 = vcombine.low %v5624_v57, %v5632_v55  ;;  %v5634_v19 = vcombine.high %v5624_v57, %v5632_v55  ;;  %v5769_v17 = vcombine.low %v5760_v50, %v5768_v32 }
 0x559   : > { %v5770_v56 = vcombine.high %v5760_v50, %v5768_v32  ;;  %v5850_v23 = vshrl.u32 %v11320_v42, 16  ;;  %v5862_v58 = vshrl.u32 %v11323_v2, 16  ;;  %v5874_v25 = vshrl.u32 %v11326_v47, 16 }
 0x55a   : > { %v11354_v29 = vpop.permute.xlu0 %5997  ;;  %v11356_v6 = vpop.permute.xlu1 %5999  ;;  %v5641_v52 = vrot.slane %v5633_v30, %v12287_v26  ;;  %v5648_v28 = vrot.slane %v5634_v19, %v12287_v26  ;;  %v5777_v37 = vrot.slane %v5769_v17, %v12287_v26  ;;  %v5844_v24 = vshrl.u32 %v5615_v41, 16 }
 0x55b   : > { %12549 = vst [vmem:[#allocation84_spill] sm:$0xff] %v11354_v29  ;;  %12550 = vst [vmem:[#allocation85_spill] sm:$0xff] %v11356_v6  ;;  %v5784_v7 = vrot.slane %v5770_v56, %v12287_v26  ;;  %v5868_v55 = vshrl.u32 %v5751_v13, 16  ;;  %v5856_v32 = vshrl.u32 %v11342_v61, 16  ;;  %v5880_v57 = vshrl.u32 %v11348_v20, 16 }
 0x55c   : > { %v5649_v50 = vcombine.high %v5641_v52, %v12382_v44  ;;  %v5650_v54 = vcombine.high %v5648_v28, %v12382_v44  ;;  %v5839_v18 = vshrl.u32 %v5641_v52, 16  ;;  %v5851_v62 = vshrl.u32 %v5648_v28, 16 }
 0x55d   : > { %v5785_v30 = vcombine.high %v5777_v37, %v12382_v44  ;;  %v5786_v19 = vcombine.high %v5784_v7, %v12382_v44  ;;  %v5863_v14 = vshrl.u32 %v5777_v37, 16  ;;  %v5875_v17 = vshrl.u32 %v5784_v7, 16 }
 0x55e   : > { %v6002_v36 = vpop.permute.xlu0 %6001  ;;  %v11368_v56 = vpop.permute.xlu1 %6003  ;;  %v5840_v11 = vpack.i.b16 %v5839_v18, %v5838_v8  ;;  %v5843_v21 = vpack.i.b16 %v5649_v50, %v5615_v41  ;;  %v5845_v60 = vshrl.u32 %v5649_v50, 16  ;;  %v5849_v39 = vpack.i.b16 %v5648_v28, %v11320_v42  ;;  %v12564_v50 = vld [vmem:[#allocation82_spill] sm:$0xff] }
 0x55f   : > { %v5864_v6 = vpack.i.b16 %v5863_v14, %v5862_v58  ;;  %v5867_v26 = vpack.i.b16 %v5785_v30, %v5751_v13  ;;  %v5869_v31 = vshrl.u32 %v5785_v30, 16  ;;  %v5873_v3 = vpack.i.b16 %v5784_v7, %v11326_v47 }
 0x560   : > { %v7722_v29 = vcombine.low %v5792_v9, %v5840_v11  ;;  %v11375_v44 = vcombine.low %v12551_v59, %v5843_v21  ;;  %v11377_v10 = vpack.i.b16 %v5845_v60, %v5844_v24  ;;  %v12552_v18 = vpack.i.b16 %v11234_v49, %v11213_v48 }
 0x561   : > { %v7730_v8 = vcombine.low %v5816_v40, %v5864_v6  ;;  %v12553_v13 = vpack.i.b16 %v11251_v15, %v11224_v63  ;;  %v11389_v11 = vpack.i.b16 %v5869_v31, %v5868_v55  ;;  %v12554_v59 = vpack.i.b16 %v11240_v5, %v11220_v33 }
 0x562   : > { %v11382_v41 = vcombine.low %v12552_v18, %v5849_v39  ;;  %v6006_v42 = vpop.permute.xlu0 %6005  ;;  %v6008_v14 = vpop.permute.xlu1 %6007  ;;  %5889 = vrot.lane.b32.xlu0 %v7722_v29, %s8150_s27  ;;  %v11399_v49 = vpack.i.b16 %v5851_v62, %v5850_v23  ;;  %v11401_v27 = vpack.i.b16 %v5875_v17, %v5874_v25  ;;  %v5855_v63 = vpack.i.b16 %v5650_v54, %v11342_v61 }
 0x563   : > { %v11387_v47 = vcombine.low %v12553_v13, %v5867_v26  ;;  %v11394_v43 = vcombine.low %v12554_v59, %v5873_v3  ;;  %5927 = vrot.lane.b32.xlu1 %v7730_v8, %s8150_s27  ;;  %v5879_v31 = vpack.i.b16 %v5786_v19, %v11348_v20  ;;  %v5857_v33 = vshrl.u32 %v5650_v54, 16 }
 0x564   : > { %v5881_v5 = vshrl.u32 %v5786_v19, 16  ;;  %v12555_v21 = vpack.i.b16 %v11263_v35, %v11278_v34  ;;  %v5837_v3 = vpack.i.b16 %v5641_v52, %v11317_v45  ;;  %v12556_v40 = vpack.i.b16 %v11284_v51, %v11290_v46  ;;  %v12559_v51 = vld [vmem:[#allocation92_spill] sm:$0xff]  ;;  %v12560_v46 = vld [vmem:[#allocation18_spill] sm:$0xff]  ;;  %v12565_v19 = vld [vmem:[#allocation15_spill] sm:$0xff] }
 0x565   : > { %v11423_v61 = vpack.i.b16 %v5857_v33, %v5856_v32  ;;  %v5861_v23 = vpack.i.b16 %v5777_v37, %v11323_v2  ;;  %v12557_v35 = vpack.i.b16 %v11231_v1, %v11199_v22  ;;  %v12561_v25 = vpack.i.b16 %v12559_v51, %v12560_v46  ;;  %v12563_v1 = vld [vmem:[#allocation84_spill] sm:$0xff] }
 0x566   : > { %v11415_v62 = vcombine.low %v12555_v21, %v5855_v63  ;;  %v6010_v39 = vpop.permute.xlu0 %6009  ;;  %v6012_v9 = vpop.permute.xlu1 %6011  ;;  %v11421_v54 = vcombine.low %v12556_v40, %v5879_v31  ;;  %v11425_v20 = vpack.i.b16 %v5881_v5, %v5880_v57  ;;  %v12566_v5 = vld [vmem:[#allocation16_spill] sm:$0xff]  ;;  %v12569_v26 = vmov 0  }
 0x567   : > { %v11431_v34 = vcombine.low %v12557_v35, %v5837_v3  ;;  %v11440_v29 = vcombine.low %v12561_v25, %v5861_v23  ;;  %v6089_v30 = vcombine.low %v12564_v50, %v6010_v39  ;;  %v12567_v25 = vld [vmem:[#allocation85_spill] sm:$0xff] }
 0x569   : > { %12558 = vst [vmem:[#allocation27_spill] sm:$0xff] %v11431_v34  ;;  %12562 = vst [vmem:[#allocation24_spill] sm:$0xff] %v11440_v29 }
 0x56a   : > { %v6014_v6 = vpop.permute.xlu0 %6013  ;;  %v6016_v52 = vpop.permute.xlu1 %6015 }
 0x56b   : > { %v6123_v24 = vcombine.low %v12563_v1, %v6014_v6  ;;  %v6259_v6 = vcombine.low %v12567_v25, %v6016_v52 }
 0x56d   : > { %v11448_v18 = vrot.slane %v6123_v24, %v12565_v19  ;;  %v11475_v50 = vrot.slane %v6259_v6, %v12565_v19 }
 0x56e   : > { %v6018_v28 = vpop.permute.xlu0 %6017  ;;  %v6020_v2 = vpop.permute.xlu1 %6019 }
 0x56f   : > { %v6097_v55 = vcombine.low %v6002_v36, %v6018_v28  ;;  %v6233_v28 = vcombine.low %v11368_v56, %v6020_v2 }
 0x571   : > { %v11451_v8 = vrot.slane %v6097_v55, %v12565_v19 }
 0x572   : > { %v6022_v37 = vpop.permute.xlu0 %6021  ;;  %v6024_v7 = vpop.permute.xlu1 %6023 }
 0x573   : > { %v6131_v22 = vcombine.low %v6006_v42, %v6022_v37  ;;  %v11454_v42 = vrot.slane %v6089_v30, %v12565_v19  ;;  %v6267_v35 = vcombine.low %v6008_v14, %v6024_v7  ;;  %v12568_v37 = vld [vmem:[#allocation98_spill] sm:$0xff]  ;;  %v11478_v30 = vrot.slane %v6233_v28, %v12565_v19 }
 0x575   : > { %v11445_v17 = vrot.slane %v6131_v22, %v12565_v19  ;;  %v6105_v63 = vcombine.low %v11454_v42, %v11451_v8  ;;  %v6225_v22 = vcombine.low %v12568_v37, %v6012_v9  ;;  %v11472_v1 = vrot.slane %v6267_v35, %v12565_v19 }
 0x576   : > { %v6026_v32 = vpop.permute.xlu0 %6025  ;;  %v6028_v57 = vpop.permute.xlu1 %6027 }
 0x577   : > { %v6139_v36 = vcombine.low %v11448_v18, %v11445_v17  ;;  %v11464_v3 = vrot.slane %v6105_v63, %v12566_v5  ;;  %v11481_v14 = vrot.slane %v6225_v22, %v12565_v19  ;;  %v6275_v52 = vcombine.low %v11475_v50, %v11472_v1 }
 0x579   : > { %v11461_v21 = vrot.slane %v6139_v36, %v12566_v5  ;;  %v6241_v63 = vcombine.low %v11481_v14, %v11478_v30  ;;  %v6283_v6 = vrot.slane %v6275_v52, %v12566_v5 }
 0x57a   : > { %v6030_v13 = vpop.permute.xlu0 %6029  ;;  %v6032_v59 = vpop.permute.xlu1 %6031 }
 0x57b   : > { %v6291_v34 = vcombine.high %v6283_v6, %v12569_v26 }
 0x57e   : > { %v6034_v31 = vpop.permute.xlu0 %6033  ;;  %v6036_v33 = vpop.permute.xlu1 %6035 }
 0x582   : > { %v6038_v39 = vpop.permute.xlu0 %6037  ;;  %v6040_v40 = vpop.permute.xlu1 %6039 }
 0x586   : > { %v6042_v51 = vpop.permute.xlu0 %6041  ;;  %v6044_v46 = vpop.permute.xlu1 %6043 }
 0x587   : > { %v6157_v9 = vcombine.low %v6026_v32, %v6042_v51  ;;  %v6293_v35 = vcombine.low %v6028_v57, %v6044_v46 }
 0x589   : > { %v11495_v58 = vrot.slane %v6157_v9, %v12565_v19  ;;  %v11499_v51 = vrot.slane %v6293_v35, %v12565_v19 }
 0x58a   : > { %v6046_v24 = vpop.permute.xlu0 %6045  ;;  %v6048_v55 = vpop.permute.xlu1 %6047 }
 0x58b   : > { %v6191_v32 = vcombine.low %v6030_v13, %v6046_v24 }
 0x58e   : > { %v6050_v56 = vpop.permute.xlu0 %6049  ;;  %v6052_v2 = vpop.permute.xlu1 %6051 }
 0x58f   : > { %v6165_v7 = vcombine.low %v6034_v31, %v6050_v56  ;;  %v6301_v36 = vcombine.low %v6036_v33, %v6052_v2  ;;  %v6327_v31 = vcombine.low %v6032_v59, %v6048_v55  ;;  %v6249_v33 = vrot.slane %v6241_v63, %v12566_v5 }
 0x590   : > { %v11512_v59 = vrot.slane %v6191_v32, %v12565_v19 }
 0x591   : > { %v11488_v25 = vrot.slane %v6165_v7, %v12565_v19  ;;  %v11492_v28 = vrot.slane %v6301_v36, %v12565_v19  ;;  %v6387_v13 = vpack.i.b16 %v6283_v6, %v6249_v33  ;;  %v11515_v24 = vrot.slane %v6327_v31, %v12565_v19 }
 0x592   : > { %v6054_v37 = vpop.permute.xlu0 %6053  ;;  %v6056_v22 = vpop.permute.xlu1 %6055  ;;  %v6365_v36 = vshrl.u32 %v11461_v21, 16  ;;  %v6388_v31 = vshrl.u32 %v6249_v33, 16 }
 0x593   : > { %v6199_v57 = vcombine.low %v6038_v39, %v6054_v37  ;;  %v6335_v46 = vcombine.low %v6040_v40, %v6056_v22  ;;  %v6173_v52 = vcombine.low %v11495_v58, %v11488_v25  ;;  %v6309_v56 = vcombine.low %v11499_v51, %v11492_v28 }
 0x594   : > { %v6389_v37 = vshrl.u32 %v6283_v6, 16 }
 0x595   : > { %v11506_v2 = vrot.slane %v6199_v57, %v12565_v19  ;;  %v11509_v9 = vrot.slane %v6335_v46, %v12565_v19  ;;  %v6181_v39 = vrot.slane %v6173_v52, %v12566_v5  ;;  %v6317_v7 = vrot.slane %v6309_v56, %v12566_v5 }
 0x596   : > { %v6364_v19 = vshrl.u32 %v11464_v3, 16  ;;  %v6390_v60 = vpack.i.b16 %v6389_v37, %v6388_v31  ;;  %v6121_v37 = vcombine.high %v11464_v3, %v12569_v26 }
 0x597   : > { %v6207_v40 = vcombine.low %v11512_v59, %v11506_v2  ;;  %v6343_v55 = vcombine.low %v11515_v24, %v11509_v9  ;;  %v6412_v22 = vshrl.u32 %v6181_v39, 16  ;;  %v6436_v57 = vshrl.u32 %v6317_v7, 16 }
 0x598   : > { %v6366_v52 = vpack.i.b16 %v6365_v36, %v6364_v19  ;;  %v6189_v29 = vcombine.high %v6181_v39, %v12569_v26  ;;  %v6325_v36 = vcombine.high %v6317_v7, %v12569_v26 }
 0x599   : > { %v6215_v63 = vrot.slane %v6207_v40, %v12566_v5  ;;  %v6351_v35 = vrot.slane %v6343_v55, %v12566_v5  ;;  %v6155_v55 = vcombine.high %v11461_v21, %v12569_v26 }
 0x59b   : > { %v6413_v32 = vshrl.u32 %v6215_v63, 16  ;;  %v6437_v46 = vshrl.u32 %v6351_v35, 16  ;;  %v6223_v56 = vcombine.high %v6215_v63, %v12569_v26  ;;  %v6359_v23 = vcombine.high %v6351_v35, %v12569_v26 }
 0x59c   : > { %v6411_v19 = vpack.i.b16 %v6215_v63, %v6181_v39 }
 0x59d   : > { %v6414_v45 = vpack.i.b16 %v6413_v32, %v6412_v22  ;;  %v6438_v15 = vpack.i.b16 %v6437_v46, %v6436_v57  ;;  %v6435_v22 = vpack.i.b16 %v6351_v35, %v6317_v7  ;;  %v6369_v32 = vpack.i.b16 %v6155_v55, %v6121_v37 }
 0x59e   : > { %v6419_v63 = vshrl.u32 %v6223_v56, 16  ;;  %v6443_v46 = vshrl.u32 %v6359_v23, 16  ;;  %v6371_v7 = vshrl.u32 %v6155_v55, 16  ;;  %v6395_v35 = vshrl.u32 %v6291_v34, 16 }
 0x59f   : > { %v7738_v48 = vcombine.low %v6366_v52, %v6414_v45  ;;  %v7746_v40 = vcombine.low %v6390_v60, %v6438_v15  ;;  %v6417_v45 = vpack.i.b16 %v6223_v56, %v6189_v29  ;;  %v6257_v15 = vcombine.high %v6249_v33, %v12569_v26 }
 0x5a0   : > { %v6441_v60 = vpack.i.b16 %v6359_v23, %v6325_v36  ;;  %v11548_v57 = vcombine.low %v6387_v13, %v6435_v22  ;;  %v6370_v52 = vshrl.u32 %v6121_v37, 16  ;;  %v6344_v13 = vcombine.high %v11515_v24, %v11509_v9 }
 0x5a1   : > { %6463 = vrot.lane.b32.xlu0 %v7738_v48, %s8150_s27  ;;  %6501 = vrot.lane.b32.xlu1 %v7746_v40, %s8150_s27  ;;  %v12570_v48 = vpack.i.b16 %v11461_v21, %v11464_v3  ;;  %v6393_v31 = vpack.i.b16 %v6291_v34, %v6257_v15  ;;  %v7739_v39 = vcombine.low %v6369_v32, %v6417_v45  ;;  %v6442_v21 = vshrl.u32 %v6325_v36, 16 }
 0x5a2   : > { %v6208_v3 = vcombine.high %v11512_v59, %v11506_v2  ;;  %v6394_v40 = vshrl.u32 %v6257_v15, 16  ;;  %v6140_v23 = vcombine.high %v11448_v18, %v11445_v17  ;;  %v12571_v34 = vcombine.low %v11270_v4, %v11377_v10 }
 0x5a3   : > { %v11544_v6 = vcombine.low %v12570_v48, %v6411_v19  ;;  %v7747_v33 = vcombine.low %v6393_v31, %v6441_v60  ;;  %v6444_v56 = vpack.i.b16 %v6443_v46, %v6442_v21  ;;  %v6372_v55 = vpack.i.b16 %v6371_v7, %v6370_v52 }
 0x5a4   : > { %v6276_v2 = vcombine.high %v11475_v50, %v11472_v1  ;;  %v6310_v9 = vcombine.high %v11499_v51, %v11492_v28  ;;  %v12572_v59 = vcombine.low %v11280_v38, %v11389_v11  ;;  %v6396_v17 = vpack.i.b16 %v6395_v35, %v6394_v40 }
 0x5a5   : > { %5894 = vrot.lane.b32.xlu0 %v11375_v44, %s8149_s7  ;;  %5932 = vrot.lane.b32.xlu1 %v11387_v47, %s8149_s7  ;;  %v6418_v44 = vshrl.u32 %v6189_v29, 16  ;;  %v6174_v29 = vcombine.high %v11495_v58, %v11488_v25  ;;  %v6106_v58 = vcombine.high %v11454_v42, %v11451_v8  ;;  %v6222_v18 = vrot.slane %v6208_v3, %v12566_v5 }
 0x5a6   : > { %v6242_v4 = vcombine.high %v11481_v14, %v11478_v30  ;;  %v6358_v1 = vrot.slane %v6344_v13, %v12566_v5  ;;  %v7748_v50 = vcombine.low %v6396_v17, %v6444_v56  ;;  %v6154_v25 = vrot.slane %v6140_v23, %v12566_v5 }
 0x5a7   : > { %v6420_v47 = vpack.i.b16 %v6419_v63, %v6418_v44  ;;  %v6188_v28 = vrot.slane %v6174_v29, %v12566_v5  ;;  %v6290_v38 = vrot.slane %v6276_v2, %v12566_v5  ;;  %v6324_v11 = vrot.slane %v6310_v9, %v12566_v5 }
 0x5a8   : > { %v6120_v8 = vrot.slane %v6106_v58, %v12566_v5  ;;  %v6256_v30 = vrot.slane %v6242_v4, %v12566_v5  ;;  %v6425_v36 = vshrl.u32 %v6222_v18, 16  ;;  %v6449_v45 = vshrl.u32 %v6358_v1, 16 }
 0x5a9   : > { %6468 = vrot.lane.b32.xlu0 %v7739_v39, %s8149_s7  ;;  %6506 = vrot.lane.b32.xlu1 %v7747_v33, %s8149_s7  ;;  %v7740_v10 = vcombine.low %v6372_v55, %v6420_v47  ;;  %v6423_v42 = vpack.i.b16 %v6222_v18, %v6188_v28  ;;  %v6447_v14 = vpack.i.b16 %v6358_v1, %v6324_v11  ;;  %v6377_v15 = vshrl.u32 %v6154_v25, 16 }
 0x5aa   : > { %v6375_v51 = vpack.i.b16 %v6154_v25, %v6120_v8  ;;  %v6399_v24 = vpack.i.b16 %v6290_v38, %v6256_v30  ;;  %v6424_v60 = vshrl.u32 %v6188_v28, 16  ;;  %v6401_v22 = vshrl.u32 %v6290_v38, 16 }
 0x5ab   : > { %v6448_v32 = vshrl.u32 %v6324_v11, 16  ;;  %v6376_v5 = vshrl.u32 %v6120_v8, 16  ;;  %v12574_v63 = vcombine.low %v11274_v16, %v11401_v27  ;;  %v6224_v46 = vcombine.high %v6222_v18, %v12569_v26 }
 0x5ac   : > { %v7741_v37 = vcombine.low %v6375_v51, %v6423_v42  ;;  %v7749_v19 = vcombine.low %v6399_v24, %v6447_v14  ;;  %v6426_v48 = vpack.i.b16 %v6425_v36, %v6424_v60  ;;  %v6360_v44 = vcombine.high %v6358_v1, %v12569_v26 }
 0x5ad   : > { %5899 = vrot.lane.b32.xlu0 %v12571_v34, %s8153_s30  ;;  %5937 = vrot.lane.b32.xlu1 %v12572_v59, %s8153_s30  ;;  %v6450_v31 = vpack.i.b16 %v6449_v45, %v6448_v32  ;;  %v6378_v39 = vpack.i.b16 %v6377_v15, %v6376_v5  ;;  %v6156_v21 = vcombine.high %v6154_v25, %v12569_v26  ;;  %v6431_v23 = vshrl.u32 %v6224_v46, 16  ;;  %v12577_v5 = vld [vmem:[#allocation27_spill] sm:$0xff] }
 0x5ae   : > { %v6190_v3 = vcombine.high %v6188_v28, %v12569_v26  ;;  %v6122_v16 = vcombine.high %v6120_v8, %v12569_v26  ;;  %v6258_v52 = vcombine.high %v6256_v30, %v12569_v26  ;;  %v6455_v34 = vshrl.u32 %v6360_v44, 16 }
 0x5af   : > { %v7742_v7 = vcombine.low %v6378_v39, %v6426_v48  ;;  %v6383_v55 = vshrl.u32 %v6156_v21, 16 }
 0x5b0   : > { %v6429_v27 = vpack.i.b16 %v6224_v46, %v6190_v3  ;;  %v6381_v13 = vpack.i.b16 %v6156_v21, %v6122_v16  ;;  %v6430_v2 = vshrl.u32 %v6190_v3, 16  ;;  %v6382_v59 = vshrl.u32 %v6122_v16, 16 }
 0x5b1   : > { %6473 = vrot.lane.b32.xlu0 %v7740_v10, %s8153_s30  ;;  %6511 = vrot.lane.b32.xlu1 %v7748_v50, %s8153_s30  ;;  %v12576_v10 = vcombine.low %v11307_v53, %v11425_v20 }
 0x5b2   : > { %v7743_v56 = vcombine.low %v6381_v13, %v6429_v27  ;;  %v6432_v17 = vpack.i.b16 %v6431_v23, %v6430_v2  ;;  %v6384_v18 = vpack.i.b16 %v6383_v55, %v6382_v59 }
 0x5b4   : > { %v7744_v1 = vcombine.low %v6384_v18, %v6432_v17 }
 0x5b5   : > { %5904 = vrot.lane.b32.xlu0 %v11382_v41, %s8148_s29  ;;  %5942 = vrot.lane.b32.xlu1 %v11394_v43, %s8148_s29  ;;  %v6400_v41 = vshrl.u32 %v6256_v30, 16  ;;  %v12573_v43 = vcombine.low %v11272_v0, %v11399_v49  ;;  %v6292_v0 = vcombine.high %v6290_v38, %v12569_v26  ;;  %v6326_v49 = vcombine.high %v6324_v11, %v12569_v26 }
 0x5b7   : > { %v6402_v33 = vpack.i.b16 %v6401_v22, %v6400_v41  ;;  %v6453_v47 = vpack.i.b16 %v6360_v44, %v6326_v49  ;;  %v6405_v40 = vpack.i.b16 %v6292_v0, %v6258_v52  ;;  %v6407_v26 = vshrl.u32 %v6292_v0, 16  ;;  %v12578_v41 = vld [vmem:[#allocation24_spill] sm:$0xff] }
 0x5b8   : > { %v6454_v9 = vshrl.u32 %v6326_v49, 16 }
 0x5b9   : > { %6478 = vrot.lane.b32.xlu0 %v7741_v37, %s8148_s29  ;;  %6516 = vrot.lane.b32.xlu1 %v7749_v19, %s8148_s29  ;;  %v7750_v35 = vcombine.low %v6402_v33, %v6450_v31  ;;  %v7751_v29 = vcombine.low %v6405_v40, %v6453_v47 }
 0x5ba   : > { %v6456_v58 = vpack.i.b16 %v6455_v34, %v6454_v9 }
 0x5bd   : > { %5909 = vrot.lane.b32.xlu0 %v12573_v43, %s8152_s6  ;;  %5947 = vrot.lane.b32.xlu1 %v12574_v63, %s8152_s6 }
 0x5c1   : > { %6483 = vrot.lane.b32.xlu0 %v7742_v7, %s8152_s6  ;;  %6521 = vrot.lane.b32.xlu1 %v7750_v35, %s8152_s6 }
 0x5c5   : > { %5914 = vrot.lane.b32.xlu0 %v11415_v62, %s8151_s10  ;;  %5952 = vrot.lane.b32.xlu1 %v11421_v54, %s8151_s10  ;;  %v6406_v62 = vshrl.u32 %v6258_v52, 16  ;;  %v12575_v54 = vcombine.low %v11298_v12, %v11423_v61 }
 0x5c7   : > { %v6408_v4 = vpack.i.b16 %v6407_v26, %v6406_v62 }
 0x5c9   : > { %6488 = vrot.lane.b32.xlu0 %v7743_v56, %s8151_s10  ;;  %6526 = vrot.lane.b32.xlu1 %v7751_v29, %s8151_s10  ;;  %v7752_v50 = vcombine.low %v6408_v4, %v6456_v58 }
 0x5cd   : > { %5919 = vrot.lane.b32.xlu0 %v12575_v54, %s8154_s18  ;;  %5957 = vrot.lane.b32.xlu1 %v12576_v10, %s8154_s18 }
 0x5d1   : > { %6493 = vrot.lane.b32.xlu0 %v7744_v1, %s8154_s18  ;;  %6531 = vrot.lane.b32.xlu1 %v7752_v50, %s8154_s18 }
 0x5d4   : > { %v5890_v25 = vpop.permute.xlu0 %5889 }
 0x5d5   : > { %v5928_v28 = vpop.permute.xlu1 %5927  ;;  %v5961_v48 = vsel %vm1512_vm0, %v12577_v5, %v5890_v25 }
 0x5d6   : > { %v5977_v31 = vsel %vm1512_vm0, %v12578_v41, %v5928_v28 }
 0x613   : > { %v6464_v38 = vpop.permute.xlu0 %6463  ;;  %v6502_v11 = vpop.permute.xlu1 %6501 }
 0x614   : > { %v6535_v35 = vsel %vm1512_vm0, %v11544_v6, %v6464_v38  ;;  %v6551_v0 = vsel %vm1512_vm0, %v11548_v57, %v6502_v11 }
 0x617   : > { %v5895_v8 = vpop.permute.xlu0 %5894  ;;  %v5933_v12 = vpop.permute.xlu1 %5932 }
 0x618   : > { %v5963_v43 = vsel %vm1516_vm2, %v5961_v48, %v5895_v8  ;;  %v5979_v63 = vsel %vm1516_vm2, %v5977_v31, %v5933_v12 }
 0x61b   : > { %v6469_v61 = vpop.permute.xlu0 %6468  ;;  %v6507_v42 = vpop.permute.xlu1 %6506 }
 0x61c   : > { %v6537_v49 = vsel %vm1516_vm2, %v6535_v35, %v6469_v61  ;;  %v6553_v47 = vsel %vm1516_vm2, %v6551_v0, %v6507_v42 }
 0x61f   : > { %v5900_v30 = vpop.permute.xlu0 %5899  ;;  %v5938_v14 = vpop.permute.xlu1 %5937 }
 0x620   : > { %v5965_v33 = vsel %vm1519_vm1, %v5963_v43, %v5900_v30  ;;  %v5981_v7 = vsel %vm1519_vm1, %v5979_v63, %v5938_v14 }
 0x623   : > { %v6474_v51 = vpop.permute.xlu0 %6473  ;;  %v6512_v53 = vpop.permute.xlu1 %6511 }
 0x624   : > { %v6539_v13 = vsel %vm1519_vm1, %v6537_v49, %v6474_v51  ;;  %v6555_v23 = vsel %vm1519_vm1, %v6553_v47, %v6512_v53 }
 0x627   : > { %v5905_v20 = vpop.permute.xlu0 %5904  ;;  %v5943_v24 = vpop.permute.xlu1 %5942 }
 0x628   : > { %v5967_v44 = vsel %vm1522_vm3, %v5965_v33, %v5905_v20  ;;  %v5983_v21 = vsel %vm1522_vm3, %v5981_v7, %v5943_v24 }
 0x62b   : > { %v6479_v36 = vpop.permute.xlu0 %6478  ;;  %v6517_v37 = vpop.permute.xlu1 %6516 }
 0x62c   : > { %v6541_v57 = vsel %vm1522_vm3, %v6539_v13, %v6479_v36  ;;  %v6557_v34 = vsel %vm1522_vm3, %v6555_v23, %v6517_v37 }
 0x62f   : > { %v5910_v45 = vpop.permute.xlu0 %5909  ;;  %v5948_v19 = vpop.permute.xlu1 %5947 }
 0x630   : > { %v5969_v3 = vsel %vm1525_vm4, %v5967_v44, %v5910_v45  ;;  %v5985_v16 = vsel %vm1525_vm4, %v5983_v21, %v5948_v19 }
 0x633   : > { %v6484_v15 = vpop.permute.xlu0 %6483  ;;  %v6522_v60 = vpop.permute.xlu1 %6521 }
 0x634   : > { %v6543_v55 = vsel %vm1525_vm4, %v6541_v57, %v6484_v15  ;;  %v6559_v2 = vsel %vm1525_vm4, %v6557_v34, %v6522_v60 }
 0x637   : > { %v5915_v22 = vpop.permute.xlu0 %5914  ;;  %v5953_v32 = vpop.permute.xlu1 %5952 }
 0x638   : > { %v5971_v27 = vsel %vm1528_vm5, %v5969_v3, %v5915_v22  ;;  %v5987_v6 = vsel %vm1528_vm5, %v5985_v16, %v5953_v32 }
 0x63b   : > { %v6489_v39 = vpop.permute.xlu0 %6488  ;;  %v6527_v46 = vpop.permute.xlu1 %6526 }
 0x63c   : > { %v6545_v26 = vsel %vm1528_vm5, %v6543_v55, %v6489_v39  ;;  %v6561_v59 = vsel %vm1528_vm5, %v6559_v2, %v6527_v46 }
 0x63f   : > { %v5920_v52 = vpop.permute.xlu0 %5919  ;;  %v5958_v56 = vpop.permute.xlu1 %5957 }
 0x640   : > { %v5973_v40 = vsel %vm1531_vm6, %v5971_v27, %v5920_v52  ;;  %v5989_v29 = vsel %vm1531_vm6, %v5987_v6, %v5958_v56 }
 0x641   : > { %5991 = vst [vmem:[#allocation3 + $0x70] sm:$0xff] %v5973_v40  ;;  %5992 = vst [vmem:[#allocation3 + $0x78] sm:$0xff] %v5989_v29 }
 0x643   : > { %v6494_v9 = vpop.permute.xlu0 %6493  ;;  %v6532_v62 = vpop.permute.xlu1 %6531 }
 0x644   : > { %v6547_v17 = vsel %vm1531_vm6, %v6545_v26, %v6494_v9  ;;  %v6563_v58 = vsel %vm1531_vm6, %v6561_v59, %v6532_v62 }
 0x645   : > { %6565 = vst [vmem:[#allocation3 + $0x80] sm:$0xff] %v6547_v17  ;;  %6566 = vst [vmem:[#allocation3 + $0x88] sm:$0xff] %v6563_v58 }
 0x646 PF: > { %v6570_v54 = vld [vmem:[#allocation3 + $0x8] sm:$0xff]  ;;  %v6569_v18 = vld [vmem:[#allocation3] sm:$0xff]  ;;  %v6572_v10 = vld [vmem:[#allocation3 + $0x18] sm:$0xff]  ;;  %vm6596_vm7 = vcmask 130048   ;;  %v8156_v22 = vmov 0   ;;  %v6654_v32 = vlaneseq  ;;  %vm6821_vm8 = vcmask 1041409  }
 0x647   : > { %6600 = vmatprep.subr.bf16.mxu0 %v6570_v54  ;;  %v6571_v4 = vld [vmem:[#allocation3 + $0x10] sm:$0xff]  ;;  %v6574_v1 = vld [vmem:[#allocation3 + $0x28] sm:$0xff]  ;;  %v6573_v50 = vld [vmem:[#allocation3 + $0x20] sm:$0xff]  ;;  %7962 = vset.pattern.permute.xlu0 %v8156_v22  ;;  %v8157_v5 = vmov 1414812756   ;;  %vm6823_vm9 = vcmask 1042434  }
 0x648   : > { %6601 = vmatpush1.bf16.msra.mxu0 %v6569_v18  ;;  %v7965_v25 = vld [vmem:[%s8350_s5 + $0x4] ss:$8 sps:$4 sm:$0xff]   ;;  %v6576_v28 = vld [vmem:[#allocation3 + $0x38] sm:$0xff]  ;;  %v6575_v38 = vld [vmem:[#allocation3 + $0x30] sm:$0xff]  ;;  %7961 = vset.pattern.permute.xlu1 %v8156_v22  ;;  %v6666_v48 = vunpack.c.l.s4 %v8157_v5  ;;  %v8158_v41 = vmov 269488144  }
 0x649   : > { %6602 = vmatprep.subr.bf16.mxu0 %v6572_v10  ;;  %7755 = vmatprep.mubr.msk.bf16.mxu0 %vm6596_vm7, %v7965_v25  ;;  %v6578_v11 = vld [vmem:[#allocation3 + $0x48] sm:$0xff]  ;;  %v6577_v8 = vld [vmem:[#allocation3 + $0x40] sm:$0xff]  ;;  %v6580_v12 = vld [vmem:[#allocation3 + $0x58] sm:$0xff]  ;;  %v6652_v31 = vunpack.c.l.s4 %v8158_v41  ;;  %v8159_v43 = vmov 842150450   ;;  %v11672_v46 = vshrl.u32 %v6654_v32, 7 }
 0x64a   : > { %v6579_v61 = vld [vmem:[#allocation3 + $0x50] sm:$0xff]  ;;  %v6582_v42 = vld [vmem:[#allocation3 + $0x68] sm:$0xff]  ;;  %v6581_v30 = vld [vmem:[#allocation3 + $0x60] sm:$0xff]  ;;  %v6659_v39 = vunpack.c.l.s4 %v8159_v43  ;;  %v8160_v63 = vmov 1983009808   ;;  %v6667_v7 = vunpack.c.0.s8 %v6666_v48  ;;  %v6788_v25 = vand.u32 127, %v6654_v32 }
 0x64b   : > { %v6584_v14 = vld [vmem:[#allocation3 + $0x78] sm:$0xff]  ;;  %v6583_v51 = vld [vmem:[#allocation3 + $0x70] sm:$0xff]  ;;  %v7963_v24 = vld [vmem:[%s8350_s5] ss:$8 sps:$4 sm:$0xff]   ;;  %v6708_v33 = vunpack.c.l.s4 %v8160_v63  ;;  %v6653_v44 = vunpack.c.0.s8 %v6652_v31  ;;  %v8161_v21 = vmov 1987475062  }
 0x64c   : > { %6603 = vmatpush1.bf16.msra.mxu0 %v6571_v4  ;;  %v6586_v53 = vld [vmem:[#allocation3 + $0x88] sm:$0xff]  ;;  %v6585_v20 = vld [vmem:[#allocation3 + $0x80] sm:$0xff]  ;;  %v6660_v35 = vunpack.c.0.s8 %v6659_v39  ;;  %v6673_v3 = vunpack.c.l.s4 %v8161_v21  ;;  %v11675_v49 = vsub.s32 %v6667_v7, %v11672_v46  ;;  %vm6825_vm10 = vcmask 1043459   ;;  %s7763_s5 = sshll.u32 %s8126_s22, 3  ;;  %s7420_s9 = sshll.u32 %s8362_s23, 4  ;;  %s11854_s9 = int_to_ptr.vmem [resolvable:$true] %s7420_s9 }
 0x64d   : > { %6604 = vmatprep.subr.bf16.mxu0 %v6574_v1  ;;  %v6709_v0 = vunpack.c.0.s8 %v6708_v33  ;;  %v11678_v16 = vsub.s32 %v6653_v44, %v11672_v46  ;;  %vm6827_vm11 = vcmask 1044484   ;;  %vm6829_vm12 = vcmask 1045509   ;;  %s11860_s22 = scalar_lea.sflag [#allocation6], %s277_s28  ;;  %s8016_s27 = scalar_lea.vmem %s11854_s9, 512 }
 0x64e   : > { %v11681_v27 = vsub.s32 %v6660_v35, %v11672_v46  ;;  %v6674_v52 = vunpack.c.0.s8 %v6673_v3  ;;  %vm6831_vm13 = vcmask 1046534   ;;  %vm6833_vm14 = vcmask 1047559   ;;  %p8017_p2 = scmp.ne.s32.totalorder %s11854_s9, %s8016_s27  ;;  %p12579_p4 = scmp.ne.s32.totalorder %s12179_s11, 0 }
 0x64f   : > { %v11684_v47 = vsub.s32 %v6709_v0, %v11672_v46  ;;  %vm6836_vm15 = vcmask 15360   ;;  %v6860_v39 = vsub.s32 4, %v11672_v46  ;;  %v6864_v63 = vsub.s32 5, %v11672_v46  ;;  %s8162_s10 = smov [#allocation7]  }
 0x650   : > { %6605 = vmatpush1.bf16.msra.mxu0 %v6573_v50  ;;  %v11689_v56 = vsub.s32 %v6674_v52, %v11672_v46  ;;  %v6868_v33 = vsub.s32 6, %v11672_v46  ;;  %v6872_v7 = vsub.s32 7, %v11672_v46  ;;  %v6844_v35 = vsub.s32 0, %v11672_v46  ;;  %p8018_p0 = pnand %p8017_p2, %p12579_p4  ;;  %s8020_s6 = sshll.u32 %s8162_s10, 4  ;;  %s8021_s6 = int_to_ptr.vmem [resolvable:$false] %s8020_s6 }
 0x651   : > { %6606 = vmatprep.subr.bf16.mxu0 %v6576_v28  ;;  %v6848_v21 = vsub.s32 1, %v11672_v46  ;;  %v6852_v3 = vsub.s32 2, %v11672_v46  ;;  %v6856_v0 = vsub.s32 3, %v11672_v46  ;;  %s8022_s30 = scalar_lea.vmem %s8021_s6, 1024  ;;  %p8023_p6 = scmp.lt.s32.totalorder %s11854_s9, %s8021_s6 }
 0x652   : > { %p8019_p1 = pneg %p8018_p0  ;;  %p8024_p9 = scmp.lt.s32.totalorder %s8022_s30, %s8016_s27 }
 0x654   : > { %6607 = vmatpush1.bf16.msra.mxu0 %v6575_v38  ;;  %v11706_v38 = vsub.s32 %v6788_v25, %v11672_v46  ;;  %p8025_p3 = por %p8024_p9, %p8023_p6 }
 0x655   : > { %6608 = vmatprep.subr.bf16.mxu0 %v6578_v11 }
 0x656   : > { %p8026_p11 = pnand %p8025_p3, %p8019_p1 }
 0x658   : > { %6609 = vmatpush1.bf16.msra.mxu0 %v6577_v8 }
 0x659   : > { %6610 = vmatprep.subr.bf16.mxu0 %v6580_v12 }
 0x65c   : > { %6611 = vmatpush1.bf16.msra.mxu0 %v6579_v61 }
 0x65d   : > { %6612 = vmatprep.subr.bf16.mxu0 %v6582_v42 }
 0x660   : > { %6613 = vmatpush1.bf16.msra.mxu0 %v6581_v30 }
 0x661   : > { %6614 = vmatprep.subr.bf16.mxu0 %v6584_v14 }
 0x664   : > { %6615 = vmatpush1.bf16.msra.mxu0 %v6583_v51 }
 0x665   : > { %6616 = vmatprep.subr.bf16.mxu0 %v6586_v53 }
 0x668   : > { %6617 = vmatpush1.bf16.msra.mxu0 %v6585_v20 }
 0x66b   : > { %6633 = vmatmul.mubr.bf16.vlgmr.msra.gmra.mrb[0].mxu0 %v7963_v24 }
 0x73e   : > { %v11660_v36 = vpop.f32.mrb[0].mxu0 }
 0x73f   : > { %v11662_v37 = vpop.f32.mrb[1].mxu0 }
 0x740   : > { %v11664_v45 = vpop.f32.mrb[2].mxu0  ;;  %v6643_v19 = vadd.f32 %v11662_v37, %v11660_v36 }
 0x741   : > { %v11668_v15 = vpop.f32.mrb[3].mxu0 }
 0x742   : > { %v6646_v60 = vadd.f32 %v11668_v15, %v11664_v45  ;;  %6644 = vadd.xlane.f32.xlu0 %v6643_v19 }
 0x746   : > { %6647 = vadd.xlane.f32.xlu0 %v6646_v60 }
 0x7cf   : > { %v6645_v13 = vpop.xlane.xlu0 %6644 }
 0x7d0   : > { %v6671_v6 = vrot.slane %v6645_v13, %v11675_v49  ;;  %v6657_v40 = vrot.slane %v6645_v13, %v11678_v16  ;;  %v6664_v23 = vrot.slane %v6645_v13, %v11681_v27  ;;  %v6678_v34 = vrot.slane %v6645_v13, %v11689_v56 }
 0x7d2   : > { %v6713_v57 = vrot.slane %v6657_v40, %v11684_v47  ;;  %v6727_v29 = vrot.slane %v6671_v6, %v11684_v47  ;;  %v6720_v55 = vrot.slane %v6664_v23, %v11684_v47  ;;  %v6734_v9 = vrot.slane %v6678_v34, %v11684_v47 }
 0x7d3   : > { %v6648_v2 = vpop.xlane.xlu0 %6647 }
 0x7d4   : > { %6764 = vperm.xlu1 %7961, %v6713_v57   ;;  %6770 = vperm.xlu0 %7962, %v6727_v29   ;;  %v6685_v26 = vrot.slane %v6648_v2, %v11678_v16  ;;  %v6692_v59 = vrot.slane %v6648_v2, %v11681_v27  ;;  %v6699_v62 = vrot.slane %v6648_v2, %v11675_v49 }
 0x7d5   : > { %v6706_v54 = vrot.slane %v6648_v2, %v11689_v56 }
 0x7d6   : > { %v6741_v17 = vrot.slane %v6685_v26, %v11684_v47  ;;  %v6748_v58 = vrot.slane %v6692_v59, %v11684_v47  ;;  %v6755_v18 = vrot.slane %v6699_v62, %v11684_v47 }
 0x7d7   : > { %v6762_v10 = vrot.slane %v6706_v54, %v11684_v47 }
 0x7d8   : > { %6767 = vperm.xlu1 %7961, %v6720_v55  }
 0x7dc   : > { %6773 = vperm.xlu1 %7961, %v6734_v9  }
 0x7e0   : > { %6776 = vperm.xlu1 %7961, %v6741_v17  }
 0x7e4   : > { %6779 = vperm.xlu1 %7961, %v6748_v58  }
 0x7e8   : > { %6782 = vperm.xlu1 %7961, %v6755_v18  }
 0x7ec   : > { %6785 = vperm.xlu1 %7961, %v6762_v10  }
 0x853   : > { %v6765_v4 = vpop.permute.xlu1 %6764  ;;  %v6771_v61 = vpop.permute.xlu0 %6770 }
 0x854   : > { %v6792_v12 = vrot.slane %v6765_v4, %v11706_v38  ;;  %v6800_v14 = vrot.slane %v6771_v61, %v11706_v38 }
 0x857   : > { %v6768_v1 = vpop.permute.xlu1 %6767 }
 0x858   : > { %v6796_v11 = vrot.slane %v6768_v1, %v11706_v38 }
 0x85a   : > { %v6822_v42 = vsel %vm6821_vm8, %v6796_v11, %v6792_v12 }
 0x85b   : > { %v6774_v50 = vpop.permute.xlu1 %6773  ;;  %v6824_v24 = vsel %vm6823_vm9, %v6800_v14, %v6822_v42 }
 0x85c   : > { %v6804_v30 = vrot.slane %v6774_v50, %v11706_v38 }
 0x85e   : > { %v6826_v60 = vsel %vm6825_vm10, %v6804_v30, %v6824_v24 }
 0x85f   : > { %v6777_v28 = vpop.permute.xlu1 %6776 }
 0x860   : > { %v6808_v51 = vrot.slane %v6777_v28, %v11706_v38 }
 0x862   : > { %v6828_v22 = vsel %vm6827_vm11, %v6808_v51, %v6826_v60 }
 0x863   : > { %v6780_v8 = vpop.permute.xlu1 %6779 }
 0x864   : > { %v6812_v20 = vrot.slane %v6780_v8, %v11706_v38 }
 0x866   : > { %v6830_v5 = vsel %vm6829_vm12, %v6812_v20, %v6828_v22 }
 0x867   : > { %v6783_v53 = vpop.permute.xlu1 %6782 }
 0x868   : > { %v6816_v19 = vrot.slane %v6783_v53, %v11706_v38 }
 0x86a   : > { %v6832_v41 = vsel %vm6831_vm13, %v6816_v19, %v6830_v5 }
 0x86b   : > { %v6786_v32 = vpop.permute.xlu1 %6785 }
 0x86c   : > { %v6820_v48 = vrot.slane %v6786_v32, %v11706_v38 }
 0x86e   : > { %v6834_v31 = vsel %vm6833_vm14, %v6820_v48, %v6832_v41 }
 0x86f   : > { %v6837_v43 = vsel %vm6836_vm15, %v6834_v31, 0.0 }
 0x870   : > { %6838 = vadd.xlane.f32.xlu1 %v6837_v43 }
 0x8fd   : > { %v6839_v44 = vpop.xlane.xlu1 %6838 }
 0x8fe   : > { %v6840_v52 = vmul.f32 0.001953125, %v6839_v44 }
 0x900   : > { %v6861_v13 = vrot.slane %v6840_v52, %v6860_v39  ;;  %v6865_v6 = vrot.slane %v6840_v52, %v6864_v63  ;;  %v6869_v40 = vrot.slane %v6840_v52, %v6868_v33  ;;  %v6873_v23 = vrot.slane %v6840_v52, %v6872_v7 }
 0x901   : > { %v6845_v57 = vrot.slane %v6840_v52, %v6844_v35  ;;  %v6849_v29 = vrot.slane %v6840_v52, %v6848_v21  ;;  %v6853_v34 = vrot.slane %v6840_v52, %v6852_v3  ;;  %v6857_v55 = vrot.slane %v6840_v52, %v6856_v0 }
 0x902   : > { %v6892_v2 = vcombine.low %v6861_v13, %v6865_v6  ;;  %v6893_v26 = vcombine.low %v6869_v40, %v6873_v23 }
 0x903   : > { %v6874_v9 = vcombine.low %v6845_v57, %v6849_v29  ;;  %v6875_v59 = vcombine.low %v6853_v34, %v6857_v55 }
 0x904   : > { %v6900_v17 = vrot.slane %v6892_v2, %v11684_v47  ;;  %v6907_v62 = vrot.slane %v6893_v26, %v11684_v47 }
 0x905   : > { %v6882_v58 = vrot.slane %v6874_v9, %v11684_v47  ;;  %v6889_v54 = vrot.slane %v6875_v59, %v11684_v47 }
 0x906   : > { %v6908_v18 = vcombine.low %v6900_v17, %v6907_v62  ;;  %v6909_v10 = vcombine.high %v6900_v17, %v6907_v62 }
 0x907   : > { %v6890_v4 = vcombine.low %v6882_v58, %v6889_v54  ;;  %v6891_v1 = vcombine.high %v6882_v58, %v6889_v54 }
 0x908   : > { %v11753_v50 = vsub.f32 %v11664_v45, %v6908_v18  ;;  %v11756_v25 = vsub.f32 %v11668_v15, %v6909_v10 }
 0x909   : > { %v11759_v28 = vsub.f32 %v11660_v36, %v6890_v4  ;;  %v11762_v11 = vsub.f32 %v11662_v37, %v6891_v1 }
 0x90a   : > { %v6920_v8 = vmul.f32 %v11753_v50, %v11753_v50  ;;  %v6921_v12 = vmul.f32 %v11756_v25, %v11756_v25 }
 0x90b   : > { %v6918_v61 = vmul.f32 %v11759_v28, %v11759_v28  ;;  %v6919_v45 = vmul.f32 %v11762_v11, %v11762_v11 }
 0x90c   : > { %v6925_v15 = vadd.f32 %v6921_v12, %v6920_v8  ;;  %v7356_v8 = vld [vmem:[%s8360_s24 + $0x8] sm:$0xff] }
 0x90d   : > { %v6922_v42 = vadd.f32 %v6919_v45, %v6918_v61 }
 0x90e   : > { %6926 = vadd.xlane.f32.xlu1 %v6925_v15  ;;  %v7153_v15 = vld [vmem:[%s8355_s8] sm:$0xff] }
 0x90f   : > { %6923 = vadd.xlane.f32.xlu0 %v6922_v42  ;;  %v7164_v42 = vrot.slane %v7153_v15, %v11684_v47 }
 0x99b   : > { %v6927_v36 = vpop.xlane.xlu1 %6926 }
 0x99c   : > { %v6924_v30 = vpop.xlane.xlu0 %6923  ;;  %v6985_v51 = vrot.slane %v6927_v36, %v11689_v56  ;;  %v6964_v32 = vrot.slane %v6927_v36, %v11678_v16  ;;  %v6971_v48 = vrot.slane %v6927_v36, %v11681_v27  ;;  %v6978_v31 = vrot.slane %v6927_v36, %v11675_v49 }
 0x99d   : > { %v6936_v37 = vrot.slane %v6924_v30, %v11678_v16  ;;  %v6943_v14 = vrot.slane %v6924_v30, %v11681_v27  ;;  %v6950_v53 = vrot.slane %v6924_v30, %v11675_v49  ;;  %v6957_v19 = vrot.slane %v6924_v30, %v11689_v56 }
 0x99e   : > { %v7041_v60 = vrot.slane %v6985_v51, %v11684_v47  ;;  %v7020_v41 = vrot.slane %v6964_v32, %v11684_v47  ;;  %v7027_v56 = vrot.slane %v6971_v48, %v11684_v47  ;;  %v7034_v43 = vrot.slane %v6978_v31, %v11684_v47 }
 0x99f   : > { %v6999_v20 = vrot.slane %v6943_v14, %v11684_v47  ;;  %v6992_v24 = vrot.slane %v6936_v37, %v11684_v47  ;;  %v7006_v22 = vrot.slane %v6950_v53, %v11684_v47  ;;  %v7013_v5 = vrot.slane %v6957_v19, %v11684_v47 }
 0x9a0   : > { %v7172_v14 = vcombine.high %v7164_v42, %v7164_v42  ;;  %v7157_v51 = vcombine.high %v7153_v15, %v7153_v15 }
 0x9a1   : > { %7046 = vperm.xlu0 %7962, %v6999_v20   ;;  %7043 = vperm.xlu1 %7961, %v6992_v24  }
 0x9a2   : > { %v7171_v24 = vrot.slane %v7157_v51, %v11684_v47 }
 0x9a5   : > { %7064 = vperm.xlu0 %7962, %v7041_v60   ;;  %7049 = vperm.xlu1 %7961, %v7006_v22   ;;  %v7173_v22 = vcombine.high %v7171_v24, %v7171_v24 }
 0x9a9   : > { %7052 = vperm.xlu1 %7961, %v7013_v5  }
 0x9ad   : > { %7055 = vperm.xlu1 %7961, %v7020_v41  }
 0x9b1   : > { %7058 = vperm.xlu1 %7961, %v7027_v56  }
 0x9b5   : > { %7061 = vperm.xlu1 %7961, %v7034_v43  }
 0xa20   : > { %v7044_v44 = vpop.permute.xlu1 %7043  ;;  %v7047_v6 = vpop.permute.xlu0 %7046 }
 0xa21   : > { %v7073_v23 = vrot.slane %v7047_v6, %v11706_v38  ;;  %v7069_v27 = vrot.slane %v7044_v44, %v11706_v38  ;;  %v7355_v6 = vld [vmem:[%s8360_s24] sm:$0xff]  ;;  %s7801_s24 = sshll.u32 %s8122_s21, 2 }
 0xa23   : > { %v7098_v55 = vsel %vm6821_vm8, %v7073_v23, %v7069_v27 }
 0xa24   : > { %v7050_v52 = vpop.permute.xlu1 %7049  ;;  %v7065_v26 = vpop.permute.xlu0 %7064 }
 0xa25   : > { %v7077_v57 = vrot.slane %v7050_v52, %v11706_v38  ;;  %v7097_v54 = vrot.slane %v7065_v26, %v11706_v38 }
 0xa27   : > { %v7099_v9 = vsel %vm6823_vm9, %v7077_v57, %v7098_v55 }
 0xa28   : > { %v7053_v13 = vpop.permute.xlu1 %7052 }
 0xa29   : > { %v7081_v29 = vrot.slane %v7053_v13, %v11706_v38 }
 0xa2b   : > { %v7100_v59 = vsel %vm6825_vm10, %v7081_v29, %v7099_v9 }
 0xa2c   : > { %v7056_v40 = vpop.permute.xlu1 %7055 }
 0xa2d   : > { %v7085_v34 = vrot.slane %v7056_v40, %v11706_v38 }
 0xa2f   : > { %v7101_v62 = vsel %vm6827_vm11, %v7085_v34, %v7100_v59 }
 0xa30   : > { %v7059_v49 = vpop.permute.xlu1 %7058 }
 0xa31   : > { %v7089_v2 = vrot.slane %v7059_v49, %v11706_v38 }
 0xa33   : > { %v7102_v18 = vsel %vm6829_vm12, %v7089_v2, %v7101_v62 }
 0xa34   : > { %v7062_v17 = vpop.permute.xlu1 %7061 }
 0xa35   : > { %v7093_v58 = vrot.slane %v7062_v17, %v11706_v38 }
 0xa37   : > { %v7103_v10 = vsel %vm6831_vm13, %v7093_v58, %v7102_v18 }
 0xa38   : > { %v7104_v4 = vsel %vm6833_vm14, %v7097_v54, %v7103_v10 }
 0xa39   : > { %v7106_v1 = vsel %vm6836_vm15, %v7104_v4, 0.0 }
 0xa3a   : > { %7107 = vadd.xlane.f32.xlu1 %v7106_v1 }
 0xa4b   : > { %7364 = vperm.xlu1 %7961, %v7356_v8  }
 0xac7   : > { %v7108_v12 = vpop.xlane.xlu1 %7107 }
 0xac8   : > { %v7109_v61 = vmul.f32 0.001953125, %v7108_v12 }
 0xaca   : > { %v7110_v45 = vadd.f32 1e-05, %v7109_v61 }
 0xacc   : > { %7968 = vrsqrt.f32 %v7110_v45 }
 0xad6   : > { %v7969_v38 = vpop.eup %7968 }
 0xad7   : > { %v7116_v36 = vrot.slane %v7969_v38, %v6844_v35  ;;  %v7120_v37 = vrot.slane %v7969_v38, %v6848_v21  ;;  %v7124_v20 = vrot.slane %v7969_v38, %v6852_v3  ;;  %v7128_v60 = vrot.slane %v7969_v38, %v6856_v0  ;;  %v7154_v35 = vld [vmem:[%s8355_s8 + $0x8] sm:$0xff]  ;;  %s7417_s8 = sadd.s32 %s7801_s24, %s7763_s5 }
 0xad8   : > { %v7132_v21 = vrot.slane %v7969_v38, %v6860_v39  ;;  %v7181_v5 = vrot.slane %v7154_v35, %v11684_v47  ;;  %v7136_v3 = vrot.slane %v7969_v38, %v6864_v63  ;;  %v7174_v31 = vcombine.high %v7154_v35, %v7154_v35  ;;  %s7764_s0 = sshll.u32 %s7417_s8, 7 }
 0xad9   : > { %v7199_v30 = vmul.f32 %v7164_v42, %v7116_v36  ;;  %v7200_v53 = vmul.f32 %v7172_v14, %v7120_v37  ;;  %v7201_v19 = vmul.f32 %v7171_v24, %v7124_v20  ;;  %v7202_v32 = vmul.f32 %v7173_v22, %v7128_v60  ;;  %s11852_s21 = scalar_lea.hbm %s11925_s4, %s7764_s0 }
 0xada   : > { %v7203_v48 = vmul.f32 %v7181_v5, %v7132_v21  ;;  %v7189_v41 = vcombine.high %v7181_v5, %v7181_v5  ;;  %v7140_v0 = vrot.slane %v7969_v38, %v6868_v33  ;;  %v7188_v43 = vrot.slane %v7174_v31, %v11684_v47 }
 0xadb   : > { %7209 = vperm.xlu0 %7962, %v7199_v30   ;;  %v7144_v39 = vrot.slane %v7969_v38, %v6872_v7 }
 0xadc   : > { %v7204_v56 = vmul.f32 %v7189_v41, %v7136_v3  ;;  %v7205_v44 = vmul.f32 %v7188_v43, %v7140_v0  ;;  %v7190_v52 = vcombine.high %v7188_v43, %v7188_v43 }
 0xade   : > { %v7206_v13 = vmul.f32 %v7190_v52, %v7144_v39 }
 0xadf   : > { %7221 = vperm.xlu0 %7962, %v7200_v53   ;;  %v7365_v53 = vpop.permute.xlu1 %7364 }
 0xae3   : > { %7233 = vperm.xlu0 %7962, %v7201_v19  }
 0xae7   : > { %7245 = vperm.xlu0 %7962, %v7202_v32  }
 0xaeb   : > { %7257 = vperm.xlu0 %7962, %v7203_v48  }
 0xaef   : > { %7269 = vperm.xlu0 %7962, %v7204_v56  }
 0xaf3   : > { %7281 = vperm.xlu0 %7962, %v7205_v44  }
 0xaf7   : > { %7293 = vperm.xlu0 %7962, %v7206_v13  }
 0xafb   : > { %7359 = vperm.xlu0 %7962, %v7355_v6  }
 0xb5a   : > { %v7210_v63 = vpop.permute.xlu0 %7209 }
 0xb5b   : > { %v7218_v46 = vrot.slane %v7210_v63, %v11678_v16 }
 0xb5e   : > { %v7222_v40 = vpop.permute.xlu0 %7221 }
 0xb5f   : > { %v7230_v29 = vrot.slane %v7222_v40, %v11678_v16 }
 0xb61   : > { %v7311_v55 = vcombine.low %v7218_v46, %v7230_v29 }
 0xb62   : > { %v7234_v23 = vpop.permute.xlu0 %7233 }
 0xb63   : > { %v7242_v49 = vrot.slane %v7234_v23, %v11678_v16  ;;  %v7319_v9 = vrot.slane %v7311_v55, %v11684_v47 }
 0xb66   : > { %v7246_v27 = vpop.permute.xlu0 %7245 }
 0xb67   : > { %v7254_v57 = vrot.slane %v7246_v27, %v11678_v16 }
 0xb69   : > { %v7312_v7 = vcombine.low %v7242_v49, %v7254_v57 }
 0xb6a   : > { %v7258_v33 = vpop.permute.xlu0 %7257 }
 0xb6b   : > { %v7326_v2 = vrot.slane %v7312_v7, %v11684_v47  ;;  %v7266_v17 = vrot.slane %v7258_v33, %v11678_v16 }
 0xb6d   : > { %v7327_v62 = vcombine.low %v7319_v9, %v7326_v2  ;;  %v7328_v58 = vcombine.high %v7319_v9, %v7326_v2 }
 0xb6e   : > { %v7270_v34 = vpop.permute.xlu0 %7269 }
 0xb6f   : > { %v7278_v59 = vrot.slane %v7270_v34, %v11678_v16  ;;  %v7351_v8 = vmul.f32 %v7327_v62, %v11759_v28  ;;  %v7352_v12 = vmul.f32 %v7328_v58, %v11762_v11 }
 0xb71   : > { %v7329_v18 = vcombine.low %v7266_v17, %v7278_v59 }
 0xb72   : > { %v7282_v26 = vpop.permute.xlu0 %7281 }
 0xb73   : > { %v7290_v10 = vrot.slane %v7282_v26, %v11678_v16  ;;  %v7337_v45 = vrot.slane %v7329_v18, %v11684_v47 }
 0xb76   : > { %v7294_v54 = vpop.permute.xlu0 %7293 }
 0xb77   : > { %v7302_v4 = vrot.slane %v7294_v54, %v11678_v16 }
 0xb79   : > { %v7330_v1 = vcombine.low %v7290_v10, %v7302_v4 }
 0xb7a   : > { %v7360_v61 = vpop.permute.xlu0 %7359 }
 0xb7b   : > { %v7344_v15 = vrot.slane %v7330_v1, %v11684_v47  ;;  %v7367_v42 = vadd.f32 %v7360_v61, %v7351_v8  ;;  %v7368_v38 = vadd.f32 %v7360_v61, %v7352_v12 }
 0xb7d   : > { %v7345_v36 = vcombine.low %v7337_v45, %v7344_v15  ;;  %v7346_v30 = vcombine.high %v7337_v45, %v7344_v15  ;;  %v7756_v37 = vmul.f32 -1.442695, %v7367_v42  ;;  %v7757_v14 = vmul.f32 -1.442695, %v7368_v38 }
 0xb7f   : > { %v7353_v51 = vmul.f32 %v7345_v36, %v11753_v50  ;;  %v7354_v16 = vmul.f32 %v7346_v30, %v11756_v25  ;;  %7970 = vpow2.f32 %v7756_v37 }
 0xb80   : > { %7972 = vpow2.f32 %v7757_v14 }
 0xb81   : > { %v7369_v28 = vadd.f32 %v7365_v53, %v7353_v51  ;;  %v7370_v11 = vadd.f32 %v7365_v53, %v7354_v16 }
 0xb83   : > { %v7758_v20 = vmul.f32 -1.442695, %v7369_v28  ;;  %v7759_v24 = vmul.f32 -1.442695, %v7370_v11 }
 0xb85   : > { %7974 = vpow2.f32 %v7758_v20 }
 0xb86   : > { %7976 = vpow2.f32 %v7759_v24 }
 0xb89   : > { %v7971_v47 = vpop.eup %7970 }
 0xb8a   : > { %v7973_v19 = vpop.eup %7972  ;;  %v7383_v60 = vadd.f32 1.0, %v7971_v47 }
 0xb8b   : > { %v7384_v22 = vadd.f32 1.0, %v7973_v19 }
 0xb8c   : > { %7978 = vrcp.f32 %v7383_v60 }
 0xb8d   : > { %7980 = vrcp.f32 %v7384_v22 }
 0xb8f   : > { %v7975_v50 = vpop.eup %7974 }
 0xb90   : > { %v7977_v25 = vpop.eup %7976  ;;  %v7385_v35 = vadd.f32 1.0, %v7975_v50 }
 0xb91   : > { %v7386_v32 = vadd.f32 1.0, %v7977_v25 }
 0xb92   : > { %7982 = vrcp.f32 %v7385_v35 }
 0xb93   : > { %7984 = vrcp.f32 %v7386_v32 }
 0xb96   : > { %v7979_v21 = vpop.eup %7978 }
 0xb97   : > { %v7981_v5 = vpop.eup %7980  ;;  %v7395_v48 = vmul.f32 %v7979_v21, %v7367_v42 }
 0xb98   : > { %v7396_v3 = vmul.f32 %v7981_v5, %v7368_v38 }
 0xb99   : > { %7399 = vst [vmem:[%s8362_s23] sm:$0xff] %v7395_v48 }
 0xb9a   : > { %7400 = vst [vmem:[%s8362_s23 + $0x8] sm:$0xff] %v7396_v3 }
 0xb9c   : > { %v7983_v41 = vpop.eup %7982 }
 0xb9d   : > { %v7985_v31 = vpop.eup %7984  ;;  %v7397_v56 = vmul.f32 %v7983_v41, %v7369_v28 }
 0xb9e   : > { %v7398_v0 = vmul.f32 %v7985_v31, %v7370_v11 }
 0xb9f   : > { %7401 = vst [vmem:[%s8362_s23 + $0x10] sm:$0xff] %v7397_v56 }
 0xba0   : > { %7402 = vst [vmem:[%s8362_s23 + $0x18] sm:$0xff] %v7398_v0 }
 0xba1   : > { %8029 = shalt.err (!%p8026_p11)
}
 0xba2   : > { %s8030_s23 = scalar_lea.hbm %s11852_s21, 512  ;;  %s8034_s26 = scalar_lea.hbm %s11925_s4, 2048 }
 0xba3   : > { %p8031_p13 = scmp.ne.s32.totalorder %s11852_s21, %s8030_s23  ;;  %p8035_p10 = scmp.lt.u32.totalorder %s11852_s21, %s11925_s4 }
 0xba4   : > { %p8036_p12 = scmp.lt.u32.totalorder %s8034_s26, %s8030_s23  ;;  %p8038_p2 = scmp.lt.u32.totalorder %s8030_s23, %s11852_s21 }
 0xba5   : > { %p8032_p5 = pnand %p8031_p13, %p12579_p4 }
 0xba6   : > { %p8037_p7 = por %p8036_p12, %p8035_p10 }
 0xba7   : > { %p8033_p8 = pneg %p8032_p5 }
 0xba8   : > { %p8039_p0 = por %p8038_p2, %p8037_p7 }
 0xbaa   : > { %p8040_p1 = pnand %p8039_p0, %p8033_p8 }
 0xbac   : > { %8043 = shalt.err (!%p8040_p1)
}
 0xbad   : > { %s8163_s8 = smov 256   ;;  %s8164_s0 = smov 16  }
 0xbae   : > { %7804 = dma.vmem_to_hbm [thread:$0]  (%p12579_p4), %s11854_s9, 512, %s11852_s21, %s11860_s22, %s8163_s8, %s8163_s8, %s8164_s0  }
 0xbaf PF: > { %p7815_p6 = scmp.ge.s32.totalorder %s8138_s25, 2  ;;  %s7435_s29 = sand.u32 1, %s8098_s15  }
 0xbb0   : > { %p12580_p9 = scmp.ne.s32.totalorder %s12180_s14, 0  ;;  %s7436_s7 = scalar_lea.sflag [#allocation6], %s7435_s29 }
 0xbb2   : > { %p7811_p3 = pnand %p7815_p6, %p12580_p9 }
 0xbb4   : > { %8093 = dma.done.wait (!%p7811_p3), %s7436_s7, 512  }
 0xbb5   : > { %8095 = vsyncadd (!%p7811_p3), %s7436_s7, 4294966784  ;;  %s20_s25 = sadd.s32 1, %s8138_s25   ;;  %s12581_s21 = sld [smem:[#allocation10_spill]] }
 0xbb6   : > { %p17_p11 = scmp.ge.s32.totalorder %s20_s25, 6   ;;  %s12582_s22 = sld [smem:[#allocation11_spill]] }
 0xbb7   : > { %s12583_s23 = sld [smem:[#allocation12_spill]]  ;;  %s12584_s24 = sld [smem:[#allocation13_spill]] }
 0xbb8   : > { %s12585_s15 = smov %s8102_s16  ;;  %s12586_s16 = smov %s8106_s17 }
 0xbb9   : > { %s12587_s17 = smov %s8280_s13  ;;  %s12588_s18 = smov %s8114_s19 }
 0xbba   : > { %s12589_s19 = smov %s8118_s20  ;;  %s12590_s20 = smov %s8277_s12 }
 0xbbb   :  { %19 = sbr.rel (!%p17_p11) target bundleno = 11 (0xb), region = 94 }
 0xbc2   :  { %7441 = vsyncpa [#allocation5], 1 }
 0xbc3   :  { %7443 = vsyncpa [#allocation5 + $0x1], 1 }
 0xbc4   :  { %7444 = vsyncpa [#allocation6], 1 }
 0xbc5   :  { %7446 = vsyncpa [#allocation6 + $0x1], 1 }

</bundles_post_ra>
